<compile_context>
chip_gen: v6e
topology: v6e:2x2x1
jax: 0.10.0
libtpu: 0.0.40
codegen_flags: <defaults>
</compile_context>

<pallas_src>
import functools

import jax
import jax.numpy as jnp
from jax.experimental import pallas as pl
from jax.experimental.pallas import tpu as pltpu  # noqa: F401  (TPU backend)

F32 = jnp.float32

# ----------------------------- small configs -----------------------------
BATCH = 2
IN_CHANNELS = 1          # temporal_encoder_config['in_channels']
SEQ_LEN = 32             # temporal_encoder_config['seq_len'] (small)
BASE_CHANNELS = 8
SCALES = (3, 5, 7)
TEMP_OUT = 64            # temporal_encoder_config['output_dim']

PATCH_SIZE = 8           # semantic_encoder_config['patch_size'] (overlap=0)
EMBED_DIM = 32
SEM_NHEAD = 4
SEM_FF = 64
SEM_LAYERS = 1
SEM_OUT = 64             # semantic_encoder_config['output_dim']

FUSION_DIM = 64          # fusion_config['fusion_dim']

FC_HIDDEN = 128          # forecasting_config['hidden_dim']
FORECAST_LEN = 16
NUM_VARS = IN_CHANNELS

OPT_HIDDEN = 128         # optimizer_config['hidden_dim']
VOCAB = 256              # llm_config['vocab_size'] (small)

D_MODEL = 32             # llm_config['d_model']
LLM_NHEADS = 4
LLM_FF = 64
LLM_LAYERS = 2


# ----------------------------- in-kernel math helpers -----------------------------
def _ln(x, g, b, eps=1e-5):
    mu = jnp.mean(x, axis=-1, keepdims=True)
    xc = x - mu
    var = jnp.mean(xc * xc, axis=-1, keepdims=True)
    return xc * jax.lax.rsqrt(var + eps) * g + b


def _gelu(x):
    # TODO(synk): PyTorch nn.GELU defaults to exact erf; tanh approximation is
    # used here because erf is not guaranteed to lower in Mosaic.
    return jax.nn.gelu(x, approximate=True)


def _mha_2d(q, k, v, *, n_heads, batch, seq):
    """Multi-head self-attention on flat [batch*seq, E] operands.

    Heads are selected with full-width lane masks so every matmul contracts
    over the full E dimension (no 8-lane per-head slices, no transposes).
    """
    E = q.shape[-1]
    dh = E // n_heads
    scale = 1.0 / float(dh) ** 0.5
    col = jax.lax.broadcasted_iota(jnp.int32, (1, E), 1)
    out_rows = []
    for b in range(batch):
        r0 = b * seq
        qb = q[r0:r0 + seq, :]
        kb = k[r0:r0 + seq, :]
        vb = v[r0:r0 + seq, :]
        head_outs = []
        for h in range(n_heads):
            m = ((col >= h * dh) & (col < (h + 1) * dh)).astype(jnp.float32)  # [1, E]
            s = jax.lax.dot_general(qb * m, kb, (((1,), (1,)), ((), ())),
                                    preferred_element_type=jnp.float32) * scale
            s = s - jnp.max(s, axis=-1, keepdims=True)
            p = jnp.exp(s)
            p = p / jnp.sum(p, axis=-1, keepdims=True)
            # v masked to this head's columns -> output lands in those columns.
            head_outs.append(jnp.dot(p, vb * m, preferred_element_type=jnp.float32))
        ob = head_outs[0]
        for ho in head_outs[1:]:
            ob = ob + ho
        out_rows.append(ob)
    return out_rows[0] if batch == 1 else jnp.concatenate(out_rows, axis=0)


def _encoder_layer_math(x, wqkv, bqkv, wo, bo, g1, b1, ffw1, ffb1, ffw2, ffb2, g2, b2,
                        *, n_heads, batch, seq):
    """Post-LN PyTorch-style TransformerEncoderLayer on a flat [batch*seq, E] slab."""
    E = x.shape[-1]
    qkv = jnp.dot(x, wqkv, preferred_element_type=jnp.float32) + bqkv     # fused QKV
    q = qkv[:, :E]
    k = qkv[:, E:2 * E]
    v = qkv[:, 2 * E:3 * E]
    if seq == 1:
        attn = v              # softmax over a single key is identically 1 -> out == V
    else:
        attn = _mha_2d(q, k, v, n_heads=n_heads, batch=batch, seq=seq)
    proj = jnp.dot(attn, wo, preferred_element_type=jnp.float32) + bo
    h1 = _ln(x + proj, g1, b1)
    ff = jnp.maximum(jnp.dot(h1, ffw1, preferred_element_type=jnp.float32) + ffb1, 0.0)
    ff = jnp.dot(ff, ffw2, preferred_element_type=jnp.float32) + ffb2
    return _ln(h1 + ff, g2, b2)


# ----------------------------- Pallas kernels -----------------------------
def _temporal_kernel(cols_ref, wconv_ref, bconv_ref, poolw_ref, projw_ref,
                     projb_ref, o_ref, *, batch, length):
    """Multi-scale conv (block-diag matmul) + attention pooling + projection."""
    f = jnp.maximum(
        jnp.dot(cols_ref[...], wconv_ref[...], preferred_element_type=jnp.float32)
        + bconv_ref[...], 0.0)                                   # [B*L, C_total]
    pw = poolw_ref[...]                                          # [1, C_total]
    pooled = []
    for b in range(batch):
        fb = f[b * length:(b + 1) * length, :]                   # [L, C_total]
        sc = jnp.sum(fb * pw, axis=-1, keepdims=True)            # [L, 1]
        sc = sc - jnp.max(sc, axis=0, keepdims=True)
        p = jnp.exp(sc)
        p = p / jnp.sum(p, axis=0, keepdims=True)
        pooled.append(jnp.sum(fb * p, axis=0, keepdims=True))    # [1, C_total]
    pooled = pooled[0] if batch == 1 else jnp.concatenate(pooled, axis=0)
    o_ref[...] = (jnp.dot(pooled, projw_ref[...], preferred_element_type=jnp.float32)
                  + projb_ref[...]).astype(o_ref.dtype)


def _semantic_kernel(patches_ref, embw_ref, embb_ref,
                     wqkv_ref, bqkv_ref, wo_ref, bo_ref, g1_ref, b1_ref,
                     ffw1_ref, ffb1_ref, ffw2_ref, ffb2_ref, g2_ref, b2_ref,
                     outw_ref, outb_ref, o_ref, *, batch, seq, n_heads, n_layers):
    """Patch embedding (+pos) -> transformer encoder layer(s) -> mean pool -> proj."""
    x = (jnp.dot(patches_ref[...], embw_ref[...], preferred_element_type=jnp.float32)
         + embb_ref[...])                                        # [B*P, E]  (pos folded in)
    for l in range(n_layers):
        x = _encoder_layer_math(
            x, wqkv_ref[l], bqkv_ref[l], wo_ref[l], bo_ref[l],
            g1_ref[l], b1_ref[l], ffw1_ref[l], ffb1_ref[l],
            ffw2_ref[l], ffb2_ref[l], g2_ref[l], b2_ref[l],
            n_heads=n_heads, batch=batch, seq=seq)
    rows = [jnp.mean(x[b * seq:(b + 1) * seq, :], axis=0, keepdims=True)
            for b in range(batch)]
    pooled = rows[0] if batch == 1 else jnp.concatenate(rows, axis=0)   # [B, E]
    o_ref[...] = (jnp.dot(pooled, outw_ref[...], preferred_element_type=jnp.float32)
                  + outb_ref[...]).astype(o_ref.dtype)


def _head_kernel(t_ref, s_ref, fw1_ref, fb1_ref, fw2_ref, fb2_ref, fwr_ref, fbr_ref,
                 lng_ref, lnb_ref, h1w_ref, h1b_ref, cw2_ref, cb2_ref, pw2_ref, pb2_ref,
                 fused_ref, fc_ref, prompt_ref, *, fc_hidden):
    """CrossModalityFusion + ForecastingHead + PromptOptimizer in one kernel."""
    t = t_ref[...]
    s = s_ref[...]
    x = jnp.concatenate([t, s], axis=-1)                                    # [B, 128]
    h = _gelu(jnp.dot(x, fw1_ref[...], preferred_element_type=jnp.float32) + fb1_ref[...])
    h = jnp.dot(h, fw2_ref[...], preferred_element_type=jnp.float32) + fb2_ref[...]
    h = h + jnp.dot(t, fwr_ref[...], preferred_element_type=jnp.float32) + fbr_ref[...]
    fused = _ln(h, lng_ref[...], lnb_ref[...])
    fused_ref[...] = fused.astype(fused_ref.dtype)
    # concatenated forecast|prompt first layers -> one lane-dense [B, 256] matmul
    hh = _gelu(jnp.dot(fused, h1w_ref[...], preferred_element_type=jnp.float32)
               + h1b_ref[...])
    fh = hh[:, :fc_hidden]
    ph = hh[:, fc_hidden:]
    fc_ref[...] = (jnp.dot(fh, cw2_ref[...], preferred_element_type=jnp.float32)
                   + cb2_ref[...]).astype(fc_ref.dtype)
    prompt_ref[...] = (jnp.dot(ph, pw2_ref[...], preferred_element_type=jnp.float32)
                       + pb2_ref[...]).astype(prompt_ref.dtype)


def _llm_kernel(emb_ref, wqkv_ref, bqkv_ref, wo_ref, bo_ref, g1_ref, b1_ref,
                ffw1_ref, ffb1_ref, ffw2_ref, ffb2_ref, g2_ref, b2_ref,
                outw_ref, outb_ref, logits_ref, hidden_ref,
                *, batch, seq, n_heads, n_layers):
    """SimpleTransformer: n_layers encoder layers + output projection to vocab."""
    x = emb_ref[...]                                             # [B*S, D_MODEL]
    for l in range(n_layers):
        x = _encoder_layer_math(
            x, wqkv_ref[l], bqkv_ref[l], wo_ref[l], bo_ref[l],
            g1_ref[l], b1_ref[l], ffw1_ref[l], ffb1_ref[l],
            ffw2_ref[l], ffb2_ref[l], g2_ref[l], b2_ref[l],
            n_heads=n_heads, batch=batch, seq=seq)
    hidden_ref[...] = x.astype(hidden_ref.dtype)
    logits_ref[...] = (jnp.dot(x, outw_ref[...], preferred_element_type=jnp.float32)
                       + outb_ref[...]).astype(logits_ref.dtype)


def _mlp_head_kernel(x_ref, w1_ref, b1_ref, w2_ref, b2_ref, o_ref):
    """Fallback gelu-MLP head (used only when semantic features are absent)."""
    h = _gelu(jnp.dot(x_ref[...], w1_ref[...], preferred_element_type=jnp.float32)
              + b1_ref[...])
    o_ref[...] = (jnp.dot(h, w2_ref[...], preferred_element_type=jnp.float32)
                  + b2_ref[...]).astype(o_ref.dtype)


# ----------------------------- wrappers (pallas_call) -----------------------------
# All kernels are single-invocation (no grid): every operand is tiny and mapped
# whole into VMEM, so per-step pipeline bookkeeping and double buffering are skipped.

def _im2col_multiscale(x, scales):
    """x: [B, C, L] -> [B*L, C*sum(scales)]; per-scale 'same' windows concatenated."""
    B, C, L = x.shape
    slabs = []
    for k in scales:
        pad = k // 2
        xp = jnp.pad(x, ((0, 0), (0, 0), (pad, pad)))
        cols = jnp.stack([xp[:, :, j:j + L] for j in range(k)], axis=-1)  # [B,C,L,k]
        slabs.append(jnp.transpose(cols, (0, 2, 1, 3)).reshape(B * L, C * k))
    return jnp.concatenate(slabs, axis=-1)


def temporal_encoder(params, x):
    B, C, L = x.shape
    cols = _im2col_multiscale(x, SCALES)                         # glue im2col
    return pl.pallas_call(
        functools.partial(_temporal_kernel, batch=B, length=L),
        out_shape=jax.ShapeDtypeStruct((B, TEMP_OUT), F32),
    )(cols, params["conv_w"], params["conv_b"], params["pool_w"],
      params["proj_w"], params["proj_b"])


def semantic_encoder(params, x):
    B, C, L = x.shape
    P = L // PATCH_SIZE
    patches = x.reshape(B, C, P, PATCH_SIZE)
    patches = jnp.transpose(patches, (0, 2, 1, 3)).reshape(B * P, C * PATCH_SIZE)
    # fold positional embedding into the embedding bias (tiny glue add)
    emb_bias = params["embed_b"] + jnp.tile(params["pos"], (B, 1))        # [B*P, E]
    lyr = params["layers"]
    return pl.pallas_call(
        functools.partial(_semantic_kernel, batch=B, seq=P,
                          n_heads=SEM_NHEAD, n_layers=SEM_LAYERS),
        out_shape=jax.ShapeDtypeStruct((B, SEM_OUT), F32),
    )(patches, params["embed_w"], emb_bias,
      lyr["wqkv"], lyr["bqkv"], lyr["wo"], lyr["bo"], lyr["ln1g"], lyr["ln1b"],
      lyr["w1"], lyr["b1"], lyr["w2"], lyr["b2"], lyr["ln2g"], lyr["ln2b"],
      params["out_w"], params["out_b"])


def fused_heads(params, t, s):
    """fusion_module + forecasting_head + prompt_optimizer in one pallas_call."""
    f = params["fusion"]
    c = params["forecast"]
    p = params["prompt"]
    h1w = jnp.concatenate([c["w1"], p["w1"]], axis=1)            # [64, 256]
    h1b = jnp.concatenate([c["b1"], p["b1"]], axis=1)            # [1, 256]
    B = t.shape[0]
    fused, fc_flat, prompt_logits = pl.pallas_call(
        functools.partial(_head_kernel, fc_hidden=FC_HIDDEN),
        out_shape=(jax.ShapeDtypeStruct((B, FUSION_DIM), F32),
                   jax.ShapeDtypeStruct((B, FORECAST_LEN * NUM_VARS), F32),
                   jax.ShapeDtypeStruct((B, VOCAB), F32)),
    )(t, s, f["w1"], f["b1"], f["w2"], f["b2"], f["wres"], f["bres"],
      f["ln_g"], f["ln_b"], h1w, h1b, c["w2"], c["b2"], p["w2"], p["b2"])
    return fused, fc_flat, prompt_logits


def forecasting_head_only(params, fused):
    fc_flat = pl.pallas_call(
        _mlp_head_kernel,
        out_shape=jax.ShapeDtypeStruct((fused.shape[0], FORECAST_LEN * NUM_VARS), F32),
    )(fused, params["w1"], params["b1"], params["w2"], params["b2"])
    return fc_flat


def simple_llm(params, input_ids, attention_mask=None):
    # TODO(synk): src_key_padding_mask / attention_mask is ignored — the generated
    # prompt sequence has length 1 and no padding.
    emb = jnp.take(params["embedding"], input_ids, axis=0)       # [B, S, D] gather glue
    B, S, D = emb.shape
    lyr = params["layers"]
    logits, hidden = pl.pallas_call(
        functools.partial(_llm_kernel, batch=B, seq=S,
                          n_heads=LLM_NHEADS, n_layers=LLM_LAYERS),
        out_shape=(jax.ShapeDtypeStruct((B * S, VOCAB), F32),
                   jax.ShapeDtypeStruct((B * S, D), F32)),
    )(emb.reshape(B * S, D),
      lyr["wqkv"], lyr["bqkv"], lyr["wo"], lyr["bo"], lyr["ln1g"], lyr["ln1b"],
      lyr["w1"], lyr["b1"], lyr["w2"], lyr["b2"], lyr["ln2g"], lyr["ln2b"],
      params["out_w"], params["out_b"])
    return {"logits": logits.reshape(B, S, VOCAB),
            "hidden_states": hidden.reshape(B, S, D),
            "embeddings": emb}


# ----------------------------- forward pass -----------------------------
def integrated_forward(params, time_series_input, time_features=None,
                       llm_input_ids=None, attention_mask=None, mode="integrated"):
    x = time_series_input
    if x.shape[1] != IN_CHANNELS:                                # accept [B, L, C] too
        x = jnp.transpose(x, (0, 2, 1))

    temporal_features = temporal_encoder(params["temporal"], x)

    if mode in ("integrated", "train"):
        semantic_features = semantic_encoder(params["semantic"], x)
    else:
        semantic_features = None

    if semantic_features is not None:
        fused_features, forecast_flat, prompt_logits = fused_heads(
            params, temporal_features, semantic_features)
    else:
        fused_features = temporal_features
        forecast_flat = forecasting_head_only(params["forecast"], fused_features)
        prompt_logits = None

    forecast = forecast_flat.reshape(-1, FORECAST_LEN, NUM_VARS)

    prompt_tokens = None
    if mode == "integrated" and prompt_logits is not None:
        prompt_tokens = jnp.argmax(prompt_logits, axis=1)        # glue argmax
        if llm_input_ids is None:
            llm_input_ids = prompt_tokens[:, None]

    llm_outputs = None
    if mode in ("integrated", "llm") and llm_input_ids is not None:
        llm_outputs = simple_llm(params["llm"], llm_input_ids, attention_mask)

    if mode == "forecast":
        return forecast
    if mode == "llm":
        return llm_outputs
    if mode == "integrated":
        return {"forecast": forecast, "prompt_logits": prompt_logits,
                "prompt_tokens": prompt_tokens, "llm_outputs": llm_outputs}
    return {"forecast": forecast, "prompt_logits": prompt_logits,
            "temporal_features": temporal_features, "semantic_features": semantic_features,
            "fused_features": fused_features, "llm_outputs": llm_outputs}


# ----------------------------- parameter init -----------------------------
def _dense_init(key, fan_in, fan_out):
    kw, kb = jax.random.split(key)
    scale = 1.0 / float(max(fan_in, 1)) ** 0.5
    w = (scale * jax.random.normal(kw, (fan_in, fan_out))).astype(F32)
    b = (scale * jax.random.normal(kb, (1, fan_out))).astype(F32)
    return w, b


def _encoder_stack_params(key, n_layers, d_model, d_ff):
    """Transformer encoder layers with fused-QKV weights, stacked on a leading layer axis."""
    def one(k):
        ks = jax.random.split(k, 6)
        wq, bq = _dense_init(ks[0], d_model, d_model)
        wk, bk = _dense_init(ks[1], d_model, d_model)
        wv, bv = _dense_init(ks[2], d_model, d_model)
        wo, bo = _dense_init(ks[3], d_model, d_model)
        w1, b1 = _dense_init(ks[4], d_model, d_ff)
        w2, b2 = _dense_init(ks[5], d_ff, d_model)
        return {
            "wqkv": jnp.concatenate([wq, wk, wv], axis=1),       # [E, 3E]
            "bqkv": jnp.concatenate([bq, bk, bv], axis=1),       # [1, 3E]
            "wo": wo, "bo": bo,
            "ln1g": jnp.ones((1, d_model), F32), "ln1b": jnp.zeros((1, d_model), F32),
            "w1": w1, "b1": b1, "w2": w2, "b2": b2,
            "ln2g": jnp.ones((1, d_model), F32), "ln2b": jnp.zeros((1, d_model), F32),
        }
    layers = [one(k) for k in jax.random.split(key, n_layers)]
    return jax.tree_util.tree_map(lambda *xs: jnp.stack(xs, axis=0), *layers)


def init_params(key):
    keys = jax.random.split(key, 24)
    ki = iter(keys)

    # temporal encoder: block-diagonal multi-scale conv weight [sum(C*k), 3*base]
    ck_total = IN_CHANNELS * sum(SCALES)
    c_total = BASE_CHANNELS * len(SCALES)
    conv_w = jnp.zeros((ck_total, c_total), F32)
    conv_b_parts = []
    row = 0
    for i, k in enumerate(SCALES):
        w, b = _dense_init(next(ki), IN_CHANNELS * k, BASE_CHANNELS)
        conv_w = conv_w.at[row:row + IN_CHANNELS * k,
                           i * BASE_CHANNELS:(i + 1) * BASE_CHANNELS].set(w)
        conv_b_parts.append(b)
        row += IN_CHANNELS * k
    conv_b = jnp.concatenate(conv_b_parts, axis=1)
    pool_w = (jax.random.normal(next(ki), (1, c_total)) / float(c_total) ** 0.5).astype(F32)
    proj_w, proj_b = _dense_init(next(ki), c_total, TEMP_OUT)
    temporal = {"conv_w": conv_w, "conv_b": conv_b, "pool_w": pool_w,
                "proj_w": proj_w, "proj_b": proj_b}

    # semantic encoder
    P = SEQ_LEN // PATCH_SIZE
    embed_w, embed_b = _dense_init(next(ki), IN_CHANNELS * PATCH_SIZE, EMBED_DIM)
    pos = (0.02 * jax.random.normal(next(ki), (P, EMBED_DIM))).astype(F32)
    sem_layers = _encoder_stack_params(next(ki), SEM_LAYERS, EMBED_DIM, SEM_FF)
    out_w, out_b = _dense_init(next(ki), EMBED_DIM, SEM_OUT)
    semantic = {"embed_w": embed_w, "embed_b": embed_b, "pos": pos,
                "layers": sem_layers, "out_w": out_w, "out_b": out_b}

    # fusion
    fw1, fb1 = _dense_init(next(ki), TEMP_OUT + SEM_OUT, FUSION_DIM)
    fw2, fb2 = _dense_init(next(ki), FUSION_DIM, FUSION_DIM)
    fwr, fbr = _dense_init(next(ki), TEMP_OUT, FUSION_DIM)
    fusion = {"w1": fw1, "b1": fb1, "w2": fw2, "b2": fb2, "wres": fwr, "bres": fbr,
              "ln_g": jnp.ones((1, FUSION_DIM), F32), "ln_b": jnp.zeros((1, FUSION_DIM), F32)}

    # forecasting head
    cw1, cb1 = _dense_init(next(ki), FUSION_DIM, FC_HIDDEN)
    cw2, cb2 = _dense_init(next(ki), FC_HIDDEN, FORECAST_LEN * NUM_VARS)
    forecast = {"w1": cw1, "b1": cb1, "w2": cw2, "b2": cb2}

    # prompt optimizer
    pw1, pb1 = _dense_init(next(ki), FUSION_DIM, OPT_HIDDEN)
    pw2, pb2 = _dense_init(next(ki), OPT_HIDDEN, VOCAB)
    prompt = {"w1": pw1, "b1": pb1, "w2": pw2, "b2": pb2}

    # compatible simple LLM
    embedding = (0.02 * jax.random.normal(next(ki), (VOCAB, D_MODEL))).astype(F32)
    llm_layers = _encoder_stack_params(next(ki), LLM_LAYERS, D_MODEL, LLM_FF)
    ow, ob = _dense_init(next(ki), D_MODEL, VOCAB)
    llm = {"embedding": embedding, "layers": llm_layers, "out_w": ow, "out_b": ob}

    return {"temporal": temporal, "semantic": semantic, "fusion": fusion,
            "forecast": forecast, "prompt": prompt, "llm": llm}


# ----------------------------- main -----------------------------
if __name__ == "__main__":
    x = jax.random.normal(jax.random.PRNGKey(0), (BATCH, IN_CHANNELS, SEQ_LEN), dtype=F32)
    params = init_params(jax.random.PRNGKey(42))

    fwd = jax.jit(functools.partial(integrated_forward, mode="integrated"))
    out = fwd(params, x)
    jax.block_until_ready(out)

    assert out["forecast"].shape == (BATCH, FORECAST_LEN, NUM_VARS)
    assert out["prompt_logits"].shape == (BATCH, VOCAB)
    assert out["prompt_tokens"].shape == (BATCH,)
    assert out["llm_outputs"]["logits"].shape == (BATCH, 1, VOCAB)
    assert out["llm_outputs"]["hidden_states"].shape == (BATCH, 1, D_MODEL)
    print("KERNEL_OK")
</pallas_src>

<mosaic_0001>
module attributes {stable_mosaic.version = 11 : i64} {
  func.func @_temporal_kernel(%arg0: memref<64x15xf32, #tpu.memory_space<vmem>>, %arg1: memref<15x24xf32, #tpu.memory_space<vmem>>, %arg2: memref<1x24xf32, #tpu.memory_space<vmem>>, %arg3: memref<1x24xf32, #tpu.memory_space<vmem>>, %arg4: memref<24x64xf32, #tpu.memory_space<vmem>>, %arg5: memref<1x64xf32, #tpu.memory_space<vmem>>, %arg6: memref<2x64xf32, #tpu.memory_space<vmem>>) attributes {dimension_semantics = [], scalar_prefetch = 0 : i64, scratch_operands = 0 : i64, tpu.core_type = #tpu.core_type<tc>} {
    %c0 = arith.constant 0 : index
    %c0_0 = arith.constant 0 : index
    %0 = vector.load %arg0[%c0, %c0_0] : memref<64x15xf32, #tpu.memory_space<vmem>>, vector<64x15xf32>
    %c0_1 = arith.constant 0 : index
    %c0_2 = arith.constant 0 : index
    %1 = vector.load %arg1[%c0_1, %c0_2] : memref<15x24xf32, #tpu.memory_space<vmem>>, vector<15x24xf32>
    %cst = arith.constant dense<0.000000e+00> : vector<64x24xf32>
    %2 = tpu.matmul %0, %1, %cst {dimension_numbers = #tpu.dot_dimension_numbers<[1], [0], [0], [1], [0, 0, 1, 1], [], []>} : vector<64x15xf32>, vector<15x24xf32>, vector<64x24xf32> -> vector<64x24xf32>
    %c0_3 = arith.constant 0 : index
    %c0_4 = arith.constant 0 : index
    %3 = vector.load %arg2[%c0_3, %c0_4] : memref<1x24xf32, #tpu.memory_space<vmem>>, vector<1x24xf32>
    %4 = vector.broadcast %3 : vector<1x24xf32> to vector<64x24xf32>
    %5 = arith.addf %2, %4 : vector<64x24xf32>
    %cst_5 = arith.constant 0.000000e+00 : f32
    %6 = vector.broadcast %cst_5 : f32 to vector<64x24xf32>
    %7 = arith.maximumf %5, %6 : vector<64x24xf32>
    %c0_6 = arith.constant 0 : index
    %c0_7 = arith.constant 0 : index
    %8 = vector.load %arg3[%c0_6, %c0_7] : memref<1x24xf32, #tpu.memory_space<vmem>>, vector<1x24xf32>
    %9 = vector.extract_strided_slice %7 {offsets = [0, 0], sizes = [32, 24], strides = [1, 1]} : vector<64x24xf32> to vector<32x24xf32>
    %10 = vector.broadcast %8 : vector<1x24xf32> to vector<32x24xf32>
    %11 = arith.mulf %9, %10 : vector<32x24xf32>
    %cst_8 = arith.constant dense<0.000000e+00> : vector<32xf32>
    %12 = vector.multi_reduction <add>, %11, %cst_8 [1] : vector<32x24xf32> to vector<32xf32>
    %13 = vector.shape_cast %12 : vector<32xf32> to vector<32x1xf32>
    %cst_9 = arith.constant dense<0xFF800000> : vector<1xf32>
    %14 = vector.multi_reduction <maximumf>, %13, %cst_9 [0] : vector<32x1xf32> to vector<1xf32>
    %15 = vector.shape_cast %14 : vector<1xf32> to vector<1x1xf32>
    %16 = vector.broadcast %15 : vector<1x1xf32> to vector<32x1xf32>
    %17 = arith.subf %13, %16 : vector<32x1xf32>
    %18 = math.exp %17 : vector<32x1xf32>
    %cst_10 = arith.constant dense<0.000000e+00> : vector<1xf32>
    %19 = vector.multi_reduction <add>, %18, %cst_10 [0] : vector<32x1xf32> to vector<1xf32>
    %20 = vector.shape_cast %19 : vector<1xf32> to vector<1x1xf32>
    %21 = vector.broadcast %20 : vector<1x1xf32> to vector<32x1xf32>
    %22 = arith.divf %18, %21 : vector<32x1xf32>
    %23 = vector.broadcast %22 : vector<32x1xf32> to vector<32x24xf32>
    %24 = arith.mulf %9, %23 : vector<32x24xf32>
    %cst_11 = arith.constant dense<0.000000e+00> : vector<24xf32>
    %25 = vector.multi_reduction <add>, %24, %cst_11 [0] : vector<32x24xf32> to vector<24xf32>
    %26 = vector.shape_cast %25 : vector<24xf32> to vector<1x24xf32>
    %27 = vector.extract_strided_slice %7 {offsets = [32, 0], sizes = [32, 24], strides = [1, 1]} : vector<64x24xf32> to vector<32x24xf32>
    %28 = vector.broadcast %8 : vector<1x24xf32> to vector<32x24xf32>
    %29 = arith.mulf %27, %28 : vector<32x24xf32>
    %cst_12 = arith.constant dense<0.000000e+00> : vector<32xf32>
    %30 = vector.multi_reduction <add>, %29, %cst_12 [1] : vector<32x24xf32> to vector<32xf32>
    %31 = vector.shape_cast %30 : vector<32xf32> to vector<32x1xf32>
    %cst_13 = arith.constant dense<0xFF800000> : vector<1xf32>
    %32 = vector.multi_reduction <maximumf>, %31, %cst_13 [0] : vector<32x1xf32> to vector<1xf32>
    %33 = vector.shape_cast %32 : vector<1xf32> to vector<1x1xf32>
    %34 = vector.broadcast %33 : vector<1x1xf32> to vector<32x1xf32>
    %35 = arith.subf %31, %34 : vector<32x1xf32>
    %36 = math.exp %35 : vector<32x1xf32>
    %cst_14 = arith.constant dense<0.000000e+00> : vector<1xf32>
    %37 = vector.multi_reduction <add>, %36, %cst_14 [0] : vector<32x1xf32> to vector<1xf32>
    %38 = vector.shape_cast %37 : vector<1xf32> to vector<1x1xf32>
    %39 = vector.broadcast %38 : vector<1x1xf32> to vector<32x1xf32>
    %40 = arith.divf %36, %39 : vector<32x1xf32>
    %41 = vector.broadcast %40 : vector<32x1xf32> to vector<32x24xf32>
    %42 = arith.mulf %27, %41 : vector<32x24xf32>
    %cst_15 = arith.constant dense<0.000000e+00> : vector<24xf32>
    %43 = vector.multi_reduction <add>, %42, %cst_15 [0] : vector<32x24xf32> to vector<24xf32>
    %44 = vector.shape_cast %43 : vector<24xf32> to vector<1x24xf32>
    %45 = tpu.concatenate %26, %44 in 0 : vector<1x24xf32>, vector<1x24xf32> -> vector<2x24xf32>
    %c0_16 = arith.constant 0 : index
    %c0_17 = arith.constant 0 : index
    %46 = vector.load %arg4[%c0_16, %c0_17] : memref<24x64xf32, #tpu.memory_space<vmem>>, vector<24x64xf32>
    %cst_18 = arith.constant dense<0.000000e+00> : vector<2x64xf32>
    %47 = tpu.matmul %45, %46, %cst_18 {dimension_numbers = #tpu.dot_dimension_numbers<[1], [0], [0], [1], [0, 0, 1, 1], [], []>} : vector<2x24xf32>, vector<24x64xf32>, vector<2x64xf32> -> vector<2x64xf32>
    %c0_19 = arith.constant 0 : index
    %c0_20 = arith.constant 0 : index
    %48 = vector.load %arg5[%c0_19, %c0_20] : memref<1x64xf32, #tpu.memory_space<vmem>>, vector<1x64xf32>
    %49 = vector.broadcast %48 : vector<1x64xf32> to vector<2x64xf32>
    %50 = arith.addf %47, %49 : vector<2x64xf32>
    %c0_21 = arith.constant 0 : index
    %c0_22 = arith.constant 0 : index
    %51 = vector.load %arg6[%c0_21, %c0_22] : memref<2x64xf32, #tpu.memory_space<vmem>>, vector<2x64xf32>
    tpu.vector_store %arg6[%c0_21, %c0_22], %50 {strides = array<i32>} : memref<2x64xf32, #tpu.memory_space<vmem>>, vector<2x64xf32>,
    return
  }
}

module attributes {stable_mosaic.version = 11 : i64} {
  func.func @_head_kernel(%arg0: memref<2x64xf32, #tpu.memory_space<vmem>>, %arg1: memref<2x64xf32, #tpu.memory_space<vmem>>, %arg2: memref<128x64xf32, #tpu.memory_space<vmem>>, %arg3: memref<1x64xf32, #tpu.memory_space<vmem>>, %arg4: memref<64x64xf32, #tpu.memory_space<vmem>>, %arg5: memref<1x64xf32, #tpu.memory_space<vmem>>, %arg6: memref<64x64xf32, #tpu.memory_space<vmem>>, %arg7: memref<1x64xf32, #tpu.memory_space<vmem>>, %arg8: memref<1x64xf32, #tpu.memory_space<vmem>>, %arg9: memref<1x64xf32, #tpu.memory_space<vmem>>, %arg10: memref<64x256xf32, #tpu.memory_space<vmem>>, %arg11: memref<1x256xf32, #tpu.memory_space<vmem>>, %arg12: memref<128x16xf32, #tpu.memory_space<vmem>>, %arg13: memref<1x16xf32, #tpu.memory_space<vmem>>, %arg14: memref<128x256xf32, #tpu.memory_space<vmem>>, %arg15: memref<1x256xf32, #tpu.memory_space<vmem>>, %arg16: memref<2x64xf32, #tpu.memory_space<vmem>>, %arg17: memref<2x16xf32, #tpu.memory_space<vmem>>, %arg18: memref<2x256xf32, #tpu.memory_space<vmem>>) attributes {dimension_semantics = [], scalar_prefetch = 0 : i64, scratch_operands = 0 : i64, tpu.core_type = #tpu.core_type<tc>} {
    %c0 = arith.constant 0 : index
    %c0_0 = arith.constant 0 : index
    %0 = vector.load %arg0[%c0, %c0_0] : memref<2x64xf32, #tpu.memory_space<vmem>>, vector<2x64xf32>
    %c0_1 = arith.constant 0 : index
    %c0_2 = arith.constant 0 : index
    %1 = vector.load %arg1[%c0_1, %c0_2] : memref<2x64xf32, #tpu.memory_space<vmem>>, vector<2x64xf32>
    %2 = tpu.concatenate %0, %1 in 1 : vector<2x64xf32>, vector<2x64xf32> -> vector<2x128xf32>
    %c0_3 = arith.constant 0 : index
    %c0_4 = arith.constant 0 : index
    %3 = vector.load %arg2[%c0_3, %c0_4] : memref<128x64xf32, #tpu.memory_space<vmem>>, vector<128x64xf32>
    %cst = arith.constant dense<0.000000e+00> : vector<2x64xf32>
    %4 = tpu.matmul %2, %3, %cst {dimension_numbers = #tpu.dot_dimension_numbers<[1], [0], [0], [1], [0, 0, 1, 1], [], []>} : vector<2x128xf32>, vector<128x64xf32>, vector<2x64xf32> -> vector<2x64xf32>
    %c0_5 = arith.constant 0 : index
    %c0_6 = arith.constant 0 : index
    %5 = vector.load %arg3[%c0_5, %c0_6] : memref<1x64xf32, #tpu.memory_space<vmem>>, vector<1x64xf32>
    %6 = vector.broadcast %5 : vector<1x64xf32> to vector<2x64xf32>
    %7 = arith.addf %4, %6 : vector<2x64xf32>
    %8 = arith.mulf %7, %7 : vector<2x64xf32>
    %9 = arith.mulf %7, %8 : vector<2x64xf32>
    %cst_7 = arith.constant 4.471500e-02 : f32
    %10 = vector.broadcast %cst_7 : f32 to vector<2x64xf32>
    %11 = arith.mulf %10, %9 : vector<2x64xf32>
    %12 = arith.addf %7, %11 : vector<2x64xf32>
    %cst_8 = arith.constant 0.797884583 : f32
    %13 = vector.broadcast %cst_8 : f32 to vector<2x64xf32>
    %14 = arith.mulf %13, %12 : vector<2x64xf32>
    %15 = math.tanh %14 : vector<2x64xf32>
    %cst_9 = arith.constant 1.000000e+00 : f32
    %16 = vector.broadcast %cst_9 : f32 to vector<2x64xf32>
    %17 = arith.addf %16, %15 : vector<2x64xf32>
    %cst_10 = arith.constant 5.000000e-01 : f32
    %18 = vector.broadcast %cst_10 : f32 to vector<2x64xf32>
    %19 = arith.mulf %18, %17 : vector<2x64xf32>
    %20 = arith.mulf %7, %19 : vector<2x64xf32>
    %c0_11 = arith.constant 0 : index
    %c0_12 = arith.constant 0 : index
    %21 = vector.load %arg4[%c0_11, %c0_12] : memref<64x64xf32, #tpu.memory_space<vmem>>, vector<64x64xf32>
    %cst_13 = arith.constant dense<0.000000e+00> : vector<2x64xf32>
    %22 = tpu.matmul %20, %21, %cst_13 {dimension_numbers = #tpu.dot_dimension_numbers<[1], [0], [0], [1], [0, 0, 1, 1], [], []>} : vector<2x64xf32>, vector<64x64xf32>, vector<2x64xf32> -> vector<2x64xf32>
    %c0_14 = arith.constant 0 : index
    %c0_15 = arith.constant 0 : index
    %23 = vector.load %arg5[%c0_14, %c0_15] : memref<1x64xf32, #tpu.memory_space<vmem>>, vector<1x64xf32>
    %24 = vector.broadcast %23 : vector<1x64xf32> to vector<2x64xf32>
    %25 = arith.addf %22, %24 : vector<2x64xf32>
    %c0_16 = arith.constant 0 : index
    %c0_17 = arith.constant 0 : index
    %26 = vector.load %arg6[%c0_16, %c0_17] : memref<64x64xf32, #tpu.memory_space<vmem>>, vector<64x64xf32>
    %cst_18 = arith.constant dense<0.000000e+00> : vector<2x64xf32>
    %27 = tpu.matmul %0, %26, %cst_18 {dimension_numbers = #tpu.dot_dimension_numbers<[1], [0], [0], [1], [0, 0, 1, 1], [], []>} : vector<2x64xf32>, vector<64x64xf32>, vector<2x64xf32> -> vector<2x64xf32>
    %28 = arith.addf %25, %27 : vector<2x64xf32>
    %c0_19 = arith.constant 0 : index
    %c0_20 = arith.constant 0 : index
    %29 = vector.load %arg7[%c0_19, %c0_20] : memref<1x64xf32, #tpu.memory_space<vmem>>, vector<1x64xf32>
    %30 = vector.broadcast %29 : vector<1x64xf32> to vector<2x64xf32>
    %31 = arith.addf %28, %30 : vector<2x64xf32>
    %c0_21 = arith.constant 0 : index
    %c0_22 = arith.constant 0 : index
    %32 = vector.load %arg8[%c0_21, %c0_22] : memref<1x64xf32, #tpu.memory_space<vmem>>, vector<1x64xf32>
    %c0_23 = arith.constant 0 : index
    %c0_24 = arith.constant 0 : index
    %33 = vector.load %arg9[%c0_23, %c0_24] : memref<1x64xf32, #tpu.memory_space<vmem>>, vector<1x64xf32>
    %cst_25 = arith.constant dense<0.000000e+00> : vector<2xf32>
    %34 = vector.multi_reduction <add>, %31, %cst_25 [1] : vector<2x64xf32> to vector<2xf32>
    %35 = vector.shape_cast %34 : vector<2xf32> to vector<2x1xf32>
    %cst_26 = arith.constant 6.400000e+01 : f32
    %36 = vector.broadcast %cst_26 : f32 to vector<2x1xf32>
    %37 = arith.divf %35, %36 : vector<2x1xf32>
    %38 = vector.broadcast %37 : vector<2x1xf32> to vector<2x64xf32>
    %39 = arith.subf %31, %38 : vector<2x64xf32>
    %40 = arith.mulf %39, %39 : vector<2x64xf32>
    %cst_27 = arith.constant dense<0.000000e+00> : vector<2xf32>
    %41 = vector.multi_reduction <add>, %40, %cst_27 [1] : vector<2x64xf32> to vector<2xf32>
    %42 = vector.shape_cast %41 : vector<2xf32> to vector<2x1xf32>
    %cst_28 = arith.constant 6.400000e+01 : f32
    %43 = vector.broadcast %cst_28 : f32 to vector<2x1xf32>
    %44 = arith.divf %42, %43 : vector<2x1xf32>
    %cst_29 = arith.constant 9.99999974E-6 : f32
    %45 = vector.broadcast %cst_29 : f32 to vector<2x1xf32>
    %46 = arith.addf %44, %45 : vector<2x1xf32>
    %47 = math.rsqrt %46 : vector<2x1xf32>
    %48 = vector.broadcast %47 : vector<2x1xf32> to vector<2x64xf32>
    %49 = arith.mulf %39, %48 : vector<2x64xf32>
    %50 = vector.broadcast %32 : vector<1x64xf32> to vector<2x64xf32>
    %51 = arith.mulf %49, %50 : vector<2x64xf32>
    %52 = vector.broadcast %33 : vector<1x64xf32> to vector<2x64xf32>
    %53 = arith.addf %51, %52 : vector<2x64xf32>
    %c0_30 = arith.constant 0 : index
    %c0_31 = arith.constant 0 : index
    %54 = vector.load %arg16[%c0_30, %c0_31] : memref<2x64xf32, #tpu.memory_space<vmem>>, vector<2x64xf32>
    tpu.vector_store %arg16[%c0_30, %c0_31], %53 {strides = array<i32>} : memref<2x64xf32, #tpu.memory_space<vmem>>, vector<2x64xf32>,
    %c0_32 = arith.constant 0 : index
    %c0_33 = arith.constant 0 : index
    %55 = vector.load %arg10[%c0_32, %c0_33] : memref<64x256xf32, #tpu.memory_space<vmem>>, vector<64x256xf32>
    %cst_34 = arith.constant dense<0.000000e+00> : vector<2x256xf32>
    %56 = tpu.matmul %53, %55, %cst_34 {dimension_numbers = #tpu.dot_dimension_numbers<[1], [0], [0], [1], [0, 0, 1, 1], [], []>} : vector<2x64xf32>, vector<64x256xf32>, vector<2x256xf32> -> vector<2x256xf32>
    %c0_35 = arith.constant 0 : index
    %c0_36 = arith.constant 0 : index
    %57 = vector.load %arg11[%c0_35, %c0_36] : memref<1x256xf32, #tpu.memory_space<vmem>>, vector<1x256xf32>
    %58 = vector.broadcast %57 : vector<1x256xf32> to vector<2x256xf32>
    %59 = arith.addf %56, %58 : vector<2x256xf32>
    %60 = arith.mulf %59, %59 : vector<2x256xf32>
    %61 = arith.mulf %59, %60 : vector<2x256xf32>
    %cst_37 = arith.constant 4.471500e-02 : f32
    %62 = vector.broadcast %cst_37 : f32 to vector<2x256xf32>
    %63 = arith.mulf %62, %61 : vector<2x256xf32>
    %64 = arith.addf %59, %63 : vector<2x256xf32>
    %cst_38 = arith.constant 0.797884583 : f32
    %65 = vector.broadcast %cst_38 : f32 to vector<2x256xf32>
    %66 = arith.mulf %65, %64 : vector<2x256xf32>
    %67 = math.tanh %66 : vector<2x256xf32>
    %cst_39 = arith.constant 1.000000e+00 : f32
    %68 = vector.broadcast %cst_39 : f32 to vector<2x256xf32>
    %69 = arith.addf %68, %67 : vector<2x256xf32>
    %cst_40 = arith.constant 5.000000e-01 : f32
    %70 = vector.broadcast %cst_40 : f32 to vector<2x256xf32>
    %71 = arith.mulf %70, %69 : vector<2x256xf32>
    %72 = arith.mulf %59, %71 : vector<2x256xf32>
    %73 = vector.extract_strided_slice %72 {offsets = [0, 0], sizes = [2, 128], strides = [1, 1]} : vector<2x256xf32> to vector<2x128xf32>
    %74 = vector.extract_strided_slice %72 {offsets = [0, 128], sizes = [2, 128], strides = [1, 1]} : vector<2x256xf32> to vector<2x128xf32>
    %c0_41 = arith.constant 0 : index
    %c0_42 = arith.constant 0 : index
    %75 = vector.load %arg12[%c0_41, %c0_42] : memref<128x16xf32, #tpu.memory_space<vmem>>, vector<128x16xf32>
    %cst_43 = arith.constant dense<0.000000e+00> : vector<2x16xf32>
    %76 = tpu.matmul %73, %75, %cst_43 {dimension_numbers = #tpu.dot_dimension_numbers<[1], [0], [0], [1], [0, 0, 1, 1], [], []>} : vector<2x128xf32>, vector<128x16xf32>, vector<2x16xf32> -> vector<2x16xf32>
    %c0_44 = arith.constant 0 : index
    %c0_45 = arith.constant 0 : index
    %77 = vector.load %arg13[%c0_44, %c0_45] : memref<1x16xf32, #tpu.memory_space<vmem>>, vector<1x16xf32>
    %78 = vector.broadcast %77 : vector<1x16xf32> to vector<2x16xf32>
    %79 = arith.addf %76, %78 : vector<2x16xf32>
    %c0_46 = arith.constant 0 : index
    %c0_47 = arith.constant 0 : index
    %80 = vector.load %arg17[%c0_46, %c0_47] : memref<2x16xf32, #tpu.memory_space<vmem>>, vector<2x16xf32>
    tpu.vector_store %arg17[%c0_46, %c0_47], %79 {strides = array<i32>} : memref<2x16xf32, #tpu.memory_space<vmem>>, vector<2x16xf32>,
    %c0_48 = arith.constant 0 : index
    %c0_49 = arith.constant 0 : index
    %81 = vector.load %arg14[%c0_48, %c0_49] : memref<128x256xf32, #tpu.memory_space<vmem>>, vector<128x256xf32>
    %cst_50 = arith.constant dense<0.000000e+00> : vector<2x256xf32>
    %82 = tpu.matmul %74, %81, %cst_50 {dimension_numbers = #tpu.dot_dimension_numbers<[1], [0], [0], [1], [0, 0, 1, 1], [], []>} : vector<2x128xf32>, vector<128x256xf32>, vector<2x256xf32> -> vector<2x256xf32>
    %c0_51 = arith.constant 0 : index
    %c0_52 = arith.constant 0 : index
    %83 = vector.load %arg15[%c0_51, %c0_52] : memref<1x256xf32, #tpu.memory_space<vmem>>, vector<1x256xf32>
    %84 = vector.broadcast %83 : vector<1x256xf32> to vector<2x256xf32>
    %85 = arith.addf %82, %84 : vector<2x256xf32>
    %c0_53 = arith.constant 0 : index
    %c0_54 = arith.constant 0 : index
    %86 = vector.load %arg18[%c0_53, %c0_54] : memref<2x256xf32, #tpu.memory_space<vmem>>, vector<2x256xf32>
    tpu.vector_store %arg18[%c0_53, %c0_54], %85 {strides = array<i32>} : memref<2x256xf32, #tpu.memory_space<vmem>>, vector<2x256xf32>,
    return
  }
}

module attributes {stable_mosaic.version = 11 : i64} {
  func.func @_semantic_kernel(%arg0: memref<8x8xf32, #tpu.memory_space<vmem>>, %arg1: memref<8x32xf32, #tpu.memory_space<vmem>>, %arg2: memref<8x32xf32, #tpu.memory_space<vmem>>, %arg3: memref<1x32x96xf32, #tpu.memory_space<vmem>>, %arg4: memref<1x1x96xf32, #tpu.memory_space<vmem>>, %arg5: memref<1x32x32xf32, #tpu.memory_space<vmem>>, %arg6: memref<1x1x32xf32, #tpu.memory_space<vmem>>, %arg7: memref<1x1x32xf32, #tpu.memory_space<vmem>>, %arg8: memref<1x1x32xf32, #tpu.memory_space<vmem>>, %arg9: memref<1x32x64xf32, #tpu.memory_space<vmem>>, %arg10: memref<1x1x64xf32, #tpu.memory_space<vmem>>, %arg11: memref<1x64x32xf32, #tpu.memory_space<vmem>>, %arg12: memref<1x1x32xf32, #tpu.memory_space<vmem>>, %arg13: memref<1x1x32xf32, #tpu.memory_space<vmem>>, %arg14: memref<1x1x32xf32, #tpu.memory_space<vmem>>, %arg15: memref<32x64xf32, #tpu.memory_space<vmem>>, %arg16: memref<1x64xf32, #tpu.memory_space<vmem>>, %arg17: memref<2x64xf32, #tpu.memory_space<vmem>>) attributes {dimension_semantics = [], scalar_prefetch = 0 : i64, scratch_operands = 0 : i64, tpu.core_type = #tpu.core_type<tc>} {
    %c0 = arith.constant 0 : index
    %c0_0 = arith.constant 0 : index
    %0 = vector.load %arg0[%c0, %c0_0] : memref<8x8xf32, #tpu.memory_space<vmem>>, vector<8x8xf32>
    %c0_1 = arith.constant 0 : index
    %c0_2 = arith.constant 0 : index
    %1 = vector.load %arg1[%c0_1, %c0_2] : memref<8x32xf32, #tpu.memory_space<vmem>>, vector<8x32xf32>
    %cst = arith.constant dense<0.000000e+00> : vector<8x32xf32>
    %2 = tpu.matmul %0, %1, %cst {dimension_numbers = #tpu.dot_dimension_numbers<[1], [0], [0], [1], [0, 0, 1, 1], [], []>} : vector<8x8xf32>, vector<8x32xf32>, vector<8x32xf32> -> vector<8x32xf32>
    %c0_3 = arith.constant 0 : index
    %c0_4 = arith.constant 0 : index
    %3 = vector.load %arg2[%c0_3, %c0_4] : memref<8x32xf32, #tpu.memory_space<vmem>>, vector<8x32xf32>
    %4 = arith.addf %2, %3 : vector<8x32xf32>
    %c0_5 = arith.constant 0 : index
    %c0_6 = arith.constant 0 : index
    %c0_7 = arith.constant 0 : index
    %5 = vector.load %arg3[%c0_5, %c0_6, %c0_7] : memref<1x32x96xf32, #tpu.memory_space<vmem>>, vector<1x32x96xf32>
    %6 = vector.shape_cast %5 : vector<1x32x96xf32> to vector<32x96xf32>
    %c0_8 = arith.constant 0 : index
    %c0_9 = arith.constant 0 : index
    %c0_10 = arith.constant 0 : index
    %7 = vector.load %arg4[%c0_8, %c0_9, %c0_10] : memref<1x1x96xf32, #tpu.memory_space<vmem>>, vector<1x1x96xf32>
    %8 = vector.shape_cast %7 : vector<1x1x96xf32> to vector<1x96xf32>
    %c0_11 = arith.constant 0 : index
    %c0_12 = arith.constant 0 : index
    %c0_13 = arith.constant 0 : index
    %9 = vector.load %arg5[%c0_11, %c0_12, %c0_13] : memref<1x32x32xf32, #tpu.memory_space<vmem>>, vector<1x32x32xf32>
    %10 = vector.shape_cast %9 : vector<1x32x32xf32> to vector<32x32xf32>
    %c0_14 = arith.constant 0 : index
    %c0_15 = arith.constant 0 : index
    %c0_16 = arith.constant 0 : index
    %11 = vector.load %arg6[%c0_14, %c0_15, %c0_16] : memref<1x1x32xf32, #tpu.memory_space<vmem>>, vector<1x1x32xf32>
    %12 = vector.shape_cast %11 : vector<1x1x32xf32> to vector<1x32xf32>
    %c0_17 = arith.constant 0 : index
    %c0_18 = arith.constant 0 : index
    %c0_19 = arith.constant 0 : index
    %13 = vector.load %arg7[%c0_17, %c0_18, %c0_19] : memref<1x1x32xf32, #tpu.memory_space<vmem>>, vector<1x1x32xf32>
    %14 = vector.shape_cast %13 : vector<1x1x32xf32> to vector<1x32xf32>
    %c0_20 = arith.constant 0 : index
    %c0_21 = arith.constant 0 : index
    %c0_22 = arith.constant 0 : index
    %15 = vector.load %arg8[%c0_20, %c0_21, %c0_22] : memref<1x1x32xf32, #tpu.memory_space<vmem>>, vector<1x1x32xf32>
    %16 = vector.shape_cast %15 : vector<1x1x32xf32> to vector<1x32xf32>
    %c0_23 = arith.constant 0 : index
    %c0_24 = arith.constant 0 : index
    %c0_25 = arith.constant 0 : index
    %17 = vector.load %arg9[%c0_23, %c0_24, %c0_25] : memref<1x32x64xf32, #tpu.memory_space<vmem>>, vector<1x32x64xf32>
    %18 = vector.shape_cast %17 : vector<1x32x64xf32> to vector<32x64xf32>
    %c0_26 = arith.constant 0 : index
    %c0_27 = arith.constant 0 : index
    %c0_28 = arith.constant 0 : index
    %19 = vector.load %arg10[%c0_26, %c0_27, %c0_28] : memref<1x1x64xf32, #tpu.memory_space<vmem>>, vector<1x1x64xf32>
    %20 = vector.shape_cast %19 : vector<1x1x64xf32> to vector<1x64xf32>
    %c0_29 = arith.constant 0 : index
    %c0_30 = arith.constant 0 : index
    %c0_31 = arith.constant 0 : index
    %21 = vector.load %arg11[%c0_29, %c0_30, %c0_31] : memref<1x64x32xf32, #tpu.memory_space<vmem>>, vector<1x64x32xf32>
    %22 = vector.shape_cast %21 : vector<1x64x32xf32> to vector<64x32xf32>
    %c0_32 = arith.constant 0 : index
    %c0_33 = arith.constant 0 : index
    %c0_34 = arith.constant 0 : index
    %23 = vector.load %arg12[%c0_32, %c0_33, %c0_34] : memref<1x1x32xf32, #tpu.memory_space<vmem>>, vector<1x1x32xf32>
    %24 = vector.shape_cast %23 : vector<1x1x32xf32> to vector<1x32xf32>
    %c0_35 = arith.constant 0 : index
    %c0_36 = arith.constant 0 : index
    %c0_37 = arith.constant 0 : index
    %25 = vector.load %arg13[%c0_35, %c0_36, %c0_37] : memref<1x1x32xf32, #tpu.memory_space<vmem>>, vector<1x1x32xf32>
    %26 = vector.shape_cast %25 : vector<1x1x32xf32> to vector<1x32xf32>
    %c0_38 = arith.constant 0 : index
    %c0_39 = arith.constant 0 : index
    %c0_40 = arith.constant 0 : index
    %27 = vector.load %arg14[%c0_38, %c0_39, %c0_40] : memref<1x1x32xf32, #tpu.memory_space<vmem>>, vector<1x1x32xf32>
    %28 = vector.shape_cast %27 : vector<1x1x32xf32> to vector<1x32xf32>
    %cst_41 = arith.constant dense<0.000000e+00> : vector<8x96xf32>
    %29 = tpu.matmul %4, %6, %cst_41 {dimension_numbers = #tpu.dot_dimension_numbers<[1], [0], [0], [1], [0, 0, 1, 1], [], []>} : vector<8x32xf32>, vector<32x96xf32>, vector<8x96xf32> -> vector<8x96xf32>
    %30 = vector.broadcast %8 : vector<1x96xf32> to vector<8x96xf32>
    %31 = arith.addf %29, %30 : vector<8x96xf32>
    %32 = vector.extract_strided_slice %31 {offsets = [0, 0], sizes = [8, 32], strides = [1, 1]} : vector<8x96xf32> to vector<8x32xf32>
    %33 = vector.extract_strided_slice %31 {offsets = [0, 32], sizes = [8, 32], strides = [1, 1]} : vector<8x96xf32> to vector<8x32xf32>
    %34 = vector.extract_strided_slice %31 {offsets = [0, 64], sizes = [8, 32], strides = [1, 1]} : vector<8x96xf32> to vector<8x32xf32>
    %35 = tpu.iota {dimensions = array<i32: 1>} : vector<1x32xi32>
    %36 = vector.extract_strided_slice %32 {offsets = [0, 0], sizes = [4, 32], strides = [1, 1]} : vector<8x32xf32> to vector<4x32xf32>
    %37 = vector.extract_strided_slice %33 {offsets = [0, 0], sizes = [4, 32], strides = [1, 1]} : vector<8x32xf32> to vector<4x32xf32>
    %38 = vector.extract_strided_slice %34 {offsets = [0, 0], sizes = [4, 32], strides = [1, 1]} : vector<8x32xf32> to vector<4x32xf32>
    %c0_i32 = arith.constant 0 : i32
    %39 = vector.broadcast %c0_i32 : i32 to vector<1x32xi32>
    %40 = arith.cmpi sge, %35, %39 : vector<1x32xi32>
    %c8_i32 = arith.constant 8 : i32
    %41 = vector.broadcast %c8_i32 : i32 to vector<1x32xi32>
    %42 = arith.cmpi slt, %35, %41 : vector<1x32xi32>
    %43 = arith.andi %40, %42 : vector<1x32xi1>
    %44 = arith.extui %43 : vector<1x32xi1> to vector<1x32xi32>
    %45 = arith.sitofp %44 : vector<1x32xi32> to vector<1x32xf32>
    %46 = vector.broadcast %45 : vector<1x32xf32> to vector<4x32xf32>
    %47 = arith.mulf %36, %46 : vector<4x32xf32>
    %cst_42 = arith.constant dense<0.000000e+00> : vector<4x4xf32>
    %48 = tpu.matmul %47, %37, %cst_42 {dimension_numbers = #tpu.dot_dimension_numbers<[1], [1], [0], [0], [0, 0, 1, 0], [], []>} : vector<4x32xf32>, vector<4x32xf32>, vector<4x4xf32> -> vector<4x4xf32>
    %cst_43 = arith.constant 0.353553385 : f32
    %49 = vector.broadcast %cst_43 : f32 to vector<4x4xf32>
    %50 = arith.mulf %48, %49 : vector<4x4xf32>
    %cst_44 = arith.constant dense<0xFF800000> : vector<4xf32>
    %51 = vector.multi_reduction <maximumf>, %50, %cst_44 [1] : vector<4x4xf32> to vector<4xf32>
    %52 = vector.shape_cast %51 : vector<4xf32> to vector<4x1xf32>
    %53 = vector.broadcast %52 : vector<4x1xf32> to vector<4x4xf32>
    %54 = arith.subf %50, %53 : vector<4x4xf32>
    %55 = math.exp %54 : vector<4x4xf32>
    %cst_45 = arith.constant dense<0.000000e+00> : vector<4xf32>
    %56 = vector.multi_reduction <add>, %55, %cst_45 [1] : vector<4x4xf32> to vector<4xf32>
    %57 = vector.shape_cast %56 : vector<4xf32> to vector<4x1xf32>
    %58 = vector.broadcast %57 : vector<4x1xf32> to vector<4x4xf32>
    %59 = arith.divf %55, %58 : vector<4x4xf32>
    %60 = vector.broadcast %45 : vector<1x32xf32> to vector<4x32xf32>
    %61 = arith.mulf %38, %60 : vector<4x32xf32>
    %cst_46 = arith.constant dense<0.000000e+00> : vector<4x32xf32>
    %62 = tpu.matmul %59, %61, %cst_46 {dimension_numbers = #tpu.dot_dimension_numbers<[1], [0], [0], [1], [0, 0, 1, 1], [], []>} : vector<4x4xf32>, vector<4x32xf32>, vector<4x32xf32> -> vector<4x32xf32>
    %c8_i32_47 = arith.constant 8 : i32
    %63 = vector.broadcast %c8_i32_47 : i32 to vector<1x32xi32>
    %64 = arith.cmpi sge, %35, %63 : vector<1x32xi32>
    %c16_i32 = arith.constant 16 : i32
    %65 = vector.broadcast %c16_i32 : i32 to vector<1x32xi32>
    %66 = arith.cmpi slt, %35, %65 : vector<1x32xi32>
    %67 = arith.andi %64, %66 : vector<1x32xi1>
    %68 = arith.extui %67 : vector<1x32xi1> to vector<1x32xi32>
    %69 = arith.sitofp %68 : vector<1x32xi32> to vector<1x32xf32>
    %70 = vector.broadcast %69 : vector<1x32xf32> to vector<4x32xf32>
    %71 = arith.mulf %36, %70 : vector<4x32xf32>
    %cst_48 = arith.constant dense<0.000000e+00> : vector<4x4xf32>
    %72 = tpu.matmul %71, %37, %cst_48 {dimension_numbers = #tpu.dot_dimension_numbers<[1], [1], [0], [0], [0, 0, 1, 0], [], []>} : vector<4x32xf32>, vector<4x32xf32>, vector<4x4xf32> -> vector<4x4xf32>
    %cst_49 = arith.constant 0.353553385 : f32
    %73 = vector.broadcast %cst_49 : f32 to vector<4x4xf32>
    %74 = arith.mulf %72, %73 : vector<4x4xf32>
    %cst_50 = arith.constant dense<0xFF800000> : vector<4xf32>
    %75 = vector.multi_reduction <maximumf>, %74, %cst_50 [1] : vector<4x4xf32> to vector<4xf32>
    %76 = vector.shape_cast %75 : vector<4xf32> to vector<4x1xf32>
    %77 = vector.broadcast %76 : vector<4x1xf32> to vector<4x4xf32>
    %78 = arith.subf %74, %77 : vector<4x4xf32>
    %79 = math.exp %78 : vector<4x4xf32>
    %cst_51 = arith.constant dense<0.000000e+00> : vector<4xf32>
    %80 = vector.multi_reduction <add>, %79, %cst_51 [1] : vector<4x4xf32> to vector<4xf32>
    %81 = vector.shape_cast %80 : vector<4xf32> to vector<4x1xf32>
    %82 = vector.broadcast %81 : vector<4x1xf32> to vector<4x4xf32>
    %83 = arith.divf %79, %82 : vector<4x4xf32>
    %84 = vector.broadcast %69 : vector<1x32xf32> to vector<4x32xf32>
    %85 = arith.mulf %38, %84 : vector<4x32xf32>
    %cst_52 = arith.constant dense<0.000000e+00> : vector<4x32xf32>
    %86 = tpu.matmul %83, %85, %cst_52 {dimension_numbers = #tpu.dot_dimension_numbers<[1], [0], [0], [1], [0, 0, 1, 1], [], []>} : vector<4x4xf32>, vector<4x32xf32>, vector<4x32xf32> -> vector<4x32xf32>
    %c16_i32_53 = arith.constant 16 : i32
    %87 = vector.broadcast %c16_i32_53 : i32 to vector<1x32xi32>
    %88 = arith.cmpi sge, %35, %87 : vector<1x32xi32>
    %c24_i32 = arith.constant 24 : i32
    %89 = vector.broadcast %c24_i32 : i32 to vector<1x32xi32>
    %90 = arith.cmpi slt, %35, %89 : vector<1x32xi32>
    %91 = arith.andi %88, %90 : vector<1x32xi1>
    %92 = arith.extui %91 : vector<1x32xi1> to vector<1x32xi32>
    %93 = arith.sitofp %92 : vector<1x32xi32> to vector<1x32xf32>
    %94 = vector.broadcast %93 : vector<1x32xf32> to vector<4x32xf32>
    %95 = arith.mulf %36, %94 : vector<4x32xf32>
    %cst_54 = arith.constant dense<0.000000e+00> : vector<4x4xf32>
    %96 = tpu.matmul %95, %37, %cst_54 {dimension_numbers = #tpu.dot_dimension_numbers<[1], [1], [0], [0], [0, 0, 1, 0], [], []>} : vector<4x32xf32>, vector<4x32xf32>, vector<4x4xf32> -> vector<4x4xf32>
    %cst_55 = arith.constant 0.353553385 : f32
    %97 = vector.broadcast %cst_55 : f32 to vector<4x4xf32>
    %98 = arith.mulf %96, %97 : vector<4x4xf32>
    %cst_56 = arith.constant dense<0xFF800000> : vector<4xf32>
    %99 = vector.multi_reduction <maximumf>, %98, %cst_56 [1] : vector<4x4xf32> to vector<4xf32>
    %100 = vector.shape_cast %99 : vector<4xf32> to vector<4x1xf32>
    %101 = vector.broadcast %100 : vector<4x1xf32> to vector<4x4xf32>
    %102 = arith.subf %98, %101 : vector<4x4xf32>
    %103 = math.exp %102 : vector<4x4xf32>
    %cst_57 = arith.constant dense<0.000000e+00> : vector<4xf32>
    %104 = vector.multi_reduction <add>, %103, %cst_57 [1] : vector<4x4xf32> to vector<4xf32>
    %105 = vector.shape_cast %104 : vector<4xf32> to vector<4x1xf32>
    %106 = vector.broadcast %105 : vector<4x1xf32> to vector<4x4xf32>
    %107 = arith.divf %103, %106 : vector<4x4xf32>
    %108 = vector.broadcast %93 : vector<1x32xf32> to vector<4x32xf32>
    %109 = arith.mulf %38, %108 : vector<4x32xf32>
    %cst_58 = arith.constant dense<0.000000e+00> : vector<4x32xf32>
    %110 = tpu.matmul %107, %109, %cst_58 {dimension_numbers = #tpu.dot_dimension_numbers<[1], [0], [0], [1], [0, 0, 1, 1], [], []>} : vector<4x4xf32>, vector<4x32xf32>, vector<4x32xf32> -> vector<4x32xf32>
    %c24_i32_59 = arith.constant 24 : i32
    %111 = vector.broadcast %c24_i32_59 : i32 to vector<1x32xi32>
    %112 = arith.cmpi sge, %35, %111 : vector<1x32xi32>
    %c32_i32 = arith.constant 32 : i32
    %113 = vector.broadcast %c32_i32 : i32 to vector<1x32xi32>
    %114 = arith.cmpi slt, %35, %113 : vector<1x32xi32>
    %115 = arith.andi %112, %114 : vector<1x32xi1>
    %116 = arith.extui %115 : vector<1x32xi1> to vector<1x32xi32>
    %117 = arith.sitofp %116 : vector<1x32xi32> to vector<1x32xf32>
    %118 = vector.broadcast %117 : vector<1x32xf32> to vector<4x32xf32>
    %119 = arith.mulf %36, %118 : vector<4x32xf32>
    %cst_60 = arith.constant dense<0.000000e+00> : vector<4x4xf32>
    %120 = tpu.matmul %119, %37, %cst_60 {dimension_numbers = #tpu.dot_dimension_numbers<[1], [1], [0], [0], [0, 0, 1, 0], [], []>} : vector<4x32xf32>, vector<4x32xf32>, vector<4x4xf32> -> vector<4x4xf32>
    %cst_61 = arith.constant 0.353553385 : f32
    %121 = vector.broadcast %cst_61 : f32 to vector<4x4xf32>
    %122 = arith.mulf %120, %121 : vector<4x4xf32>
    %cst_62 = arith.constant dense<0xFF800000> : vector<4xf32>
    %123 = vector.multi_reduction <maximumf>, %122, %cst_62 [1] : vector<4x4xf32> to vector<4xf32>
    %124 = vector.shape_cast %123 : vector<4xf32> to vector<4x1xf32>
    %125 = vector.broadcast %124 : vector<4x1xf32> to vector<4x4xf32>
    %126 = arith.subf %122, %125 : vector<4x4xf32>
    %127 = math.exp %126 : vector<4x4xf32>
    %cst_63 = arith.constant dense<0.000000e+00> : vector<4xf32>
    %128 = vector.multi_reduction <add>, %127, %cst_63 [1] : vector<4x4xf32> to vector<4xf32>
    %129 = vector.shape_cast %128 : vector<4xf32> to vector<4x1xf32>
    %130 = vector.broadcast %129 : vector<4x1xf32> to vector<4x4xf32>
    %131 = arith.divf %127, %130 : vector<4x4xf32>
    %132 = vector.broadcast %117 : vector<1x32xf32> to vector<4x32xf32>
    %133 = arith.mulf %38, %132 : vector<4x32xf32>
    %cst_64 = arith.constant dense<0.000000e+00> : vector<4x32xf32>
    %134 = tpu.matmul %131, %133, %cst_64 {dimension_numbers = #tpu.dot_dimension_numbers<[1], [0], [0], [1], [0, 0, 1, 1], [], []>} : vector<4x4xf32>, vector<4x32xf32>, vector<4x32xf32> -> vector<4x32xf32>
    %135 = arith.addf %62, %86 : vector<4x32xf32>
    %136 = arith.addf %135, %110 : vector<4x32xf32>
    %137 = arith.addf %136, %134 : vector<4x32xf32>
    %138 = vector.extract_strided_slice %32 {offsets = [4, 0], sizes = [4, 32], strides = [1, 1]} : vector<8x32xf32> to vector<4x32xf32>
    %139 = vector.extract_strided_slice %33 {offsets = [4, 0], sizes = [4, 32], strides = [1, 1]} : vector<8x32xf32> to vector<4x32xf32>
    %140 = vector.extract_strided_slice %34 {offsets = [4, 0], sizes = [4, 32], strides = [1, 1]} : vector<8x32xf32> to vector<4x32xf32>
    %c0_i32_65 = arith.constant 0 : i32
    %141 = vector.broadcast %c0_i32_65 : i32 to vector<1x32xi32>
    %142 = arith.cmpi sge, %35, %141 : vector<1x32xi32>
    %c8_i32_66 = arith.constant 8 : i32
    %143 = vector.broadcast %c8_i32_66 : i32 to vector<1x32xi32>
    %144 = arith.cmpi slt, %35, %143 : vector<1x32xi32>
    %145 = arith.andi %142, %144 : vector<1x32xi1>
    %146 = arith.extui %145 : vector<1x32xi1> to vector<1x32xi32>
    %147 = arith.sitofp %146 : vector<1x32xi32> to vector<1x32xf32>
    %148 = vector.broadcast %147 : vector<1x32xf32> to vector<4x32xf32>
    %149 = arith.mulf %138, %148 : vector<4x32xf32>
    %cst_67 = arith.constant dense<0.000000e+00> : vector<4x4xf32>
    %150 = tpu.matmul %149, %139, %cst_67 {dimension_numbers = #tpu.dot_dimension_numbers<[1], [1], [0], [0], [0, 0, 1, 0], [], []>} : vector<4x32xf32>, vector<4x32xf32>, vector<4x4xf32> -> vector<4x4xf32>
    %cst_68 = arith.constant 0.353553385 : f32
    %151 = vector.broadcast %cst_68 : f32 to vector<4x4xf32>
    %152 = arith.mulf %150, %151 : vector<4x4xf32>
    %cst_69 = arith.constant dense<0xFF800000> : vector<4xf32>
    %153 = vector.multi_reduction <maximumf>, %152, %cst_69 [1] : vector<4x4xf32> to vector<4xf32>
    %154 = vector.shape_cast %153 : vector<4xf32> to vector<4x1xf32>
    %155 = vector.broadcast %154 : vector<4x1xf32> to vector<4x4xf32>
    %156 = arith.subf %152, %155 : vector<4x4xf32>
    %157 = math.exp %156 : vector<4x4xf32>
    %cst_70 = arith.constant dense<0.000000e+00> : vector<4xf32>
    %158 = vector.multi_reduction <add>, %157, %cst_70 [1] : vector<4x4xf32> to vector<4xf32>
    %159 = vector.shape_cast %158 : vector<4xf32> to vector<4x1xf32>
    %160 = vector.broadcast %159 : vector<4x1xf32> to vector<4x4xf32>
    %161 = arith.divf %157, %160 : vector<4x4xf32>
    %162 = vector.broadcast %147 : vector<1x32xf32> to vector<4x32xf32>
    %163 = arith.mulf %140, %162 : vector<4x32xf32>
    %cst_71 = arith.constant dense<0.000000e+00> : vector<4x32xf32>
    %164 = tpu.matmul %161, %163, %cst_71 {dimension_numbers = #tpu.dot_dimension_numbers<[1], [0], [0], [1], [0, 0, 1, 1], [], []>} : vector<4x4xf32>, vector<4x32xf32>, vector<4x32xf32> -> vector<4x32xf32>
    %c8_i32_72 = arith.constant 8 : i32
    %165 = vector.broadcast %c8_i32_72 : i32 to vector<1x32xi32>
    %166 = arith.cmpi sge, %35, %165 : vector<1x32xi32>
    %c16_i32_73 = arith.constant 16 : i32
    %167 = vector.broadcast %c16_i32_73 : i32 to vector<1x32xi32>
    %168 = arith.cmpi slt, %35, %167 : vector<1x32xi32>
    %169 = arith.andi %166, %168 : vector<1x32xi1>
    %170 = arith.extui %169 : vector<1x32xi1> to vector<1x32xi32>
    %171 = arith.sitofp %170 : vector<1x32xi32> to vector<1x32xf32>
    %172 = vector.broadcast %171 : vector<1x32xf32> to vector<4x32xf32>
    %173 = arith.mulf %138, %172 : vector<4x32xf32>
    %cst_74 = arith.constant dense<0.000000e+00> : vector<4x4xf32>
    %174 = tpu.matmul %173, %139, %cst_74 {dimension_numbers = #tpu.dot_dimension_numbers<[1], [1], [0], [0], [0, 0, 1, 0], [], []>} : vector<4x32xf32>, vector<4x32xf32>, vector<4x4xf32> -> vector<4x4xf32>
    %cst_75 = arith.constant 0.353553385 : f32
    %175 = vector.broadcast %cst_75 : f32 to vector<4x4xf32>
    %176 = arith.mulf %174, %175 : vector<4x4xf32>
    %cst_76 = arith.constant dense<0xFF800000> : vector<4xf32>
    %177 = vector.multi_reduction <maximumf>, %176, %cst_76 [1] : vector<4x4xf32> to vector<4xf32>
    %178 = vector.shape_cast %177 : vector<4xf32> to vector<4x1xf32>
    %179 = vector.broadcast %178 : vector<4x1xf32> to vector<4x4xf32>
    %180 = arith.subf %176, %179 : vector<4x4xf32>
    %181 = math.exp %180 : vector<4x4xf32>
    %cst_77 = arith.constant dense<0.000000e+00> : vector<4xf32>
    %182 = vector.multi_reduction <add>, %181, %cst_77 [1] : vector<4x4xf32> to vector<4xf32>
    %183 = vector.shape_cast %182 : vector<4xf32> to vector<4x1xf32>
    %184 = vector.broadcast %183 : vector<4x1xf32> to vector<4x4xf32>
    %185 = arith.divf %181, %184 : vector<4x4xf32>
    %186 = vector.broadcast %171 : vector<1x32xf32> to vector<4x32xf32>
    %187 = arith.mulf %140, %186 : vector<4x32xf32>
    %cst_78 = arith.constant dense<0.000000e+00> : vector<4x32xf32>
    %188 = tpu.matmul %185, %187, %cst_78 {dimension_numbers = #tpu.dot_dimension_numbers<[1], [0], [0], [1], [0, 0, 1, 1], [], []>} : vector<4x4xf32>, vector<4x32xf32>, vector<4x32xf32> -> vector<4x32xf32>
    %c16_i32_79 = arith.constant 16 : i32
    %189 = vector.broadcast %c16_i32_79 : i32 to vector<1x32xi32>
    %190 = arith.cmpi sge, %35, %189 : vector<1x32xi32>
    %c24_i32_80 = arith.constant 24 : i32
    %191 = vector.broadcast %c24_i32_80 : i32 to vector<1x32xi32>
    %192 = arith.cmpi slt, %35, %191 : vector<1x32xi32>
    %193 = arith.andi %190, %192 : vector<1x32xi1>
    %194 = arith.extui %193 : vector<1x32xi1> to vector<1x32xi32>
    %195 = arith.sitofp %194 : vector<1x32xi32> to vector<1x32xf32>
    %196 = vector.broadcast %195 : vector<1x32xf32> to vector<4x32xf32>
    %197 = arith.mulf %138, %196 : vector<4x32xf32>
    %cst_81 = arith.constant dense<0.000000e+00> : vector<4x4xf32>
    %198 = tpu.matmul %197, %139, %cst_81 {dimension_numbers = #tpu.dot_dimension_numbers<[1], [1], [0], [0], [0, 0, 1, 0], [], []>} : vector<4x32xf32>, vector<4x32xf32>, vector<4x4xf32> -> vector<4x4xf32>
    %cst_82 = arith.constant 0.353553385 : f32
    %199 = vector.broadcast %cst_82 : f32 to vector<4x4xf32>
    %200 = arith.mulf %198, %199 : vector<4x4xf32>
    %cst_83 = arith.constant dense<0xFF800000> : vector<4xf32>
    %201 = vector.multi_reduction <maximumf>, %200, %cst_83 [1] : vector<4x4xf32> to vector<4xf32>
    %202 = vector.shape_cast %201 : vector<4xf32> to vector<4x1xf32>
    %203 = vector.broadcast %202 : vector<4x1xf32> to vector<4x4xf32>
    %204 = arith.subf %200, %203 : vector<4x4xf32>
    %205 = math.exp %204 : vector<4x4xf32>
    %cst_84 = arith.constant dense<0.000000e+00> : vector<4xf32>
    %206 = vector.multi_reduction <add>, %205, %cst_84 [1] : vector<4x4xf32> to vector<4xf32>
    %207 = vector.shape_cast %206 : vector<4xf32> to vector<4x1xf32>
    %208 = vector.broadcast %207 : vector<4x1xf32> to vector<4x4xf32>
    %209 = arith.divf %205, %208 : vector<4x4xf32>
    %210 = vector.broadcast %195 : vector<1x32xf32> to vector<4x32xf32>
    %211 = arith.mulf %140, %210 : vector<4x32xf32>
    %cst_85 = arith.constant dense<0.000000e+00> : vector<4x32xf32>
    %212 = tpu.matmul %209, %211, %cst_85 {dimension_numbers = #tpu.dot_dimension_numbers<[1], [0], [0], [1], [0, 0, 1, 1], [], []>} : vector<4x4xf32>, vector<4x32xf32>, vector<4x32xf32> -> vector<4x32xf32>
    %c24_i32_86 = arith.constant 24 : i32
    %213 = vector.broadcast %c24_i32_86 : i32 to vector<1x32xi32>
    %214 = arith.cmpi sge, %35, %213 : vector<1x32xi32>
    %c32_i32_87 = arith.constant 32 : i32
    %215 = vector.broadcast %c32_i32_87 : i32 to vector<1x32xi32>
    %216 = arith.cmpi slt, %35, %215 : vector<1x32xi32>
    %217 = arith.andi %214, %216 : vector<1x32xi1>
    %218 = arith.extui %217 : vector<1x32xi1> to vector<1x32xi32>
    %219 = arith.sitofp %218 : vector<1x32xi32> to vector<1x32xf32>
    %220 = vector.broadcast %219 : vector<1x32xf32> to vector<4x32xf32>
    %221 = arith.mulf %138, %220 : vector<4x32xf32>
    %cst_88 = arith.constant dense<0.000000e+00> : vector<4x4xf32>
    %222 = tpu.matmul %221, %139, %cst_88 {dimension_numbers = #tpu.dot_dimension_numbers<[1], [1], [0], [0], [0, 0, 1, 0], [], []>} : vector<4x32xf32>, vector<4x32xf32>, vector<4x4xf32> -> vector<4x4xf32>
    %cst_89 = arith.constant 0.353553385 : f32
    %223 = vector.broadcast %cst_89 : f32 to vector<4x4xf32>
    %224 = arith.mulf %222, %223 : vector<4x4xf32>
    %cst_90 = arith.constant dense<0xFF800000> : vector<4xf32>
    %225 = vector.multi_reduction <maximumf>, %224, %cst_90 [1] : vector<4x4xf32> to vector<4xf32>
    %226 = vector.shape_cast %225 : vector<4xf32> to vector<4x1xf32>
    %227 = vector.broadcast %226 : vector<4x1xf32> to vector<4x4xf32>
    %228 = arith.subf %224, %227 : vector<4x4xf32>
    %229 = math.exp %228 : vector<4x4xf32>
    %cst_91 = arith.constant dense<0.000000e+00> : vector<4xf32>
    %230 = vector.multi_reduction <add>, %229, %cst_91 [1] : vector<4x4xf32> to vector<4xf32>
    %231 = vector.shape_cast %230 : vector<4xf32> to vector<4x1xf32>
    %232 = vector.broadcast %231 : vector<4x1xf32> to vector<4x4xf32>
    %233 = arith.divf %229, %232 : vector<4x4xf32>
    %234 = vector.broadcast %219 : vector<1x32xf32> to vector<4x32xf32>
    %235 = arith.mulf %140, %234 : vector<4x32xf32>
    %cst_92 = arith.constant dense<0.000000e+00> : vector<4x32xf32>
    %236 = tpu.matmul %233, %235, %cst_92 {dimension_numbers = #tpu.dot_dimension_numbers<[1], [0], [0], [1], [0, 0, 1, 1], [], []>} : vector<4x4xf32>, vector<4x32xf32>, vector<4x32xf32> -> vector<4x32xf32>
    %237 = arith.addf %164, %188 : vector<4x32xf32>
    %238 = arith.addf %237, %212 : vector<4x32xf32>
    %239 = arith.addf %238, %236 : vector<4x32xf32>
    %240 = tpu.concatenate %137, %239 in 0 : vector<4x32xf32>, vector<4x32xf32> -> vector<8x32xf32>
    %cst_93 = arith.constant dense<0.000000e+00> : vector<8x32xf32>
    %241 = tpu.matmul %240, %10, %cst_93 {dimension_numbers = #tpu.dot_dimension_numbers<[1], [0], [0], [1], [0, 0, 1, 1], [], []>} : vector<8x32xf32>, vector<32x32xf32>, vector<8x32xf32> -> vector<8x32xf32>
    %242 = vector.broadcast %12 : vector<1x32xf32> to vector<8x32xf32>
    %243 = arith.addf %241, %242 : vector<8x32xf32>
    %244 = arith.addf %4, %243 : vector<8x32xf32>
    %cst_94 = arith.constant dense<0.000000e+00> : vector<8xf32>
    %245 = vector.multi_reduction <add>, %244, %cst_94 [1] : vector<8x32xf32> to vector<8xf32>
    %246 = vector.shape_cast %245 : vector<8xf32> to vector<8x1xf32>
    %cst_95 = arith.constant 3.200000e+01 : f32
    %247 = vector.broadcast %cst_95 : f32 to vector<8x1xf32>
    %248 = arith.divf %246, %247 : vector<8x1xf32>
    %249 = vector.broadcast %248 : vector<8x1xf32> to vector<8x32xf32>
    %250 = arith.subf %244, %249 : vector<8x32xf32>
    %251 = arith.mulf %250, %250 : vector<8x32xf32>
    %cst_96 = arith.constant dense<0.000000e+00> : vector<8xf32>
    %252 = vector.multi_reduction <add>, %251, %cst_96 [1] : vector<8x32xf32> to vector<8xf32>
    %253 = vector.shape_cast %252 : vector<8xf32> to vector<8x1xf32>
    %cst_97 = arith.constant 3.200000e+01 : f32
    %254 = vector.broadcast %cst_97 : f32 to vector<8x1xf32>
    %255 = arith.divf %253, %254 : vector<8x1xf32>
    %cst_98 = arith.constant 9.99999974E-6 : f32
    %256 = vector.broadcast %cst_98 : f32 to vector<8x1xf32>
    %257 = arith.addf %255, %256 : vector<8x1xf32>
    %258 = math.rsqrt %257 : vector<8x1xf32>
    %259 = vector.broadcast %258 : vector<8x1xf32> to vector<8x32xf32>
    %260 = arith.mulf %250, %259 : vector<8x32xf32>
    %261 = vector.broadcast %14 : vector<1x32xf32> to vector<8x32xf32>
    %262 = arith.mulf %260, %261 : vector<8x32xf32>
    %263 = vector.broadcast %16 : vector<1x32xf32> to vector<8x32xf32>
    %264 = arith.addf %262, %263 : vector<8x32xf32>
    %cst_99 = arith.constant dense<0.000000e+00> : vector<8x64xf32>
    %265 = tpu.matmul %264, %18, %cst_99 {dimension_numbers = #tpu.dot_dimension_numbers<[1], [0], [0], [1], [0, 0, 1, 1], [], []>} : vector<8x32xf32>, vector<32x64xf32>, vector<8x64xf32> -> vector<8x64xf32>
    %266 = vector.broadcast %20 : vector<1x64xf32> to vector<8x64xf32>
    %267 = arith.addf %265, %266 : vector<8x64xf32>
    %cst_100 = arith.constant 0.000000e+00 : f32
    %268 = vector.broadcast %cst_100 : f32 to vector<8x64xf32>
    %269 = arith.maximumf %267, %268 : vector<8x64xf32>
    %cst_101 = arith.constant dense<0.000000e+00> : vector<8x32xf32>
    %270 = tpu.matmul %269, %22, %cst_101 {dimension_numbers = #tpu.dot_dimension_numbers<[1], [0], [0], [1], [0, 0, 1, 1], [], []>} : vector<8x64xf32>, vector<64x32xf32>, vector<8x32xf32> -> vector<8x32xf32>
    %271 = vector.broadcast %24 : vector<1x32xf32> to vector<8x32xf32>
    %272 = arith.addf %270, %271 : vector<8x32xf32>
    %273 = arith.addf %264, %272 : vector<8x32xf32>
    %cst_102 = arith.constant dense<0.000000e+00> : vector<8xf32>
    %274 = vector.multi_reduction <add>, %273, %cst_102 [1] : vector<8x32xf32> to vector<8xf32>
    %275 = vector.shape_cast %274 : vector<8xf32> to vector<8x1xf32>
    %cst_103 = arith.constant 3.200000e+01 : f32
    %276 = vector.broadcast %cst_103 : f32 to vector<8x1xf32>
    %277 = arith.divf %275, %276 : vector<8x1xf32>
    %278 = vector.broadcast %277 : vector<8x1xf32> to vector<8x32xf32>
    %279 = arith.subf %273, %278 : vector<8x32xf32>
    %280 = arith.mulf %279, %279 : vector<8x32xf32>
    %cst_104 = arith.constant dense<0.000000e+00> : vector<8xf32>
    %281 = vector.multi_reduction <add>, %280, %cst_104 [1] : vector<8x32xf32> to vector<8xf32>
    %282 = vector.shape_cast %281 : vector<8xf32> to vector<8x1xf32>
    %cst_105 = arith.constant 3.200000e+01 : f32
    %283 = vector.broadcast %cst_105 : f32 to vector<8x1xf32>
    %284 = arith.divf %282, %283 : vector<8x1xf32>
    %cst_106 = arith.constant 9.99999974E-6 : f32
    %285 = vector.broadcast %cst_106 : f32 to vector<8x1xf32>
    %286 = arith.addf %284, %285 : vector<8x1xf32>
    %287 = math.rsqrt %286 : vector<8x1xf32>
    %288 = vector.broadcast %287 : vector<8x1xf32> to vector<8x32xf32>
    %289 = arith.mulf %279, %288 : vector<8x32xf32>
    %290 = vector.broadcast %26 : vector<1x32xf32> to vector<8x32xf32>
    %291 = arith.mulf %289, %290 : vector<8x32xf32>
    %292 = vector.broadcast %28 : vector<1x32xf32> to vector<8x32xf32>
    %293 = arith.addf %291, %292 : vector<8x32xf32>
    %294 = vector.extract_strided_slice %293 {offsets = [0, 0], sizes = [4, 32], strides = [1, 1]} : vector<8x32xf32> to vector<4x32xf32>
    %cst_107 = arith.constant dense<0.000000e+00> : vector<32xf32>
    %295 = vector.multi_reduction <add>, %294, %cst_107 [0] : vector<4x32xf32> to vector<32xf32>
    %296 = vector.shape_cast %295 : vector<32xf32> to vector<1x32xf32>
    %cst_108 = arith.constant 4.000000e+00 : f32
    %297 = vector.broadcast %cst_108 : f32 to vector<1x32xf32>
    %298 = arith.divf %296, %297 : vector<1x32xf32>
    %299 = vector.extract_strided_slice %293 {offsets = [4, 0], sizes = [4, 32], strides = [1, 1]} : vector<8x32xf32> to vector<4x32xf32>
    %cst_109 = arith.constant dense<0.000000e+00> : vector<32xf32>
    %300 = vector.multi_reduction <add>, %299, %cst_109 [0] : vector<4x32xf32> to vector<32xf32>
    %301 = vector.shape_cast %300 : vector<32xf32> to vector<1x32xf32>
    %cst_110 = arith.constant 4.000000e+00 : f32
    %302 = vector.broadcast %cst_110 : f32 to vector<1x32xf32>
    %303 = arith.divf %301, %302 : vector<1x32xf32>
    %304 = tpu.concatenate %298, %303 in 0 : vector<1x32xf32>, vector<1x32xf32> -> vector<2x32xf32>
    %c0_111 = arith.constant 0 : index
    %c0_112 = arith.constant 0 : index
    %305 = vector.load %arg15[%c0_111, %c0_112] : memref<32x64xf32, #tpu.memory_space<vmem>>, vector<32x64xf32>
    %cst_113 = arith.constant dense<0.000000e+00> : vector<2x64xf32>
    %306 = tpu.matmul %304, %305, %cst_113 {dimension_numbers = #tpu.dot_dimension_numbers<[1], [0], [0], [1], [0, 0, 1, 1], [], []>} : vector<2x32xf32>, vector<32x64xf32>, vector<2x64xf32> -> vector<2x64xf32>
    %c0_114 = arith.constant 0 : index
    %c0_115 = arith.constant 0 : index
    %307 = vector.load %arg16[%c0_114, %c0_115] : memref<1x64xf32, #tpu.memory_space<vmem>>, vector<1x64xf32>
    %308 = vector.broadcast %307 : vector<1x64xf32> to vector<2x64xf32>
    %309 = arith.addf %306, %308 : vector<2x64xf32>
    %c0_116 = arith.constant 0 : index
    %c0_117 = arith.constant 0 : index
    %310 = vector.load %arg17[%c0_116, %c0_117] : memref<2x64xf32, #tpu.memory_space<vmem>>, vector<2x64xf32>
    tpu.vector_store %arg17[%c0_116, %c0_117], %309 {strides = array<i32>} : memref<2x64xf32, #tpu.memory_space<vmem>>, vector<2x64xf32>,
    return
  }
}

module attributes {stable_mosaic.version = 11 : i64} {
  func.func @_llm_kernel(%arg0: memref<2x32xf32, #tpu.memory_space<vmem>>, %arg1: memref<2x32x96xf32, #tpu.memory_space<vmem>>, %arg2: memref<2x1x96xf32, #tpu.memory_space<vmem>>, %arg3: memref<2x32x32xf32, #tpu.memory_space<vmem>>, %arg4: memref<2x1x32xf32, #tpu.memory_space<vmem>>, %arg5: memref<2x1x32xf32, #tpu.memory_space<vmem>>, %arg6: memref<2x1x32xf32, #tpu.memory_space<vmem>>, %arg7: memref<2x32x64xf32, #tpu.memory_space<vmem>>, %arg8: memref<2x1x64xf32, #tpu.memory_space<vmem>>, %arg9: memref<2x64x32xf32, #tpu.memory_space<vmem>>, %arg10: memref<2x1x32xf32, #tpu.memory_space<vmem>>, %arg11: memref<2x1x32xf32, #tpu.memory_space<vmem>>, %arg12: memref<2x1x32xf32, #tpu.memory_space<vmem>>, %arg13: memref<32x256xf32, #tpu.memory_space<vmem>>, %arg14: memref<1x256xf32, #tpu.memory_space<vmem>>, %arg15: memref<2x256xf32, #tpu.memory_space<vmem>>, %arg16: memref<2x32xf32, #tpu.memory_space<vmem>>) attributes {dimension_semantics = [], scalar_prefetch = 0 : i64, scratch_operands = 0 : i64, tpu.core_type = #tpu.core_type<tc>} {
    %c0 = arith.constant 0 : index
    %c0_0 = arith.constant 0 : index
    %0 = vector.load %arg0[%c0, %c0_0] : memref<2x32xf32, #tpu.memory_space<vmem>>, vector<2x32xf32>
    %c0_1 = arith.constant 0 : index
    %c0_2 = arith.constant 0 : index
    %c0_3 = arith.constant 0 : index
    %1 = vector.load %arg1[%c0_1, %c0_2, %c0_3] : memref<2x32x96xf32, #tpu.memory_space<vmem>>, vector<1x32x96xf32>
    %2 = vector.shape_cast %1 : vector<1x32x96xf32> to vector<32x96xf32>
    %c0_4 = arith.constant 0 : index
    %c0_5 = arith.constant 0 : index
    %c0_6 = arith.constant 0 : index
    %3 = vector.load %arg2[%c0_4, %c0_5, %c0_6] : memref<2x1x96xf32, #tpu.memory_space<vmem>>, vector<1x1x96xf32>
    %4 = vector.shape_cast %3 : vector<1x1x96xf32> to vector<1x96xf32>
    %c0_7 = arith.constant 0 : index
    %c0_8 = arith.constant 0 : index
    %c0_9 = arith.constant 0 : index
    %5 = vector.load %arg3[%c0_7, %c0_8, %c0_9] : memref<2x32x32xf32, #tpu.memory_space<vmem>>, vector<1x32x32xf32>
    %6 = vector.shape_cast %5 : vector<1x32x32xf32> to vector<32x32xf32>
    %c0_10 = arith.constant 0 : index
    %c0_11 = arith.constant 0 : index
    %c0_12 = arith.constant 0 : index
    %7 = vector.load %arg4[%c0_10, %c0_11, %c0_12] : memref<2x1x32xf32, #tpu.memory_space<vmem>>, vector<1x1x32xf32>
    %8 = vector.shape_cast %7 : vector<1x1x32xf32> to vector<1x32xf32>
    %c0_13 = arith.constant 0 : index
    %c0_14 = arith.constant 0 : index
    %c0_15 = arith.constant 0 : index
    %9 = vector.load %arg5[%c0_13, %c0_14, %c0_15] : memref<2x1x32xf32, #tpu.memory_space<vmem>>, vector<1x1x32xf32>
    %10 = vector.shape_cast %9 : vector<1x1x32xf32> to vector<1x32xf32>
    %c0_16 = arith.constant 0 : index
    %c0_17 = arith.constant 0 : index
    %c0_18 = arith.constant 0 : index
    %11 = vector.load %arg6[%c0_16, %c0_17, %c0_18] : memref<2x1x32xf32, #tpu.memory_space<vmem>>, vector<1x1x32xf32>
    %12 = vector.shape_cast %11 : vector<1x1x32xf32> to vector<1x32xf32>
    %c0_19 = arith.constant 0 : index
    %c0_20 = arith.constant 0 : index
    %c0_21 = arith.constant 0 : index
    %13 = vector.load %arg7[%c0_19, %c0_20, %c0_21] : memref<2x32x64xf32, #tpu.memory_space<vmem>>, vector<1x32x64xf32>
    %14 = vector.shape_cast %13 : vector<1x32x64xf32> to vector<32x64xf32>
    %c0_22 = arith.constant 0 : index
    %c0_23 = arith.constant 0 : index
    %c0_24 = arith.constant 0 : index
    %15 = vector.load %arg8[%c0_22, %c0_23, %c0_24] : memref<2x1x64xf32, #tpu.memory_space<vmem>>, vector<1x1x64xf32>
    %16 = vector.shape_cast %15 : vector<1x1x64xf32> to vector<1x64xf32>
    %c0_25 = arith.constant 0 : index
    %c0_26 = arith.constant 0 : index
    %c0_27 = arith.constant 0 : index
    %17 = vector.load %arg9[%c0_25, %c0_26, %c0_27] : memref<2x64x32xf32, #tpu.memory_space<vmem>>, vector<1x64x32xf32>
    %18 = vector.shape_cast %17 : vector<1x64x32xf32> to vector<64x32xf32>
    %c0_28 = arith.constant 0 : index
    %c0_29 = arith.constant 0 : index
    %c0_30 = arith.constant 0 : index
    %19 = vector.load %arg10[%c0_28, %c0_29, %c0_30] : memref<2x1x32xf32, #tpu.memory_space<vmem>>, vector<1x1x32xf32>
    %20 = vector.shape_cast %19 : vector<1x1x32xf32> to vector<1x32xf32>
    %c0_31 = arith.constant 0 : index
    %c0_32 = arith.constant 0 : index
    %c0_33 = arith.constant 0 : index
    %21 = vector.load %arg11[%c0_31, %c0_32, %c0_33] : memref<2x1x32xf32, #tpu.memory_space<vmem>>, vector<1x1x32xf32>
    %22 = vector.shape_cast %21 : vector<1x1x32xf32> to vector<1x32xf32>
    %c0_34 = arith.constant 0 : index
    %c0_35 = arith.constant 0 : index
    %c0_36 = arith.constant 0 : index
    %23 = vector.load %arg12[%c0_34, %c0_35, %c0_36] : memref<2x1x32xf32, #tpu.memory_space<vmem>>, vector<1x1x32xf32>
    %24 = vector.shape_cast %23 : vector<1x1x32xf32> to vector<1x32xf32>
    %cst = arith.constant dense<0.000000e+00> : vector<2x96xf32>
    %25 = tpu.matmul %0, %2, %cst {dimension_numbers = #tpu.dot_dimension_numbers<[1], [0], [0], [1], [0, 0, 1, 1], [], []>} : vector<2x32xf32>, vector<32x96xf32>, vector<2x96xf32> -> vector<2x96xf32>
    %26 = vector.broadcast %4 : vector<1x96xf32> to vector<2x96xf32>
    %27 = arith.addf %25, %26 : vector<2x96xf32>
    %28 = vector.extract_strided_slice %27 {offsets = [0, 64], sizes = [2, 32], strides = [1, 1]} : vector<2x96xf32> to vector<2x32xf32>
    %cst_37 = arith.constant dense<0.000000e+00> : vector<2x32xf32>
    %29 = tpu.matmul %28, %6, %cst_37 {dimension_numbers = #tpu.dot_dimension_numbers<[1], [0], [0], [1], [0, 0, 1, 1], [], []>} : vector<2x32xf32>, vector<32x32xf32>, vector<2x32xf32> -> vector<2x32xf32>
    %30 = vector.broadcast %8 : vector<1x32xf32> to vector<2x32xf32>
    %31 = arith.addf %29, %30 : vector<2x32xf32>
    %32 = arith.addf %0, %31 : vector<2x32xf32>
    %cst_38 = arith.constant dense<0.000000e+00> : vector<2xf32>
    %33 = vector.multi_reduction <add>, %32, %cst_38 [1] : vector<2x32xf32> to vector<2xf32>
    %34 = vector.shape_cast %33 : vector<2xf32> to vector<2x1xf32>
    %cst_39 = arith.constant 3.200000e+01 : f32
    %35 = vector.broadcast %cst_39 : f32 to vector<2x1xf32>
    %36 = arith.divf %34, %35 : vector<2x1xf32>
    %37 = vector.broadcast %36 : vector<2x1xf32> to vector<2x32xf32>
    %38 = arith.subf %32, %37 : vector<2x32xf32>
    %39 = arith.mulf %38, %38 : vector<2x32xf32>
    %cst_40 = arith.constant dense<0.000000e+00> : vector<2xf32>
    %40 = vector.multi_reduction <add>, %39, %cst_40 [1] : vector<2x32xf32> to vector<2xf32>
    %41 = vector.shape_cast %40 : vector<2xf32> to vector<2x1xf32>
    %cst_41 = arith.constant 3.200000e+01 : f32
    %42 = vector.broadcast %cst_41 : f32 to vector<2x1xf32>
    %43 = arith.divf %41, %42 : vector<2x1xf32>
    %cst_42 = arith.constant 9.99999974E-6 : f32
    %44 = vector.broadcast %cst_42 : f32 to vector<2x1xf32>
    %45 = arith.addf %43, %44 : vector<2x1xf32>
    %46 = math.rsqrt %45 : vector<2x1xf32>
    %47 = vector.broadcast %46 : vector<2x1xf32> to vector<2x32xf32>
    %48 = arith.mulf %38, %47 : vector<2x32xf32>
    %49 = vector.broadcast %10 : vector<1x32xf32> to vector<2x32xf32>
    %50 = arith.mulf %48, %49 : vector<2x32xf32>
    %51 = vector.broadcast %12 : vector<1x32xf32> to vector<2x32xf32>
    %52 = arith.addf %50, %51 : vector<2x32xf32>
    %cst_43 = arith.constant dense<0.000000e+00> : vector<2x64xf32>
    %53 = tpu.matmul %52, %14, %cst_43 {dimension_numbers = #tpu.dot_dimension_numbers<[1], [0], [0], [1], [0, 0, 1, 1], [], []>} : vector<2x32xf32>, vector<32x64xf32>, vector<2x64xf32> -> vector<2x64xf32>
    %54 = vector.broadcast %16 : vector<1x64xf32> to vector<2x64xf32>
    %55 = arith.addf %53, %54 : vector<2x64xf32>
    %cst_44 = arith.constant 0.000000e+00 : f32
    %56 = vector.broadcast %cst_44 : f32 to vector<2x64xf32>
    %57 = arith.maximumf %55, %56 : vector<2x64xf32>
    %cst_45 = arith.constant dense<0.000000e+00> : vector<2x32xf32>
    %58 = tpu.matmul %57, %18, %cst_45 {dimension_numbers = #tpu.dot_dimension_numbers<[1], [0], [0], [1], [0, 0, 1, 1], [], []>} : vector<2x64xf32>, vector<64x32xf32>, vector<2x32xf32> -> vector<2x32xf32>
    %59 = vector.broadcast %20 : vector<1x32xf32> to vector<2x32xf32>
    %60 = arith.addf %58, %59 : vector<2x32xf32>
    %61 = arith.addf %52, %60 : vector<2x32xf32>
    %cst_46 = arith.constant dense<0.000000e+00> : vector<2xf32>
    %62 = vector.multi_reduction <add>, %61, %cst_46 [1] : vector<2x32xf32> to vector<2xf32>
    %63 = vector.shape_cast %62 : vector<2xf32> to vector<2x1xf32>
    %cst_47 = arith.constant 3.200000e+01 : f32
    %64 = vector.broadcast %cst_47 : f32 to vector<2x1xf32>
    %65 = arith.divf %63, %64 : vector<2x1xf32>
    %66 = vector.broadcast %65 : vector<2x1xf32> to vector<2x32xf32>
    %67 = arith.subf %61, %66 : vector<2x32xf32>
    %68 = arith.mulf %67, %67 : vector<2x32xf32>
    %cst_48 = arith.constant dense<0.000000e+00> : vector<2xf32>
    %69 = vector.multi_reduction <add>, %68, %cst_48 [1] : vector<2x32xf32> to vector<2xf32>
    %70 = vector.shape_cast %69 : vector<2xf32> to vector<2x1xf32>
    %cst_49 = arith.constant 3.200000e+01 : f32
    %71 = vector.broadcast %cst_49 : f32 to vector<2x1xf32>
    %72 = arith.divf %70, %71 : vector<2x1xf32>
    %cst_50 = arith.constant 9.99999974E-6 : f32
    %73 = vector.broadcast %cst_50 : f32 to vector<2x1xf32>
    %74 = arith.addf %72, %73 : vector<2x1xf32>
    %75 = math.rsqrt %74 : vector<2x1xf32>
    %76 = vector.broadcast %75 : vector<2x1xf32> to vector<2x32xf32>
    %77 = arith.mulf %67, %76 : vector<2x32xf32>
    %78 = vector.broadcast %22 : vector<1x32xf32> to vector<2x32xf32>
    %79 = arith.mulf %77, %78 : vector<2x32xf32>
    %80 = vector.broadcast %24 : vector<1x32xf32> to vector<2x32xf32>
    %81 = arith.addf %79, %80 : vector<2x32xf32>
    %c1 = arith.constant 1 : index
    %c0_51 = arith.constant 0 : index
    %c0_52 = arith.constant 0 : index
    %82 = vector.load %arg1[%c1, %c0_51, %c0_52] : memref<2x32x96xf32, #tpu.memory_space<vmem>>, vector<1x32x96xf32>
    %83 = vector.shape_cast %82 : vector<1x32x96xf32> to vector<32x96xf32>
    %c1_53 = arith.constant 1 : index
    %c0_54 = arith.constant 0 : index
    %c0_55 = arith.constant 0 : index
    %84 = vector.load %arg2[%c1_53, %c0_54, %c0_55] : memref<2x1x96xf32, #tpu.memory_space<vmem>>, vector<1x1x96xf32>
    %85 = vector.shape_cast %84 : vector<1x1x96xf32> to vector<1x96xf32>
    %c1_56 = arith.constant 1 : index
    %c0_57 = arith.constant 0 : index
    %c0_58 = arith.constant 0 : index
    %86 = vector.load %arg3[%c1_56, %c0_57, %c0_58] : memref<2x32x32xf32, #tpu.memory_space<vmem>>, vector<1x32x32xf32>
    %87 = vector.shape_cast %86 : vector<1x32x32xf32> to vector<32x32xf32>
    %c1_59 = arith.constant 1 : index
    %c0_60 = arith.constant 0 : index
    %c0_61 = arith.constant 0 : index
    %88 = vector.load %arg4[%c1_59, %c0_60, %c0_61] : memref<2x1x32xf32, #tpu.memory_space<vmem>>, vector<1x1x32xf32>
    %89 = vector.shape_cast %88 : vector<1x1x32xf32> to vector<1x32xf32>
    %c1_62 = arith.constant 1 : index
    %c0_63 = arith.constant 0 : index
    %c0_64 = arith.constant 0 : index
    %90 = vector.load %arg5[%c1_62, %c0_63, %c0_64] : memref<2x1x32xf32, #tpu.memory_space<vmem>>, vector<1x1x32xf32>
    %91 = vector.shape_cast %90 : vector<1x1x32xf32> to vector<1x32xf32>
    %c1_65 = arith.constant 1 : index
    %c0_66 = arith.constant 0 : index
    %c0_67 = arith.constant 0 : index
    %92 = vector.load %arg6[%c1_65, %c0_66, %c0_67] : memref<2x1x32xf32, #tpu.memory_space<vmem>>, vector<1x1x32xf32>
    %93 = vector.shape_cast %92 : vector<1x1x32xf32> to vector<1x32xf32>
    %c1_68 = arith.constant 1 : index
    %c0_69 = arith.constant 0 : index
    %c0_70 = arith.constant 0 : index
    %94 = vector.load %arg7[%c1_68, %c0_69, %c0_70] : memref<2x32x64xf32, #tpu.memory_space<vmem>>, vector<1x32x64xf32>
    %95 = vector.shape_cast %94 : vector<1x32x64xf32> to vector<32x64xf32>
    %c1_71 = arith.constant 1 : index
    %c0_72 = arith.constant 0 : index
    %c0_73 = arith.constant 0 : index
    %96 = vector.load %arg8[%c1_71, %c0_72, %c0_73] : memref<2x1x64xf32, #tpu.memory_space<vmem>>, vector<1x1x64xf32>
    %97 = vector.shape_cast %96 : vector<1x1x64xf32> to vector<1x64xf32>
    %c1_74 = arith.constant 1 : index
    %c0_75 = arith.constant 0 : index
    %c0_76 = arith.constant 0 : index
    %98 = vector.load %arg9[%c1_74, %c0_75, %c0_76] : memref<2x64x32xf32, #tpu.memory_space<vmem>>, vector<1x64x32xf32>
    %99 = vector.shape_cast %98 : vector<1x64x32xf32> to vector<64x32xf32>
    %c1_77 = arith.constant 1 : index
    %c0_78 = arith.constant 0 : index
    %c0_79 = arith.constant 0 : index
    %100 = vector.load %arg10[%c1_77, %c0_78, %c0_79] : memref<2x1x32xf32, #tpu.memory_space<vmem>>, vector<1x1x32xf32>
    %101 = vector.shape_cast %100 : vector<1x1x32xf32> to vector<1x32xf32>
    %c1_80 = arith.constant 1 : index
    %c0_81 = arith.constant 0 : index
    %c0_82 = arith.constant 0 : index
    %102 = vector.load %arg11[%c1_80, %c0_81, %c0_82] : memref<2x1x32xf32, #tpu.memory_space<vmem>>, vector<1x1x32xf32>
    %103 = vector.shape_cast %102 : vector<1x1x32xf32> to vector<1x32xf32>
    %c1_83 = arith.constant 1 : index
    %c0_84 = arith.constant 0 : index
    %c0_85 = arith.constant 0 : index
    %104 = vector.load %arg12[%c1_83, %c0_84, %c0_85] : memref<2x1x32xf32, #tpu.memory_space<vmem>>, vector<1x1x32xf32>
    %105 = vector.shape_cast %104 : vector<1x1x32xf32> to vector<1x32xf32>
    %cst_86 = arith.constant dense<0.000000e+00> : vector<2x96xf32>
    %106 = tpu.matmul %81, %83, %cst_86 {dimension_numbers = #tpu.dot_dimension_numbers<[1], [0], [0], [1], [0, 0, 1, 1], [], []>} : vector<2x32xf32>, vector<32x96xf32>, vector<2x96xf32> -> vector<2x96xf32>
    %107 = vector.broadcast %85 : vector<1x96xf32> to vector<2x96xf32>
    %108 = arith.addf %106, %107 : vector<2x96xf32>
    %109 = vector.extract_strided_slice %108 {offsets = [0, 64], sizes = [2, 32], strides = [1, 1]} : vector<2x96xf32> to vector<2x32xf32>
    %cst_87 = arith.constant dense<0.000000e+00> : vector<2x32xf32>
    %110 = tpu.matmul %109, %87, %cst_87 {dimension_numbers = #tpu.dot_dimension_numbers<[1], [0], [0], [1], [0, 0, 1, 1], [], []>} : vector<2x32xf32>, vector<32x32xf32>, vector<2x32xf32> -> vector<2x32xf32>
    %111 = vector.broadcast %89 : vector<1x32xf32> to vector<2x32xf32>
    %112 = arith.addf %110, %111 : vector<2x32xf32>
    %113 = arith.addf %81, %112 : vector<2x32xf32>
    %cst_88 = arith.constant dense<0.000000e+00> : vector<2xf32>
    %114 = vector.multi_reduction <add>, %113, %cst_88 [1] : vector<2x32xf32> to vector<2xf32>
    %115 = vector.shape_cast %114 : vector<2xf32> to vector<2x1xf32>
    %cst_89 = arith.constant 3.200000e+01 : f32
    %116 = vector.broadcast %cst_89 : f32 to vector<2x1xf32>
    %117 = arith.divf %115, %116 : vector<2x1xf32>
    %118 = vector.broadcast %117 : vector<2x1xf32> to vector<2x32xf32>
    %119 = arith.subf %113, %118 : vector<2x32xf32>
    %120 = arith.mulf %119, %119 : vector<2x32xf32>
    %cst_90 = arith.constant dense<0.000000e+00> : vector<2xf32>
    %121 = vector.multi_reduction <add>, %120, %cst_90 [1] : vector<2x32xf32> to vector<2xf32>
    %122 = vector.shape_cast %121 : vector<2xf32> to vector<2x1xf32>
    %cst_91 = arith.constant 3.200000e+01 : f32
    %123 = vector.broadcast %cst_91 : f32 to vector<2x1xf32>
    %124 = arith.divf %122, %123 : vector<2x1xf32>
    %cst_92 = arith.constant 9.99999974E-6 : f32
    %125 = vector.broadcast %cst_92 : f32 to vector<2x1xf32>
    %126 = arith.addf %124, %125 : vector<2x1xf32>
    %127 = math.rsqrt %126 : vector<2x1xf32>
    %128 = vector.broadcast %127 : vector<2x1xf32> to vector<2x32xf32>
    %129 = arith.mulf %119, %128 : vector<2x32xf32>
    %130 = vector.broadcast %91 : vector<1x32xf32> to vector<2x32xf32>
    %131 = arith.mulf %129, %130 : vector<2x32xf32>
    %132 = vector.broadcast %93 : vector<1x32xf32> to vector<2x32xf32>
    %133 = arith.addf %131, %132 : vector<2x32xf32>
    %cst_93 = arith.constant dense<0.000000e+00> : vector<2x64xf32>
    %134 = tpu.matmul %133, %95, %cst_93 {dimension_numbers = #tpu.dot_dimension_numbers<[1], [0], [0], [1], [0, 0, 1, 1], [], []>} : vector<2x32xf32>, vector<32x64xf32>, vector<2x64xf32> -> vector<2x64xf32>
    %135 = vector.broadcast %97 : vector<1x64xf32> to vector<2x64xf32>
    %136 = arith.addf %134, %135 : vector<2x64xf32>
    %cst_94 = arith.constant 0.000000e+00 : f32
    %137 = vector.broadcast %cst_94 : f32 to vector<2x64xf32>
    %138 = arith.maximumf %136, %137 : vector<2x64xf32>
    %cst_95 = arith.constant dense<0.000000e+00> : vector<2x32xf32>
    %139 = tpu.matmul %138, %99, %cst_95 {dimension_numbers = #tpu.dot_dimension_numbers<[1], [0], [0], [1], [0, 0, 1, 1], [], []>} : vector<2x64xf32>, vector<64x32xf32>, vector<2x32xf32> -> vector<2x32xf32>
    %140 = vector.broadcast %101 : vector<1x32xf32> to vector<2x32xf32>
    %141 = arith.addf %139, %140 : vector<2x32xf32>
    %142 = arith.addf %133, %141 : vector<2x32xf32>
    %cst_96 = arith.constant dense<0.000000e+00> : vector<2xf32>
    %143 = vector.multi_reduction <add>, %142, %cst_96 [1] : vector<2x32xf32> to vector<2xf32>
    %144 = vector.shape_cast %143 : vector<2xf32> to vector<2x1xf32>
    %cst_97 = arith.constant 3.200000e+01 : f32
    %145 = vector.broadcast %cst_97 : f32 to vector<2x1xf32>
    %146 = arith.divf %144, %145 : vector<2x1xf32>
    %147 = vector.broadcast %146 : vector<2x1xf32> to vector<2x32xf32>
    %148 = arith.subf %142, %147 : vector<2x32xf32>
    %149 = arith.mulf %148, %148 : vector<2x32xf32>
    %cst_98 = arith.constant dense<0.000000e+00> : vector<2xf32>
    %150 = vector.multi_reduction <add>, %149, %cst_98 [1] : vector<2x32xf32> to vector<2xf32>
    %151 = vector.shape_cast %150 : vector<2xf32> to vector<2x1xf32>
    %cst_99 = arith.constant 3.200000e+01 : f32
    %152 = vector.broadcast %cst_99 : f32 to vector<2x1xf32>
    %153 = arith.divf %151, %152 : vector<2x1xf32>
    %cst_100 = arith.constant 9.99999974E-6 : f32
    %154 = vector.broadcast %cst_100 : f32 to vector<2x1xf32>
    %155 = arith.addf %153, %154 : vector<2x1xf32>
    %156 = math.rsqrt %155 : vector<2x1xf32>
    %157 = vector.broadcast %156 : vector<2x1xf32> to vector<2x32xf32>
    %158 = arith.mulf %148, %157 : vector<2x32xf32>
    %159 = vector.broadcast %103 : vector<1x32xf32> to vector<2x32xf32>
    %160 = arith.mulf %158, %159 : vector<2x32xf32>
    %161 = vector.broadcast %105 : vector<1x32xf32> to vector<2x32xf32>
    %162 = arith.addf %160, %161 : vector<2x32xf32>
    %c0_101 = arith.constant 0 : index
    %c0_102 = arith.constant 0 : index
    %163 = vector.load %arg16[%c0_101, %c0_102] : memref<2x32xf32, #tpu.memory_space<vmem>>, vector<2x32xf32>
    tpu.vector_store %arg16[%c0_101, %c0_102], %162 {strides = array<i32>} : memref<2x32xf32, #tpu.memory_space<vmem>>, vector<2x32xf32>,
    %c0_103 = arith.constant 0 : index
    %c0_104 = arith.constant 0 : index
    %164 = vector.load %arg13[%c0_103, %c0_104] : memref<32x256xf32, #tpu.memory_space<vmem>>, vector<32x256xf32>
    %cst_105 = arith.constant dense<0.000000e+00> : vector<2x256xf32>
    %165 = tpu.matmul %162, %164, %cst_105 {dimension_numbers = #tpu.dot_dimension_numbers<[1], [0], [0], [1], [0, 0, 1, 1], [], []>} : vector<2x32xf32>, vector<32x256xf32>, vector<2x256xf32> -> vector<2x256xf32>
    %c0_106 = arith.constant 0 : index
    %c0_107 = arith.constant 0 : index
    %166 = vector.load %arg14[%c0_106, %c0_107] : memref<1x256xf32, #tpu.memory_space<vmem>>, vector<1x256xf32>
    %167 = vector.broadcast %166 : vector<1x256xf32> to vector<2x256xf32>
    %168 = arith.addf %165, %167 : vector<2x256xf32>
    %c0_108 = arith.constant 0 : index
    %c0_109 = arith.constant 0 : index
    %169 = vector.load %arg15[%c0_108, %c0_109] : memref<2x256xf32, #tpu.memory_space<vmem>>, vector<2x256xf32>
    tpu.vector_store %arg15[%c0_108, %c0_109], %168 {strides = array<i32>} : memref<2x256xf32, #tpu.memory_space<vmem>>, vector<2x256xf32>,
    return
  }
}

</mosaic_0001>

<bundles_post_ra>
// kernel: integrated_forward.4
= control target key start
LH: loop header
LB: loop body
LE: loop exit
PB: predicated region body
PF: predicated region fallthrough
CT: control target
= control target key end

     0   :  { %vm65_vm0 = vcmask 1046528   ;;  %vm40_vm1 = vcmask 121856   ;;  %vm193_vm2 = vcmask 195584   ;;  %v495_v52 = vmov 0.0   ;;  %s664_s1 = inlined_call_operand.vmem [shape: f32[15,24], index: 1, kind: input, shape index: {}]   ;;  %s665_s0 = inlined_call_operand.vmem [shape: f32[64,15], index: 0, kind: input, shape index: {}]   ;;  %s666_s2 = inlined_call_operand.vmem [shape: f32[1,24], index: 2, kind: input, shape index: {}]   ;;  %s667_s3 = inlined_call_operand.vmem [shape: f32[1,24], index: 3, kind: input, shape index: {}]   ;;  %s668_s4 = inlined_call_operand.vmem [shape: f32[24,64], index: 4, kind: input, shape index: {}]   ;;  %s669_s5 = inlined_call_operand.vmem [shape: f32[1,64], index: 5, kind: input, shape index: {}]   ;;  %s670_s6 = inlined_call_operand.vmem [shape: f32[2,64], index: 6, kind: output, shape index: {}]  }
   0x1   :  { %v32_v0 = vld [vmem:[%s664_s1 + $0x8] sm:$0x7f]  ;;  %v31_v1 = vld [vmem:[%s664_s1] sm:$0xff]  ;;  %v25_v4 = vld [vmem:[%s665_s0 + $0x10] sm:$0xff]  ;;  %vm496_vm3 = vmmov 0   ;;  %vm326_vm4 = vcmask 1040384  }
   0x2   :  { %v23_v2 = vld [vmem:[%s665_s0] sm:$0xff]  ;;  %444 = vmatprep.subr.msk.mxu0 %vm65_vm0, %v32_v0  ;;  %v24_v3 = vld [vmem:[%s665_s0 + $0x8] sm:$0xff]  ;;  %469 = vmatprep.subr.msk.mxu1 %vm65_vm0, %v32_v0  ;;  %v29_v5 = vld [vmem:[%s665_s0 + $0x30] sm:$0xff]  ;;  %vm411_vm5 = vcmask 517120  }
   0x3   :  { %448 = vmatprep.mubr.msk.f32.mxu0 %vm40_vm1, %v23_v2  ;;  %445 = vmatpush3.msk.msra.mxu0 %vm65_vm0, %v32_v0  ;;  %v30_v6 = vld [vmem:[%s665_s0 + $0x38] sm:$0xff]  ;;  %v27_v8 = vld [vmem:[%s665_s0 + $0x20] sm:$0xff]  ;;  %v28_v9 = vld [vmem:[%s665_s0 + $0x28] sm:$0xff] }
   0x4   :  { %446 = vmatprep.subr.mxu0 %v31_v1  ;;  %471 = vmatpush3.msk.msra.mxu1 %vm65_vm0, %v32_v0  ;;  %v26_v7 = vld [vmem:[%s665_s0 + $0x18] sm:$0xff]  ;;  %v417_v10 = vld [vmem:[%s666_s2] ss:$0 sm:$0xff]  ;;  %v330_v53 = vld [vmem:[%s668_s4 + $0x10] sm:$0xff] }
   0x5   :  { %447 = vmatpush3.msra.mxu0 %v31_v1  ;;  %470 = vmatprep.subr.mxu1 %v31_v1  ;;  %v427_v14 = vld [vmem:[%s667_s3] ss:$0 sm:$0xff]  ;;  %v329_v54 = vld [vmem:[%s668_s4 + $0x8] sm:$0xff] }
   0x6   :  { %449 = vmatmul.mubr.msk.f32.vlgmr.msra.gmra.mxu0 %vm40_vm1, %v24_v3  ;;  %472 = vmatpush3.msra.mxu1 %v31_v1  ;;  %v328_v55 = vld [vmem:[%s668_s4] sm:$0xff] }
   0x7   :  { %451 = vmatprep.mubr.msk.f32.mxu0 %vm40_vm1, %v25_v4  ;;  %457 = vmatprep.mubr.msk.f32.mxu1 %vm40_vm1, %v29_v5 }
   0x8   :  { %458 = vmatmul.mubr.msk.f32.vlgmr.msra.gmra.mxu1 %vm40_vm1, %v30_v6  ;;  %460 = vmatprep.subr.mxu1 %v495_v52 }
   0x9   :  { %466 = vmatprep.mubr.msk.f32.mxu1 %vm496_vm3, %v495_v52  ;;  %461 = vmatpush3.msra.mxu1 %v330_v53 }
   0xa   :  { %452 = vmatmul.mubr.msk.f32.gmra.mxu0 %vm40_vm1, %v26_v7  ;;  %462 = vmatprep.subr.mxu1 %v495_v52 }
   0xb   :  { %454 = vmatprep.mubr.msk.f32.mxu0 %vm40_vm1, %v27_v8  ;;  %463 = vmatpush3.msra.mxu1 %v329_v54 }
   0xc   :  { %464 = vmatprep.subr.mxu1 %v495_v52 }
   0xd   :  { %465 = vmatpush3.msra.mxu1 %v328_v55 }
   0xe   :  { %455 = vmatmul.mubr.msk.f32.gmra.mxu0 %vm40_vm1, %v28_v9 }
  0xc6   :  { %v450_v11 = vpop.f32.mrf.mxu0 }
  0xc7   :  { %v573_v12 = vadd.f32 %v450_v11, %v417_v10 }
  0xc8   :  { %v135_v13 = vpop.f32.mrf.mxu0  ;;  %v459_v15 = vpop.f32.mrf.mxu1 }
  0xc9   :  { %v175_v16 = vmax.f32 %v573_v12, 0.0  ;;  %v579_v17 = vadd.f32 %v417_v10, %v135_v13  ;;  %v599_v34 = vadd.f32 %v459_v15, %v417_v10 }
  0xca   :  { %v453_v18 = vpop.f32.mrf.mxu0  ;;  %v165_v19 = vpop.f32.mrf.mxu1 }
  0xcb   :  { %v174_v20 = vmax.f32 %v579_v17, 0.0  ;;  %v582_v21 = vadd.f32 %v453_v18, %v417_v10  ;;  %v190_v22 = vmul.f32 %v427_v14, %v175_v16  ;;  %v586_v24 = vadd.f32 %v417_v10, %v165_v19 }
  0xcc   :  { %v145_v23 = vpop.f32.mrf.mxu0  ;;  %v181_v42 = vmax.f32 %v599_v34, 0.0 }
  0xcd   :  { %v177_v25 = vmax.f32 %v582_v21, 0.0  ;;  %v589_v26 = vadd.f32 %v417_v10, %v145_v23  ;;  %v197_v27 = vsel %vm193_vm2, %v190_v22, 0.0  ;;  %v189_v28 = vmul.f32 %v427_v14, %v174_v20 }
  0xce   :  { %198 = vadd.xlane.f32.xlu0 %v197_v27  ;;  %v456_v29 = vpop.f32.mrf.mxu0  ;;  %v180_v36 = vmax.f32 %v586_v24, 0.0  ;;  %v261_v50 = vmul.f32 %v427_v14, %v181_v42 }
  0xcf   :  { %v176_v30 = vmax.f32 %v589_v26, 0.0  ;;  %v595_v31 = vadd.f32 %v456_v29, %v417_v10  ;;  %v192_v32 = vmul.f32 %v427_v14, %v177_v25  ;;  %v194_v35 = vsel %vm193_vm2, %v189_v28, 0.0 }
  0xd0   :  { %v155_v33 = vpop.f32.mrf.mxu0  ;;  %v260_v46 = vmul.f32 %v427_v14, %v180_v36  ;;  %v271_v51 = vsel %vm193_vm2, %v261_v50, 0.0 }
  0xd1   :  { %v179_v37 = vmax.f32 %v595_v31, 0.0  ;;  %v604_v38 = vadd.f32 %v417_v10, %v155_v33  ;;  %v203_v39 = vsel %vm193_vm2, %v192_v32, 0.0  ;;  %v191_v40 = vmul.f32 %v427_v14, %v176_v30 }
  0xd2   :  { %204 = vadd.xlane.f32.xlu1 %v203_v39  ;;  %195 = vadd.xlane.f32.xlu0 %v194_v35  ;;  %v268_v49 = vsel %vm193_vm2, %v260_v46, 0.0 }
  0xd3   :  { %v178_v41 = vmax.f32 %v604_v38, 0.0  ;;  %v200_v43 = vsel %vm193_vm2, %v191_v40, 0.0  ;;  %v259_v45 = vmul.f32 %v427_v14, %v179_v37 }
  0xd5   :  { %v258_v44 = vmul.f32 %v427_v14, %v178_v41  ;;  %v265_v48 = vsel %vm193_vm2, %v259_v45, 0.0 }
  0xd6   :  { %201 = vadd.xlane.f32.xlu1 %v200_v43 }
  0xd7   :  { %v262_v47 = vsel %vm193_vm2, %v258_v44, 0.0 }
  0xd8   :  { %263 = vadd.xlane.f32.xlu0 %v262_v47 }
  0xda   :  { %266 = vadd.xlane.f32.xlu1 %v265_v48 }
  0xdc   :  { %269 = vadd.xlane.f32.xlu0 %v268_v49 }
  0xde   :  { %272 = vadd.xlane.f32.xlu1 %v271_v51 }
 0x157   :  { %v199_v56 = vpop.xlane.xlu0 %198 }
 0x15b   :  { %v205_v57 = vpop.xlane.xlu1 %204  ;;  %v196_v58 = vpop.xlane.xlu0 %195 }
 0x15c   :  { %v206_v60 = vmax.f32 %v196_v58, %v199_v56 }
 0x15f   :  { %v202_v59 = vpop.xlane.xlu1 %201 }
 0x160   :  { %v207_v61 = vmax.f32 %v202_v59, %v205_v57 }
 0x161   :  { %v264_v62 = vpop.xlane.xlu0 %263 }
 0x162   :  { %v208_v63 = vmax.f32 %v206_v60, %v207_v61 }
 0x163   :  { %v267_v0 = vpop.xlane.xlu1 %266 }
 0x164   :  { %v209_v1 = vrot.slane %v208_v63, 4  ;;  %v274_v6 = vmax.f32 %v264_v62, %v267_v0 }
 0x165   :  { %v270_v3 = vpop.xlane.xlu0 %269 }
 0x166   :  { %v210_v2 = vmax.f32 %v208_v63, %v209_v1 }
 0x167   :  { %v273_v4 = vpop.xlane.xlu1 %272 }
 0x168   :  { %v211_v5 = vrot.slane %v210_v2, 2  ;;  %v275_v7 = vmax.f32 %v270_v3, %v273_v4 }
 0x16a   :  { %v212_v8 = vmax.f32 %v210_v2, %v211_v5  ;;  %v276_v9 = vmax.f32 %v274_v6, %v275_v7 }
 0x16c   :  { %v213_v10 = vrot.slane %v212_v8, 1  ;;  %v277_v11 = vrot.slane %v276_v9, 4 }
 0x16e   :  { %v214_v13 = vmax.f32 %v212_v8, %v213_v10  ;;  %v278_v14 = vmax.f32 %v276_v9, %v277_v11 }
 0x170   :  { %v215_v15 = vsub.f32 %v196_v58, %v214_v13  ;;  %v216_v18 = vsub.f32 %v199_v56, %v214_v13  ;;  %v217_v19 = vsub.f32 %v202_v59, %v214_v13  ;;  %v218_v22 = vsub.f32 %v205_v57, %v214_v13 }
 0x171   :  { %v279_v23 = vrot.slane %v278_v14, 2 }
 0x172   :  { %v219_v27 = vmul.f32 1.442695, %v215_v15  ;;  %v221_v28 = vmul.f32 1.442695, %v216_v18  ;;  %v223_v29 = vmul.f32 1.442695, %v217_v19 }
 0x173   :  { %v280_v32 = vmax.f32 %v278_v14, %v279_v23  ;;  %v225_v33 = vmul.f32 1.442695, %v218_v22 }
 0x174   :  { %475 = vpow2.f32 %v219_v27 }
 0x175   :  { %477 = vpow2.f32 %v221_v28  ;;  %v281_v35 = vrot.slane %v280_v32, 1 }
 0x176   :  { %479 = vpow2.f32 %v223_v29 }
 0x177   :  { %v282_v39 = vmax.f32 %v280_v32, %v281_v35  ;;  %481 = vpow2.f32 %v225_v33 }
 0x179   :  { %v283_v40 = vsub.f32 %v264_v62, %v282_v39  ;;  %v284_v43 = vsub.f32 %v267_v0, %v282_v39  ;;  %v285_v44 = vsub.f32 %v270_v3, %v282_v39  ;;  %v286_v45 = vsub.f32 %v273_v4, %v282_v39 }
 0x17b   :  { %v287_v46 = vmul.f32 1.442695, %v283_v40  ;;  %v289_v47 = vmul.f32 1.442695, %v284_v43  ;;  %v291_v48 = vmul.f32 1.442695, %v285_v44 }
 0x17c   :  { %v293_v49 = vmul.f32 1.442695, %v286_v45 }
 0x17d   :  { %483 = vpow2.f32 %v287_v46 }
 0x17e   :  { %485 = vpow2.f32 %v289_v47 }
 0x17f   :  { %487 = vpow2.f32 %v291_v48 }
 0x180   :  { %489 = vpow2.f32 %v293_v49 }
 0x181   :  { %v476_v50 = vpop.eup %475 }
 0x182   :  { %v478_v51 = vpop.eup %477 }
 0x183   :  { %v227_v52 = vadd.f32 %v478_v51, %v476_v50  ;;  %v480_v53 = vpop.eup %479 }
 0x184   :  { %v482_v55 = vpop.eup %481 }
 0x185   :  { %v228_v54 = vadd.f32 %v480_v53, %v227_v52 }
 0x187   :  { %v229_v56 = vadd.f32 %v482_v55, %v228_v54 }
 0x189   :  { %v230_v57 = vrot.slane %v229_v56, 4 }
 0x18a   :  { %v484_v58 = vpop.eup %483 }
 0x18b   :  { %v486_v59 = vpop.eup %485  ;;  %v231_v60 = vadd.f32 %v230_v57, %v229_v56  ;;  %v428_v57 = vld [vmem:[%s669_s5] ss:$0 sm:$0xff] }
 0x18c   :  { %v295_v61 = vadd.f32 %v486_v59, %v484_v58  ;;  %v488_v62 = vpop.eup %487 }
 0x18d   :  { %v232_v63 = vrot.slane %v231_v60, 2  ;;  %v490_v1 = vpop.eup %489 }
 0x18e   :  { %v296_v0 = vadd.f32 %v488_v62, %v295_v61 }
 0x18f   :  { %v233_v2 = vadd.f32 %v232_v63, %v231_v60 }
 0x190   :  { %v297_v3 = vadd.f32 %v490_v1, %v296_v0 }
 0x191   :  { %v234_v4 = vrot.slane %v233_v2, 1 }
 0x192   :  { %v298_v5 = vrot.slane %v297_v3, 4 }
 0x193   :  { %v235_v6 = vadd.f32 %v234_v4, %v233_v2 }
 0x194   :  { %v299_v7 = vadd.f32 %v298_v5, %v297_v3 }
 0x195   :  { %491 = vrcp.f32 %v235_v6 }
 0x196   :  { %v300_v8 = vrot.slane %v299_v7, 2 }
 0x198   :  { %v301_v9 = vadd.f32 %v300_v8, %v299_v7 }
 0x19a   :  { %v302_v10 = vrot.slane %v301_v9, 1 }
 0x19c   :  { %v303_v11 = vadd.f32 %v302_v10, %v301_v9 }
 0x19e   :  { %493 = vrcp.f32 %v303_v11 }
 0x1a2   :  { %v492_v13 = vpop.eup %491 }
 0x1a3   :  { %v239_v14 = vmul.f32 %v492_v13, %v480_v53  ;;  %v237_v15 = vmul.f32 %v492_v13, %v476_v50  ;;  %v238_v18 = vmul.f32 %v492_v13, %v478_v51  ;;  %v240_v19 = vmul.f32 %v492_v13, %v482_v55 }
 0x1a5   :  { %v243_v22 = vmul.f32 %v239_v14, %v176_v30  ;;  %v241_v23 = vmul.f32 %v237_v15, %v174_v20  ;;  %v242_v27 = vmul.f32 %v238_v18, %v175_v16  ;;  %v244_v28 = vmul.f32 %v240_v19, %v177_v25 }
 0x1a7   :  { %v245_v29 = vsel %vm193_vm2, %v241_v23, 0.0  ;;  %v246_v32 = vsel %vm193_vm2, %v242_v27, 0.0  ;;  %v248_v35 = vsel %vm193_vm2, %v243_v22, 0.0  ;;  %v250_v26 = vsel %vm193_vm2, %v244_v28, 0.0 }
 0x1a8   :  { %v247_v33 = vadd.f32 %v246_v32, %v245_v29 }
 0x1aa   :  { %v249_v39 = vadd.f32 %v248_v35, %v247_v33 }
 0x1ab   :  { %v494_v40 = vpop.eup %493 }
 0x1ac   :  { %v308_v30 = vmul.f32 %v494_v40, %v490_v1  ;;  %v251_v17 = vadd.f32 %v250_v26, %v249_v39  ;;  %v305_v20 = vmul.f32 %v494_v40, %v484_v58  ;;  %v306_v43 = vmul.f32 %v494_v40, %v486_v59 }
 0x1ad   :  { %v307_v12 = vmul.f32 %v494_v40, %v488_v62 }
 0x1ae   :  { %v252_v16 = vrot.slane %v251_v17, 4  ;;  %v309_v21 = vmul.f32 %v305_v20, %v178_v41  ;;  %v310_v25 = vmul.f32 %v306_v43, %v179_v37  ;;  %v312_v45 = vmul.f32 %v308_v30, %v181_v42 }
 0x1af   :  { %v311_v44 = vmul.f32 %v307_v12, %v180_v36 }
 0x1b0   :  { %v313_v46 = vsel %vm193_vm2, %v309_v21, 0.0  ;;  %v314_v47 = vsel %vm193_vm2, %v310_v25, 0.0  ;;  %v253_v48 = vadd.f32 %v252_v16, %v251_v17  ;;  %v318_v38 = vsel %vm193_vm2, %v312_v45, 0.0 }
 0x1b1   :  { %v315_v49 = vadd.f32 %v314_v47, %v313_v46  ;;  %v316_v50 = vsel %vm193_vm2, %v311_v44, 0.0 }
 0x1b2   :  { %v254_v41 = vrot.slane %v253_v48, 2 }
 0x1b3   :  { %v317_v51 = vadd.f32 %v316_v50, %v315_v49 }
 0x1b4   :  { %v255_v52 = vadd.f32 %v254_v41, %v253_v48 }
 0x1b5   :  { %v319_v31 = vadd.f32 %v318_v38, %v317_v51 }
 0x1b6   :  { %v256_v53 = vrot.slane %v255_v52, 1 }
 0x1b7   :  { %v320_v37 = vrot.slane %v319_v31, 4 }
 0x1b8   :  { %v257_v54 = vadd.f32 %v256_v53, %v255_v52 }
 0x1b9   :  { %v321_v24 = vadd.f32 %v320_v37, %v319_v31 }
 0x1bb   :  { %v322_v36 = vrot.slane %v321_v24, 2 }
 0x1bd   :  { %v323_v34 = vadd.f32 %v322_v36, %v321_v24 }
 0x1bf   :  { %v324_v42 = vrot.slane %v323_v34, 1 }
 0x1c1   :  { %v325_v55 = vadd.f32 %v324_v42, %v323_v34 }
 0x1c3   :  { %v327_v56 = vsel %vm326_vm4, %v257_v54, %v325_v55 }
 0x1c4   :  { %467 = vmatmul.mubr.msk.f32.vlgmr.msra.gmra.mxu1 %vm193_vm2, %v327_v56 }
 0x284   :  { %v407_v58 = vpop.f32.mrf.mxu1 }
 0x285   :  { %v408_v59 = vadd.f32 %v428_v57, %v407_v58 }
 0x286   :  { %v468_v60 = vpop.f32.mrf.mxu1 }
 0x287   :  { %412 = vst.msk [vmem:[%s670_s6] sm:$0x3] %vm411_vm5, %v408_v59 }

// kernel: integrated_forward.6
= control target key start
LH: loop header
LB: loop body
LE: loop exit
PB: predicated region body
PF: predicated region fallthrough
CT: control target
= control target key end

     0   :  { %s1475_s0 = inlined_call_operand.vmem [shape: f32[2,64], index: 0, kind: input, shape index: {}]   ;;  %s1476_s1 = inlined_call_operand.vmem [shape: f32[2,64], index: 1, kind: input, shape index: {}]   ;;  %s1477_s2 = inlined_call_operand.vmem [shape: f32[128,64], index: 2, kind: input, shape index: {}]   ;;  %s1478_s3 = inlined_call_operand.vmem [shape: f32[1,64], index: 3, kind: input, shape index: {}]   ;;  %s1479_s4 = inlined_call_operand.vmem [shape: f32[64,64], index: 4, kind: input, shape index: {}]   ;;  %s1480_s5 = inlined_call_operand.vmem [shape: f32[1,64], index: 5, kind: input, shape index: {}]   ;;  %s1481_s6 = inlined_call_operand.vmem [shape: f32[64,64], index: 6, kind: input, shape index: {}]   ;;  %s1482_s7 = inlined_call_operand.vmem [shape: f32[1,64], index: 7, kind: input, shape index: {}]   ;;  %s1483_s8 = inlined_call_operand.vmem [shape: f32[1,64], index: 8, kind: input, shape index: {}]   ;;  %s1484_s9 = inlined_call_operand.vmem [shape: f32[1,64], index: 9, kind: input, shape index: {}]   ;;  %s1485_s10 = inlined_call_operand.vmem [shape: f32[64,256], index: 10, kind: input, shape index: {}]   ;;  %s1486_s11 = inlined_call_operand.vmem [shape: f32[1,256], index: 11, kind: input, shape index: {}]   ;;  %s1487_s12 = inlined_call_operand.vmem [shape: f32[128,16], index: 12, kind: input, shape index: {}]   ;;  %s1488_s13 = inlined_call_operand.vmem [shape: f32[1,16], index: 13, kind: input, shape index: {}]   ;;  %s1489_s14 = inlined_call_operand.vmem [shape: f32[128,256], index: 14, kind: input, shape index: {}]   ;;  %s1490_s15 = inlined_call_operand.vmem [shape: f32[1,256], index: 15, kind: input, shape index: {}]   ;;  %s1491_s16 = inlined_call_operand.hbm [shape: f32[2,64], index: 16, kind: output, shape index: {0}]   ;;  %s1492_s17 = inlined_call_operand.hbm [shape: f32[2,16], index: 17, kind: output, shape index: {1}]   ;;  %s1493_s18 = inlined_call_operand.vmem [shape: f32[2,256], index: 18, kind: output, shape index: {2}]  }
   0x1   :  { %1495 = sst [smem:[#allocation8_spill]] %s1475_s0 }
   0x2   :  { %1496 = sst [smem:[#allocation9_spill]] %s1476_s1 }
   0x3   :  { %1497 = sst [smem:[#allocation10_spill]] %s1477_s2 }
   0x4   :  { %24 = vsyncpa [#allocation3], 0  ;;  %s1498_s29 = sld [smem:[#allocation9_spill]]  ;;  %s979_s1 = smov 64   ;;  %v980_v2 = vmov 0.0   ;;  %vm981_vm0 = vmmov 0  }
   0x5   :  { %s1499_s19 = sld [smem:[#allocation10_spill]]  ;;  %814 = vmatprep.subr.mxu0 %v980_v2  ;;  %846 = vmatprep.mubr.msk.f32.mxu0 %vm981_vm0, %v980_v2 }
   0x6   :  { %849 = vmatprep.subr.mxu1 %v980_v2  ;;  %865 = vmatprep.mubr.msk.f32.mxu1 %vm981_vm0, %v980_v2 }
   0xa   :  { %v59_v0 = vld [vmem:[%s1498_s29] sm:$0x3] }
   0xb   :  { %v81_v1 = vld [vmem:[%s1499_s19 + $0x78] sm:$0xff]  ;;  %61 = vrot.lane.b32.xlu0 %v59_v0, %s979_s1  ;;  %v80_v3 = vld [vmem:[%s1499_s19 + $0x70] sm:$0xff]  ;;  %v79_v4 = vld [vmem:[%s1499_s19 + $0x68] sm:$0xff] }
   0xc   :  { %815 = vmatpush3.msra.mxu0 %v81_v1  ;;  %v78_v5 = vld [vmem:[%s1499_s19 + $0x60] sm:$0xff] }
   0xd   :  { %816 = vmatprep.subr.mxu0 %v980_v2 }
   0xe   :  { %817 = vmatpush3.msra.mxu0 %v80_v3 }
   0xf   :  { %818 = vmatprep.subr.mxu0 %v980_v2 }
  0x10   :  { %819 = vmatpush3.msra.mxu0 %v79_v4 }
  0x11   :  { %25 = vsyncpa [#allocation5], 0  ;;  %820 = vmatprep.subr.mxu0 %v980_v2  ;;  %v77_v6 = vld [vmem:[%s1499_s19 + $0x58] sm:$0xff]  ;;  %v76_v7 = vld [vmem:[%s1499_s19 + $0x50] sm:$0xff]  ;;  %s1500_s23 = sld [smem:[#allocation8_spill]]  ;;  %vm64_vm1 = vcmask 523264  }
  0x12   :  { %821 = vmatpush3.msra.mxu0 %v78_v5  ;;  %v75_v8 = vld [vmem:[%s1499_s19 + $0x48] sm:$0xff]  ;;  %v74_v9 = vld [vmem:[%s1499_s19 + $0x40] sm:$0xff]  ;;  %v73_v10 = vld [vmem:[%s1499_s19 + $0x38] sm:$0xff]  ;;  %vm348_vm2 = vcmask 517120  }
  0x13   :  { %822 = vmatprep.subr.mxu0 %v980_v2  ;;  %v72_v11 = vld [vmem:[%s1499_s19 + $0x30] sm:$0xff]  ;;  %v71_v12 = vld [vmem:[%s1499_s19 + $0x28] sm:$0xff]  ;;  %v70_v13 = vld [vmem:[%s1499_s19 + $0x20] sm:$0xff] }
  0x14   :  { %823 = vmatpush3.msra.mxu0 %v77_v6  ;;  %v69_v14 = vld [vmem:[%s1499_s19 + $0x18] sm:$0xff]  ;;  %v68_v15 = vld [vmem:[%s1499_s19 + $0x10] sm:$0xff]  ;;  %v67_v16 = vld [vmem:[%s1499_s19 + $0x8] sm:$0xff] }
  0x15   :  { %824 = vmatprep.subr.mxu0 %v980_v2  ;;  %v66_v17 = vld [vmem:[%s1499_s19] sm:$0xff]  ;;  %v175_v21 = vld [vmem:[%s1479_s4 + $0x38] sm:$0xff]  ;;  %v174_v22 = vld [vmem:[%s1479_s4 + $0x30] sm:$0xff] }
  0x16   :  { %825 = vmatpush3.msra.mxu0 %v76_v7  ;;  %850 = vmatpush3.msra.mxu1 %v175_v21  ;;  %v173_v23 = vld [vmem:[%s1479_s4 + $0x28] sm:$0xff]  ;;  %v172_v24 = vld [vmem:[%s1479_s4 + $0x20] sm:$0xff]  ;;  %v171_v25 = vld [vmem:[%s1479_s4 + $0x18] sm:$0xff] }
  0x17   :  { %826 = vmatprep.subr.mxu0 %v980_v2  ;;  %v1154_v18 = vld [vmem:[%s1500_s23] sm:$0x3]  ;;  %851 = vmatprep.subr.mxu1 %v980_v2  ;;  %v170_v26 = vld [vmem:[%s1479_s4 + $0x10] sm:$0xff]  ;;  %v169_v27 = vld [vmem:[%s1479_s4 + $0x8] sm:$0xff] }
  0x18   :  { %827 = vmatpush3.msra.mxu0 %v75_v8  ;;  %852 = vmatpush3.msra.mxu1 %v174_v22  ;;  %v168_v28 = vld [vmem:[%s1479_s4] sm:$0xff]  ;;  %v263_v42 = vld [vmem:[%s1481_s6 + $0x38] sm:$0xff]  ;;  %v262_v43 = vld [vmem:[%s1481_s6 + $0x30] sm:$0xff] }
  0x19   :  { %828 = vmatprep.subr.mxu0 %v980_v2  ;;  %853 = vmatprep.subr.mxu1 %v980_v2  ;;  %v752_v29 = vld [vmem:[%s1478_s3] ss:$0 sm:$0xff]  ;;  %v261_v44 = vld [vmem:[%s1481_s6 + $0x28] sm:$0xff]  ;;  %v259_v46 = vld [vmem:[%s1481_s6 + $0x18] sm:$0xff] }
  0x1a   :  { %829 = vmatpush3.msra.mxu0 %v74_v9  ;;  %854 = vmatpush3.msra.mxu1 %v173_v23  ;;  %v260_v45 = vld [vmem:[%s1481_s6 + $0x20] sm:$0xff]  ;;  %v258_v47 = vld [vmem:[%s1481_s6 + $0x10] sm:$0xff]  ;;  %v257_v48 = vld [vmem:[%s1481_s6 + $0x8] sm:$0xff] }
  0x1b   :  { %830 = vmatprep.subr.mxu0 %v980_v2  ;;  %855 = vmatprep.subr.mxu1 %v980_v2  ;;  %v256_v49 = vld [vmem:[%s1481_s6] sm:$0xff]  ;;  %v393_v1 = vld [vmem:[%s1485_s10 + $0x78] sm:$0xff]  ;;  %v392_v3 = vld [vmem:[%s1485_s10 + $0x70] sm:$0xff] }
  0x1c   :  { %831 = vmatpush3.msra.mxu0 %v73_v10  ;;  %856 = vmatpush3.msra.mxu1 %v172_v24  ;;  %v753_v52 = vld [vmem:[%s1480_s5] ss:$0 sm:$0xff]  ;;  %v391_v4 = vld [vmem:[%s1485_s10 + $0x68] sm:$0xff]  ;;  %v389_v6 = vld [vmem:[%s1485_s10 + $0x58] sm:$0xff] }
  0x1d   :  { %832 = vmatprep.subr.mxu0 %v980_v2  ;;  %857 = vmatprep.subr.mxu1 %v980_v2  ;;  %v756_v55 = vld [vmem:[%s1482_s7] ss:$0 sm:$0xff]  ;;  %v388_v7 = vld [vmem:[%s1485_s10 + $0x50] sm:$0xff]  ;;  %v387_v8 = vld [vmem:[%s1485_s10 + $0x48] sm:$0xff] }
  0x1e   :  { %833 = vmatpush3.msra.mxu0 %v72_v11  ;;  %858 = vmatpush3.msra.mxu1 %v171_v25  ;;  %v390_v5 = vld [vmem:[%s1485_s10 + $0x60] sm:$0xff]  ;;  %v385_v10 = vld [vmem:[%s1485_s10 + $0x38] sm:$0xff]  ;;  %v384_v11 = vld [vmem:[%s1485_s10 + $0x30] sm:$0xff] }
  0x1f   :  { %834 = vmatprep.subr.mxu0 %v980_v2  ;;  %859 = vmatprep.subr.mxu1 %v980_v2  ;;  %v386_v9 = vld [vmem:[%s1485_s10 + $0x40] sm:$0xff] }
  0x20   :  { %835 = vmatpush3.msra.mxu0 %v71_v12  ;;  %860 = vmatpush3.msra.mxu1 %v170_v26  ;;  %v383_v12 = vld [vmem:[%s1485_s10 + $0x28] sm:$0xff]  ;;  %v757_v22 = vld [vmem:[%s1483_s8] ss:$0 sm:$0xff] }
  0x21   :  { %836 = vmatprep.subr.mxu0 %v980_v2  ;;  %861 = vmatprep.subr.mxu1 %v980_v2  ;;  %v758_v24 = vld [vmem:[%s1484_s9] ss:$0 sm:$0xff] }
  0x22   :  { %837 = vmatpush3.msra.mxu0 %v70_v13  ;;  %862 = vmatpush3.msra.mxu1 %v169_v27  ;;  %v382_v13 = vld [vmem:[%s1485_s10 + $0x20] sm:$0xff]  ;;  %v513_v27 = vld [vmem:[%s1487_s12 + $0x78] sm:$0xff] }
  0x23   :  { %838 = vmatprep.subr.mxu0 %v980_v2  ;;  %863 = vmatprep.subr.mxu1 %v980_v2 }
  0x24   :  { %839 = vmatpush3.msra.mxu0 %v69_v14  ;;  %864 = vmatpush3.msra.mxu1 %v168_v28  ;;  %v381_v14 = vld [vmem:[%s1485_s10 + $0x18] sm:$0xff] }
  0x25   :  { %840 = vmatprep.subr.mxu0 %v980_v2  ;;  %868 = vmatprep.subr.mxu1 %v980_v2  ;;  %v624_v28 = vld [vmem:[%s1489_s14 + $0xf8] sm:$0xff] }
  0x26   :  { %841 = vmatpush3.msra.mxu0 %v68_v15  ;;  %v380_v15 = vld [vmem:[%s1485_s10 + $0x10] sm:$0xff] }
  0x27   :  { %842 = vmatprep.subr.mxu0 %v980_v2 }
  0x28   :  { %843 = vmatpush3.msra.mxu0 %v67_v16  ;;  %v379_v16 = vld [vmem:[%s1485_s10 + $0x8] sm:$0xff] }
  0x29   :  { %844 = vmatprep.subr.mxu0 %v980_v2 }
  0x2a   :  { %845 = vmatpush3.msra.mxu0 %v66_v17  ;;  %v378_v17 = vld [vmem:[%s1485_s10] sm:$0xff] }
  0x2b   :  { %425 = vmatprep.subr.mxu0 %v393_v1  ;;  %v500_v1 = vld [vmem:[%s1487_s12 + $0x10] sm:$0xff] }
  0x7d   :  { %v62_v19 = vpop.permute.xlu0 %61 }
  0x7e   :  { %v65_v20 = vsel %vm64_vm1, %v1154_v18, %v62_v19 }
  0x7f   :  { %847 = vmatmul.mubr.f32.vlgmr.msra.gmra.mxu0 %v65_v20 }
  0x80   :  { %473 = vmatprep.mubr.f32.mxu0 %v980_v2  ;;  %426 = vmatpush1.msra.mxu0 %v392_v3  ;;  %v599_v3 = vld [vmem:[%s1489_s14 + $0x30] sm:$0xff] }
  0x81   :  { %427 = vmatprep.subr.mxu0 %v391_v4  ;;  %v598_v4 = vld [vmem:[%s1489_s14 + $0x28] sm:$0xff] }
  0x82   :  { %428 = vmatpush1.msra.mxu0 %v390_v5  ;;  %v499_v5 = vld [vmem:[%s1487_s12 + $0x8] sm:$0xff] }
  0x83   :  { %429 = vmatprep.subr.mxu0 %v389_v6  ;;  %v597_v6 = vld [vmem:[%s1489_s14 + $0x20] sm:$0xff] }
  0x84   :  { %430 = vmatpush1.msra.mxu0 %v388_v7  ;;  %v596_v7 = vld [vmem:[%s1489_s14 + $0x18] sm:$0xff] }
  0x85   :  { %431 = vmatprep.subr.mxu0 %v387_v8  ;;  %v498_v8 = vld [vmem:[%s1487_s12] sm:$0xff] }
  0x86   :  { %432 = vmatpush1.msra.mxu0 %v386_v9  ;;  %v595_v9 = vld [vmem:[%s1489_s14 + $0x10] sm:$0xff] }
  0x87   :  { %433 = vmatprep.subr.mxu0 %v385_v10  ;;  %v594_v10 = vld [vmem:[%s1489_s14 + $0x8] sm:$0xff] }
  0x88   :  { %434 = vmatpush1.msra.mxu0 %v384_v11  ;;  %v593_v11 = vld [vmem:[%s1489_s14] sm:$0xff] }
  0x89   :  { %435 = vmatprep.subr.mxu0 %v383_v12  ;;  %v396_v12 = vlaneseq }
  0x8a   :  { %436 = vmatpush1.msra.mxu0 %v382_v13 }
  0x8b   :  { %437 = vmatprep.subr.mxu0 %v381_v14  ;;  %v397_v13 = vshrl.u32 %v396_v12, 7 }
  0x8c   :  { %438 = vmatpush1.msra.mxu0 %v380_v15 }
  0x8d   :  { %439 = vmatprep.subr.mxu0 %v379_v16  ;;  %v398_v14 = vsub.s32 0, %v397_v13  ;;  %v402_v15 = vsub.s32 1, %v397_v13 }
  0x8e   :  { %440 = vmatpush1.msra.mxu0 %v378_v17 }
  0x8f   :  { %637 = vmatprep.subr.mxu0 %v624_v28 }
 0x13f   :  { %v155_v30 = vpop.f32.mrf.mxu0 }
 0x140   :  { %v156_v31 = vadd.f32 %v752_v29, %v155_v30  ;;  %v512_v29 = vld [vmem:[%s1487_s12 + $0x70] sm:$0xff] }
 0x141   :  { %v848_v32 = vpop.f32.mrf.mxu0  ;;  %v623_v30 = vld [vmem:[%s1489_s14 + $0xf0] sm:$0xff] }
 0x142   :  { %v159_v33 = vmul.f32 %v156_v31, %v156_v31  ;;  %v511_v32 = vld [vmem:[%s1487_s12 + $0x68] sm:$0xff] }
 0x144   :  { %v160_v34 = vmul.f32 %v159_v33, %v156_v31  ;;  %v621_v33 = vld [vmem:[%s1489_s14 + $0xe0] sm:$0xff] }
 0x146   :  { %v161_v35 = vmul.f32 0.044715, %v160_v34  ;;  %v620_v34 = vld [vmem:[%s1489_s14 + $0xd8] sm:$0xff] }
 0x148   :  { %v162_v36 = vadd.f32 %v161_v35, %v156_v31  ;;  %v510_v35 = vld [vmem:[%s1487_s12 + $0x60] sm:$0xff] }
 0x14a   :  { %v163_v37 = vmul.f32 0.7978846, %v162_v36  ;;  %v619_v36 = vld [vmem:[%s1489_s14 + $0xd0] sm:$0xff] }
 0x14c   :  { %927 = vtanh.f32 %v163_v37  ;;  %v618_v37 = vld [vmem:[%s1489_s14 + $0xc8] sm:$0xff] }
 0x159   :  { %v928_v38 = vpop.eup %927 }
 0x15a   :  { %v165_v39 = vadd.f32 1.0, %v928_v38  ;;  %v509_v38 = vld [vmem:[%s1487_s12 + $0x58] sm:$0xff] }
 0x15c   :  { %v166_v40 = vmul.f32 0.5, %v165_v39  ;;  %v617_v39 = vld [vmem:[%s1489_s14 + $0xc0] sm:$0xff] }
 0x15e   :  { %v167_v41 = vmul.f32 %v166_v40, %v156_v31  ;;  %v622_v31 = vld [vmem:[%s1489_s14 + $0xe8] sm:$0xff]  ;;  %v616_v40 = vld [vmem:[%s1489_s14 + $0xb8] sm:$0xff] }
 0x160   :  { %866 = vmatmul.mubr.msk.f32.vlgmr.msra.gmra.mxu1 %vm64_vm1, %v167_v41  ;;  %v508_v41 = vld [vmem:[%s1487_s12 + $0x50] sm:$0xff] }
 0x161   :  { %869 = vmatpush3.msra.mxu1 %v263_v42  ;;  %884 = vmatprep.mubr.msk.f32.mxu1 %vm981_vm0, %v980_v2  ;;  %v615_v42 = vld [vmem:[%s1489_s14 + $0xb0] sm:$0xff] }
 0x162   :  { %870 = vmatprep.subr.mxu1 %v980_v2 }
 0x163   :  { %871 = vmatpush3.msra.mxu1 %v262_v43  ;;  %v614_v43 = vld [vmem:[%s1489_s14 + $0xa8] sm:$0xff] }
 0x164   :  { %872 = vmatprep.subr.mxu1 %v980_v2 }
 0x165   :  { %873 = vmatpush3.msra.mxu1 %v261_v44  ;;  %v507_v44 = vld [vmem:[%s1487_s12 + $0x48] sm:$0xff] }
 0x166   :  { %874 = vmatprep.subr.mxu1 %v980_v2 }
 0x167   :  { %875 = vmatpush3.msra.mxu1 %v260_v45  ;;  %v613_v45 = vld [vmem:[%s1489_s14 + $0xa0] sm:$0xff] }
 0x168   :  { %876 = vmatprep.subr.mxu1 %v980_v2 }
 0x169   :  { %877 = vmatpush3.msra.mxu1 %v259_v46  ;;  %v612_v46 = vld [vmem:[%s1489_s14 + $0x98] sm:$0xff] }
 0x16a   :  { %878 = vmatprep.subr.mxu1 %v980_v2 }
 0x16b   :  { %879 = vmatpush3.msra.mxu1 %v258_v47  ;;  %v506_v47 = vld [vmem:[%s1487_s12 + $0x40] sm:$0xff] }
 0x16c   :  { %880 = vmatprep.subr.mxu1 %v980_v2 }
 0x16d   :  { %881 = vmatpush3.msra.mxu1 %v257_v48  ;;  %v611_v48 = vld [vmem:[%s1489_s14 + $0x90] sm:$0xff] }
 0x16e   :  { %882 = vmatprep.subr.mxu1 %v980_v2 }
 0x16f   :  { %883 = vmatpush3.msra.mxu1 %v256_v49  ;;  %v610_v49 = vld [vmem:[%s1489_s14 + $0x88] sm:$0xff] }
 0x170   :  { %885 = vmatmul.mubr.msk.f32.vlgmr.msra.gmra.mxu1 %vm64_vm1, %v1154_v18  ;;  %887 = vmatprep.subr.mxu1 %v980_v2 }
 0x171   :  { %919 = vmatprep.mubr.msk.f32.mxu1 %vm981_vm0, %v980_v2  ;;  %888 = vmatpush3.msra.mxu1 %v513_v27 }
 0x172   :  { %889 = vmatprep.subr.mxu1 %v980_v2 }
 0x173   :  { %890 = vmatpush3.msra.mxu1 %v512_v29 }
 0x174   :  { %891 = vmatprep.subr.mxu1 %v980_v2 }
 0x175   :  { %892 = vmatpush3.msra.mxu1 %v511_v32 }
 0x176   :  { %893 = vmatprep.subr.mxu1 %v980_v2 }
 0x177   :  { %894 = vmatpush3.msra.mxu1 %v510_v35 }
 0x178   :  { %895 = vmatprep.subr.mxu1 %v980_v2 }
 0x179   :  { %896 = vmatpush3.msra.mxu1 %v509_v38 }
 0x17a   :  { %897 = vmatprep.subr.mxu1 %v980_v2 }
 0x17b   :  { %898 = vmatpush3.msra.mxu1 %v508_v41 }
 0x17c   :  { %899 = vmatprep.subr.mxu1 %v980_v2 }
 0x17d   :  { %900 = vmatpush3.msra.mxu1 %v507_v44 }
 0x17e   :  { %901 = vmatprep.subr.mxu1 %v980_v2 }
 0x17f   :  { %902 = vmatpush3.msra.mxu1 %v506_v47 }
 0x180   :  { %903 = vmatprep.subr.mxu1 %v980_v2 }
 0x220   :  { %v252_v50 = vpop.f32.mrf.mxu1 }
 0x221   :  { %v253_v53 = vadd.f32 %v753_v52, %v252_v50  ;;  %v505_v50 = vld [vmem:[%s1487_s12 + $0x38] sm:$0xff] }
 0x222   :  { %v867_v51 = vpop.f32.mrf.mxu1  ;;  %v608_v52 = vld [vmem:[%s1489_s14 + $0x78] sm:$0xff]  ;;  %904 = vmatpush3.msra.mxu1 %v505_v50 }
 0x223   :  { %v609_v51 = vld [vmem:[%s1489_s14 + $0x80] sm:$0xff]  ;;  %905 = vmatprep.subr.mxu1 %v980_v2 }
 0x230   :  { %v333_v54 = vpop.f32.mrf.mxu1 }
 0x231   :  { %v337_v56 = vadd.f32 %v333_v54, %v253_v53  ;;  %v504_v53 = vld [vmem:[%s1487_s12 + $0x30] sm:$0xff] }
 0x232   :  { %v886_v57 = vpop.f32.mrf.mxu1  ;;  %v607_v54 = vld [vmem:[%s1489_s14 + $0x70] sm:$0xff]  ;;  %906 = vmatpush3.msra.mxu1 %v504_v53 }
 0x233   :  { %v345_v58 = vadd.f32 %v756_v55, %v337_v56  ;;  %v606_v55 = vld [vmem:[%s1489_s14 + $0x68] sm:$0xff]  ;;  %v605_v57 = vld [vmem:[%s1489_s14 + $0x60] sm:$0xff]  ;;  %907 = vmatprep.subr.mxu1 %v980_v2 }
 0x234   :  { %v503_v56 = vld [vmem:[%s1487_s12 + $0x28] sm:$0xff] }
 0x235   :  { %v349_v59 = vsel %vm348_vm2, %v345_v58, 0.0  ;;  %908 = vmatpush3.msra.mxu1 %v503_v56 }
 0x236   :  { %350 = vadd.xlane.f32.xlu0 %v349_v59  ;;  %v502_v59 = vld [vmem:[%s1487_s12 + $0x20] sm:$0xff]  ;;  %909 = vmatprep.subr.mxu1 %v980_v2 }
 0x237   :  { %910 = vmatpush3.msra.mxu1 %v502_v59 }
 0x238   :  { %911 = vmatprep.subr.mxu1 %v980_v2 }
 0x2bf   :  { %v351_v60 = vpop.xlane.xlu0 %350 }
 0x2c0   :  { %v353_v61 = vmul.f32 0.015625, %v351_v60  ;;  %v603_v60 = vld [vmem:[%s1489_s14 + $0x50] sm:$0xff] }
 0x2c2   :  { %v354_v62 = vsub.f32 %v345_v58, %v353_v61  ;;  %v604_v58 = vld [vmem:[%s1489_s14 + $0x58] sm:$0xff]  ;;  %v602_v61 = vld [vmem:[%s1489_s14 + $0x48] sm:$0xff] }
 0x2c4   :  { %v355_v63 = vmul.f32 %v354_v62, %v354_v62 }
 0x2c6   :  { %v356_v0 = vsel %vm348_vm2, %v355_v63, 0.0  ;;  %v601_v63 = vld [vmem:[%s1489_s14 + $0x40] sm:$0xff] }
 0x2c7   :  { %357 = vadd.xlane.f32.xlu1 %v356_v0  ;;  %v600_v0 = vld [vmem:[%s1489_s14 + $0x38] sm:$0xff] }
 0x350   :  { %v358_v18 = vpop.xlane.xlu1 %357 }
 0x351   :  { %v359_v19 = vmul.f32 0.015625, %v358_v18 }
 0x353   :  { %v360_v20 = vadd.f32 1e-05, %v359_v19 }
 0x355   :  { %929 = vrsqrt.f32 %v360_v20 }
 0x362   :  { %v930_v21 = vpop.eup %929 }
 0x363   :  { %v362_v23 = vmul.f32 %v930_v21, %v354_v62  ;;  %v501_v62 = vld [vmem:[%s1487_s12 + $0x18] sm:$0xff] }
 0x364   :  { %912 = vmatpush3.msra.mxu1 %v501_v62 }
 0x365   :  { %v369_v25 = vmul.f32 %v757_v22, %v362_v23  ;;  %913 = vmatprep.subr.mxu1 %v980_v2 }
 0x366   :  { %914 = vmatpush3.msra.mxu1 %v500_v1 }
 0x367   :  { %v376_v26 = vadd.f32 %v758_v24, %v369_v25  ;;  %915 = vmatprep.subr.mxu1 %v980_v2 }
 0x368   :  { %916 = vmatpush3.msra.mxu1 %v499_v5 }
 0x369   :  { %759 = vmatmul.mubr.msk.f32.vlgmr.msra.gmra.mxu0 %vm64_vm1, %v376_v26  ;;  %377 = vst.msk [vmem:[#allocation2] sm:$0x3] %vm348_vm2, %v376_v26  ;;  %917 = vmatprep.subr.mxu1 %v980_v2 }
 0x36a   :  { %701 = vmatprep.mubr.f32.mxu0 %v980_v2  ;;  %638 = vmatpush1.msra.mxu0 %v623_v30  ;;  %v394_v2 = vld [vmem:[%s1486_s11] sm:$0x3]  ;;  %s982_s11 = smov [#allocation2]  }
 0x36b   :  { %639 = vmatprep.subr.mxu0 %v622_v31  ;;  %918 = vmatpush3.msra.mxu1 %v498_v8  ;;  %v399_v16 = vrot.slane %v394_v2, %v398_v14  ;;  %v403_v17 = vrot.slane %v394_v2, %v402_v15  ;;  %s726_s14 = sshll.u32 %s982_s11, 4  ;;  %s727_s14 = int_to_ptr.vmem [resolvable:$true] %s726_s14 }
 0x36c   :  { %640 = vmatpush1.msra.mxu0 %v621_v33  ;;  %s935_s6 = scalar_lea.vmem %s727_s14, 32  ;;  %p940_p1 = scmp.lt.s32.totalorder %s727_s14, %s727_s14 }
 0x36d   :  { %641 = vmatprep.subr.mxu0 %v620_v34  ;;  %p936_p0 = scmp.ne.s32.totalorder %s727_s14, %s935_s6  ;;  %p941_p2 = scmp.lt.s32.totalorder %s935_s6, %s935_s6 }
 0x36e   :  { %642 = vmatpush1.msra.mxu0 %v619_v36 }
 0x36f   :  { %643 = vmatprep.subr.mxu0 %v618_v37  ;;  %p942_p3 = por %p941_p2, %p940_p1 }
 0x370   :  { %644 = vmatpush1.msra.mxu0 %v617_v39 }
 0x371   :  { %645 = vmatprep.subr.mxu0 %v616_v40  ;;  %p943_p4 = pnand %p942_p3, %p936_p0 }
 0x372   :  { %646 = vmatpush1.msra.mxu0 %v615_v42 }
 0x373   :  { %647 = vmatprep.subr.mxu0 %v614_v43 }
 0x374   :  { %648 = vmatpush1.msra.mxu0 %v613_v45 }
 0x375   :  { %649 = vmatprep.subr.mxu0 %v612_v46 }
 0x376   :  { %650 = vmatpush1.msra.mxu0 %v611_v48 }
 0x377   :  { %651 = vmatprep.subr.mxu0 %v610_v49 }
 0x378   :  { %652 = vmatpush1.msra.mxu0 %v609_v51 }
 0x379   :  { %653 = vmatprep.subr.mxu0 %v608_v52 }
 0x37a   :  { %654 = vmatpush1.msra.mxu0 %v607_v54 }
 0x37b   :  { %655 = vmatprep.subr.mxu0 %v606_v55 }
 0x37c   :  { %656 = vmatpush1.msra.mxu0 %v605_v57 }
 0x37d   :  { %657 = vmatprep.subr.mxu0 %v604_v58 }
 0x37e   :  { %658 = vmatpush1.msra.mxu0 %v603_v60 }
 0x37f   :  { %659 = vmatprep.subr.mxu0 %v602_v61 }
 0x380   :  { %660 = vmatpush1.msra.mxu0 %v601_v63 }
 0x381   :  { %661 = vmatprep.subr.mxu0 %v600_v0 }
 0x382   :  { %662 = vmatpush1.msra.mxu0 %v599_v3 }
 0x383   :  { %663 = vmatprep.subr.mxu0 %v598_v4 }
 0x384   :  { %664 = vmatpush1.msra.mxu0 %v597_v6 }
 0x385   :  { %665 = vmatprep.subr.mxu0 %v596_v7 }
 0x386   :  { %666 = vmatpush1.msra.mxu0 %v595_v9 }
 0x387   :  { %667 = vmatprep.subr.mxu0 %v594_v10 }
 0x388   :  { %668 = vmatpush1.msra.mxu0 %v593_v11 }
 0x429   :  { %v475_v18 = vpop.f32.mrf.mxu0 }
 0x42a   :  { %v476_v19 = vadd.f32 %v475_v18, %v399_v16 }
 0x42b   :  { %v477_v20 = vpop.f32.mrf.mxu0 }
 0x42c   :  { %v480_v21 = vmul.f32 %v476_v19, %v476_v19  ;;  %v478_v22 = vadd.f32 %v477_v20, %v403_v17 }
 0x42e   :  { %v482_v23 = vmul.f32 %v480_v21, %v476_v19  ;;  %v481_v24 = vmul.f32 %v478_v22, %v478_v22 }
 0x430   :  { %v484_v25 = vmul.f32 0.044715, %v482_v23  ;;  %v483_v26 = vmul.f32 %v481_v24, %v478_v22 }
 0x432   :  { %v486_v27 = vadd.f32 %v484_v25, %v476_v19  ;;  %v485_v28 = vmul.f32 0.044715, %v483_v26 }
 0x434   :  { %v488_v29 = vmul.f32 0.7978846, %v486_v27  ;;  %v487_v30 = vadd.f32 %v485_v28, %v478_v22 }
 0x436   :  { %931 = vtanh.f32 %v488_v29  ;;  %v489_v31 = vmul.f32 0.7978846, %v487_v30 }
 0x438   :  { %933 = vtanh.f32 %v489_v31 }
 0x443   :  { %v932_v32 = vpop.eup %931 }
 0x444   :  { %v492_v33 = vadd.f32 1.0, %v932_v32 }
 0x445   :  { %v934_v34 = vpop.eup %933 }
 0x446   :  { %v494_v35 = vmul.f32 0.5, %v492_v33  ;;  %v493_v36 = vadd.f32 1.0, %v934_v34 }
 0x448   :  { %v496_v37 = vmul.f32 %v494_v35, %v476_v19  ;;  %v495_v38 = vmul.f32 0.5, %v493_v36 }
 0x44a   :  { %920 = vmatmul.mubr.f32.vlgmr.msra.gmra.mxu1 %v496_v37  ;;  %v497_v39 = vmul.f32 %v495_v38, %v478_v22 }
 0x44c   :  { %702 = vmatmul.mubr.f32.vlgmr.msra.gmra.mxu0 %v497_v39 }
 0x44d   :  { %946 = shalt.err (!%p943_p4)
}
 0x44e   :  { %729 = dma.vmem_to_hbm [thread:$0]  %s727_s14, 32, %s1491_s16, [#allocation3]   ;;  %v760_v40 = vld [vmem:[%s1488_s13] ss:$0 sm:$0xff]  ;;  %vm591_vm3 = vcmask 123904  }
 0x44f   :  { %v625_v41 = vld [vmem:[%s1490_s15] sm:$0x3]  ;;  %s983_s29 = smov [#allocation4]  }
 0x450   :  { %s736_s30 = sshll.u32 %s983_s29, 4  ;;  %v630_v44 = vrot.slane %v625_v41, %v398_v14  ;;  %v634_v45 = vrot.slane %v625_v41, %v402_v15  ;;  %s737_s30 = int_to_ptr.vmem [resolvable:$true] %s736_s30 }
 0x451   :  { %s955_s16 = scalar_lea.vmem %s737_s30, 32  ;;  %p960_p6 = scmp.lt.s32.totalorder %s737_s30, %s737_s30 }
 0x452   :  { %p956_p5 = scmp.ne.s32.totalorder %s737_s30, %s955_s16  ;;  %p961_p7 = scmp.lt.s32.totalorder %s955_s16, %s955_s16 }
 0x454   :  { %p962_p8 = por %p961_p7, %p960_p6 }
 0x456   :  { %p963_p9 = pnand %p962_p8, %p956_p5 }
 0x50a   :  { %v587_v42 = vpop.f32.mrf.mxu1 }
 0x50b   :  { %v588_v43 = vadd.f32 %v760_v40, %v587_v42 }
 0x50c   :  { %v921_v46 = vpop.f32.mrf.mxu1  ;;  %v703_v47 = vpop.f32.mrf.mxu0 }
 0x50d   :  { %592 = vst.msk [vmem:[#allocation4] sm:$0x3] %vm591_vm3, %v588_v43 }
 0x50e   :  { %v705_v48 = vpop.f32.mrf.mxu0 }
 0x50f   :  { %966 = shalt.err (!%p963_p9)
}
 0x510   :  { %739 = dma.vmem_to_hbm [thread:$0]  %s737_s30, 32, %s1492_s17, [#allocation5]   ;;  %v704_v49 = vadd.f32 %v703_v47, %v630_v44  ;;  %v706_v50 = vadd.f32 %v705_v48, %v634_v45 }
 0x512   :  { %v710_v51 = vcombine.low %v704_v49, %v706_v50 }
 0x514   :  { %761 = vst.sshfl [vmem:[%s1493_s18] sm:$0x33 pattern:$0x76325410] %v710_v51 }
 0x515   :  { %975 = dma.done.wait [#allocation3], 32  }
 0x516   :  { %976 = vsyncadd [#allocation3], 4294967264 }
 0x517   :  { %977 = dma.done.wait [#allocation5], 32  }
 0x518   :  { %978 = vsyncadd [#allocation5], 4294967264 }
 0x519   :  { %750 = vsyncpa [#allocation3], 1 }
 0x51a   :  { %751 = vsyncpa [#allocation5], 1 }

// kernel: integrated_forward.5
= control target key start
LH: loop header
LB: loop body
LE: loop exit
PB: predicated region body
PF: predicated region fallthrough
CT: control target
= control target key end

     0   :  { %vm59_vm0 = vcmask 64512   ;;  %v2328_v0 = vmov 0.0   ;;  %vm2329_vm1 = vmmov 0   ;;  %v241_v7 = vlaneseq  ;;  %s2330_s23 = smov 64   ;;  %s2759_s1 = inlined_call_operand.vmem [shape: f32[8,32], index: 1, kind: input, shape index: {}]   ;;  %s2760_s0 = inlined_call_operand.vmem [shape: f32[8,8], index: 0, kind: input, shape index: {}]   ;;  %s2761_s3 = inlined_call_operand.vmem [shape: f32[1,32,96], index: 3, kind: input, shape index: {}]   ;;  %s2762_s2 = inlined_call_operand.vmem [shape: f32[8,32], index: 2, kind: input, shape index: {}]   ;;  %s2763_s4 = inlined_call_operand.vmem [shape: f32[1,1,96], index: 4, kind: input, shape index: {}]   ;;  %s2764_s5 = inlined_call_operand.vmem [shape: f32[1,32,32], index: 5, kind: input, shape index: {}]   ;;  %s2765_s6 = inlined_call_operand.vmem [shape: f32[1,1,32], index: 6, kind: input, shape index: {}]   ;;  %s2766_s9 = inlined_call_operand.vmem [shape: f32[1,32,64], index: 9, kind: input, shape index: {}]   ;;  %s2767_s11 = inlined_call_operand.vmem [shape: f32[1,64,32], index: 11, kind: input, shape index: {}]   ;;  %s2768_s7 = inlined_call_operand.vmem [shape: f32[1,1,32], index: 7, kind: input, shape index: {}]   ;;  %s2769_s8 = inlined_call_operand.vmem [shape: f32[1,1,32], index: 8, kind: input, shape index: {}]   ;;  %s2770_s10 = inlined_call_operand.vmem [shape: f32[1,1,64], index: 10, kind: input, shape index: {}]   ;;  %s2771_s12 = inlined_call_operand.vmem [shape: f32[1,1,32], index: 12, kind: input, shape index: {}]   ;;  %s2772_s15 = inlined_call_operand.vmem [shape: f32[32,64], index: 15, kind: input, shape index: {}]   ;;  %s2773_s13 = inlined_call_operand.vmem [shape: f32[1,1,32], index: 13, kind: input, shape index: {}]   ;;  %s2774_s14 = inlined_call_operand.vmem [shape: f32[1,1,32], index: 14, kind: input, shape index: {}]   ;;  %s2775_s16 = inlined_call_operand.vmem [shape: f32[1,64], index: 16, kind: input, shape index: {}]   ;;  %s2776_s17 = inlined_call_operand.vmem [shape: f32[2,64], index: 17, kind: output, shape index: {}]  }
   0x1   :  { %2777 = sst [smem:[#allocation2_spill]] %s2759_s1  ;;  %2135 = vmatprep.subr.mxu0 %v2328_v0  ;;  %2137 = vmatprep.mubr.msk.f32.mxu0 %vm2329_vm1, %v2328_v0  ;;  %v136_v3 = vld [vmem:[%s2761_s3 + $0x18] sm:$0xff]  ;;  %v135_v4 = vld [vmem:[%s2761_s3 + $0x10] sm:$0xff]  ;;  %v134_v5 = vld [vmem:[%s2761_s3 + $0x8] sm:$0xff]  ;;  %vm167_vm5 = vcmask 261120   ;;  %vm328_vm7 = vcmask 27648  }
   0x2   :  { %2778 = sst [smem:[#allocation3_spill]] %s2760_s0  ;;  %2140 = vmatprep.subr.mxu1 %v2328_v0  ;;  %2148 = vmatprep.mubr.msk.f32.mxu1 %vm2329_vm1, %v2328_v0  ;;  %v133_v6 = vld [vmem:[%s2761_s3] sm:$0xff]  ;;  %v2453_v8 = vand.u32 127, %v241_v7  ;;  %vm448_vm11 = vcmask 1043456   ;;  %vm444_vm15 = vcmask 31744  }
   0x3   :  { %s2779_s26 = sld [smem:[#allocation2_spill]]  ;;  %2141 = vmatpush3.msra.mxu1 %v136_v3  ;;  %v58_v10 = vld [vmem:[%s2762_s2] sm:$0xff]  ;;  %s2331_s2 = smov 96  }
   0x4   :  { %s2780_s29 = sld [smem:[#allocation3_spill]]  ;;  %2142 = vmatprep.subr.mxu1 %v2328_v0  ;;  %vm345_vm2 = vcmp.ge.s32.totalorder %v2453_v8, 8  ;;  %vm346_vm3 = vcmp.lt.s32.totalorder %v2453_v8, 16  ;;  %v2022_v14 = vld [vmem:[%s2763_s4] ss:$0 sm:$0xff]  ;;  %vm244_vm6 = vcmp.lt.s32.totalorder %v2453_v8, 8 }
   0x5   :  { %2143 = vmatpush3.msra.mxu1 %v135_v4  ;;  %vm347_vm4 = vmand %vm345_vm2, %vm346_vm3  ;;  %v2477_v18 = vsel %vm244_vm6, 1.0, %v2328_v0  ;;  %vm695_vm8 = vcmp.ge.s32.totalorder %v2453_v8, 24  ;;  %vm696_vm9 = vcmp.lt.s32.totalorder %v2453_v8, 32  ;;  %vm521_vm12 = vcmp.ge.s32.totalorder %v2453_v8, 16 }
   0x6   :  { %2144 = vmatprep.subr.mxu1 %v2328_v0  ;;  %v2027_v9 = vsel %vm347_vm4, 1.0, %v2328_v0  ;;  %vm697_vm10 = vmand %vm695_vm8, %vm696_vm9  ;;  %vm522_vm13 = vcmp.lt.s32.totalorder %v2453_v8, 24  ;;  %vm1929_vm2 = vcmask 1040384   ;;  %vm2015_vm3 = vcmask 517120  }
   0x7   :  { %2145 = vmatpush3.msra.mxu1 %v134_v5  ;;  %437 = vrot.lane.b32.xlu1 %v2027_v9, %s2330_s23  ;;  %v2037_v30 = vsel %vm697_vm10, 1.0, %v2328_v0  ;;  %vm523_vm14 = vmand %vm521_vm12, %vm522_vm13 }
   0x8   :  { %2146 = vmatprep.subr.mxu1 %v2328_v0  ;;  %v2032_v45 = vsel %vm523_vm14, 1.0, %v2328_v0 }
   0x9   :  { %v57_v1 = vld [vmem:[%s2779_s26] sm:$0xff]  ;;  %2147 = vmatpush3.msra.mxu1 %v133_v6  ;;  %v2287_v60 = vpack.i.bf16 %v2032_v45, %v2477_v18 }
   0xa   :  { %v56_v2 = vld [vmem:[%s2780_s29] sm:$0xff]  ;;  %2136 = vmatpush3.msra.mxu0 %v57_v1  ;;  %2171 = vmatprep.subr.mxu1 %v2328_v0 }
   0xb   :  { %2138 = vmatmul.mubr.msk.f32.vlgmr.msra.gmra.mxu0 %vm59_vm0, %v56_v2  ;;  %2151 = vmatprep.subr.mxu0 %v2328_v0  ;;  %vm1806_vm0 = vcmask 523264  }
   0xc   :  { %2153 = vmatprep.mubr.msk.f32.mxu0 %vm2329_vm1, %v2328_v0 }
  0x79   :  { %v438_v28 = vpop.permute.xlu1 %437 }
  0xcb   :  { %v129_v11 = vpop.f32.mrf.mxu0 }
  0xcc   :  { %v2462_v12 = vadd.f32 %v129_v11, %v58_v10 }
  0xcd   :  { %v2139_v13 = vpop.f32.mrf.mxu0 }
  0xce   :  { %2149 = vmatmul.mubr.msk.f32.vlgmr.msra.gmra.mxu1 %vm167_vm5, %v2462_v12 }
  0xcf   :  { %2173 = vmatprep.mubr.msk.f32.mxu1 %vm2329_vm1, %v2328_v0 }
 0x18e   :  { %v237_v15 = vpop.f32.mrf.mxu1 }
 0x18f   :  { %v2471_v16 = vadd.f32 %v2022_v14, %v237_v15 }
 0x190   :  { %v2150_v17 = vpop.f32.mrf.mxu1 }
 0x191   :  { %250 = vrot.lane.b32.xlu0 %v2471_v16, %s2331_s2  ;;  %v2482_v20 = vmul.f32 %v2477_v18, %v2471_v16  ;;  %v2491_v21 = vmul.f32 %v2027_v9, %v2471_v16  ;;  %v2502_v29 = vmul.f32 %v438_v28, %v2471_v16  ;;  %v2521_v46 = vmul.f32 %v2032_v45, %v2471_v16 }
 0x192   :  { %v2529_v48 = vmul.f32 %v2037_v30, %v2471_v16  ;;  %v950_v5 = vrot.slane %v2471_v16, 4 }
 0x203   :  { %v251_v19 = vpop.permute.xlu0 %250 }
 0x204   :  { %2152 = vmatpush3.xpose.msk.msra.mxu0 %vm167_vm5, %v251_v19 }
 0x205   :  { %2156 = vmatprep.subr.mxu0 %v2328_v0 }
 0x207   :  { %2154 = vmatmul.mubr.msk.f32.vlgmr.msra.gmra.mxu0 %vm167_vm5, %v2482_v20 }
 0x208   :  { %2157 = vmatpush3.xpose.msk.msra.mxu0 %vm167_vm5, %v251_v19  ;;  %2158 = vmatprep.mubr.msk.f32.mxu0 %vm2329_vm1, %v2328_v0 }
 0x209   :  { %2161 = vmatprep.subr.mxu0 %v2328_v0 }
 0x20b   :  { %2159 = vmatmul.mubr.msk.f32.vlgmr.msra.gmra.mxu0 %vm167_vm5, %v2491_v21 }
 0x20c   :  { %2163 = vmatprep.mubr.msk.f32.mxu0 %vm2329_vm1, %v2328_v0 }
 0x2c7   :  { %v323_v22 = vpop.f32.mrf.mxu0 }
 0x2c8   :  { %v327_v36 = vmul.f32 0.35355338, %v323_v22 }
 0x2c9   :  { %v2155_v23 = vpop.f32.mrf.mxu0 }
 0x2ca   :  { %v329_v38 = vsel %vm328_vm7, %v327_v36, -inf }
 0x2cb   :  { %v420_v24 = vpop.f32.mrf.mxu0 }
 0x2cc   :  { %v424_v25 = vmul.f32 0.35355338, %v420_v24 }
 0x2cd   :  { %v2160_v26 = vpop.f32.mrf.mxu0 }
 0x2ce   :  { %v425_v27 = vsel %vm328_vm7, %v424_v25, -inf }
 0x2cf   :  { %426 = vmax.xlane.f32.xlu0 %v425_v27  ;;  %v1202_v27 = vrot.slane %v2521_v46, 4 }
 0x2e5   :  { %442 = vrot.lane.b32.xlu0 %v2502_v29, %s2330_s23 }
 0x2e9   :  { %787 = vrot.lane.b32.xlu0 %v2037_v30, %s2330_s23 }
 0x358   :  { %v427_v31 = vpop.xlane.xlu0 %426 }
 0x359   :  { %v428_v32 = vsub.f32 %v424_v25, %v427_v31 }
 0x35b   :  { %v429_v33 = vmul.f32 1.442695, %v428_v32 }
 0x35c   :  { %v443_v34 = vpop.permute.xlu0 %442 }
 0x35d   :  { %2292 = vpow2.f32 %v429_v33  ;;  %2162 = vmatpush3.msk.msra.mxu0 %vm448_vm11, %v443_v34 }
 0x35e   :  { %2166 = vmatprep.subr.mxu0 %v2328_v0 }
 0x360   :  { %v788_v15 = vpop.permute.xlu0 %787 }
 0x361   :  { %v2558_v17 = vmul.f32 %v788_v15, %v2471_v16 }
 0x36a   :  { %v2293_v35 = vpop.eup %2292 }
 0x36b   :  { %v431_v37 = vsel %vm328_vm7, %v2293_v35, 0.0 }
 0x36c   :  { %432 = vadd.xlane.f32.xlu1 %v431_v37 }
 0x370   :  { %330 = vmax.xlane.f32.xlu1 %v329_v38 }
 0x3f5   :  { %v433_v39 = vpop.xlane.xlu1 %432 }
 0x3f6   :  { %2294 = vrcp.f32 %v433_v39 }
 0x3f9   :  { %v331_v40 = vpop.xlane.xlu1 %330 }
 0x3fa   :  { %v332_v41 = vsub.f32 %v327_v36, %v331_v40 }
 0x3fc   :  { %v333_v42 = vmul.f32 1.442695, %v332_v41 }
 0x3fe   :  { %2296 = vpow2.f32 %v333_v42 }
 0x403   :  { %v2295_v43 = vpop.eup %2294 }
 0x404   :  { %v435_v44 = vmul.f32 %v2295_v43, %v2293_v35  ;;  %v949_v35 = vrot.slane %v2482_v20, 4 }
 0x406   :  { %2164 = vmatmul.mubr.msk.f32.vlgmr.msra.gmra.mxu0 %vm444_vm15, %v435_v44 }
 0x407   :  { %2167 = vmatpush3.xpose.msk.msra.mxu0 %vm167_vm5, %v251_v19  ;;  %2168 = vmatprep.mubr.msk.f32.mxu0 %vm2329_vm1, %v2328_v0 }
 0x408   :  { %2176 = vmatprep.subr.mxu0 %v2328_v0 }
 0x40a   :  { %2169 = vmatmul.mubr.msk.f32.vlgmr.msra.gmra.mxu0 %vm167_vm5, %v2521_v46 }
 0x40b   :  { %v2297_v47 = vpop.eup %2296  ;;  %2177 = vmatpush3.xpose.msk.msra.mxu0 %vm167_vm5, %v251_v19  ;;  %2178 = vmatprep.mubr.msk.f32.mxu0 %vm2329_vm1, %v2328_v0 }
 0x40c   :  { %v335_v49 = vsel %vm328_vm7, %v2297_v47, 0.0  ;;  %2186 = vmatprep.subr.mxu0 %v2328_v0 }
 0x40d   :  { %336 = vadd.xlane.f32.xlu0 %v335_v49 }
 0x40e   :  { %2179 = vmatmul.mubr.msk.f32.vlgmr.msra.gmra.mxu0 %vm167_vm5, %v2529_v48 }
 0x40f   :  { %2188 = vmatprep.mubr.msk.f32.mxu0 %vm2329_vm1, %v2328_v0 }
 0x496   :  { %v337_v18 = vpop.xlane.xlu0 %336 }
 0x4c6   :  { %v2537_v50 = vpop.f32.mrf.mxu0 }
 0x4c8   :  { %v2165_v51 = vpop.f32.mrf.mxu0 }
 0x4ca   :  { %v596_v52 = vpop.f32.mrf.mxu0 }
 0x4cb   :  { %v600_v53 = vmul.f32 0.35355338, %v596_v52 }
 0x4cc   :  { %v2170_v54 = vpop.f32.mrf.mxu0 }
 0x4cd   :  { %v601_v55 = vsel %vm328_vm7, %v600_v53, -inf }
 0x4ce   :  { %602 = vmax.xlane.f32.xlu1 %v601_v55  ;;  %v770_v56 = vpop.f32.mrf.mxu0 }
 0x4cf   :  { %v774_v57 = vmul.f32 0.35355338, %v770_v56 }
 0x4d0   :  { %v2180_v58 = vpop.f32.mrf.mxu0 }
 0x4d1   :  { %v775_v59 = vsel %vm328_vm7, %v774_v57, -inf }
 0x4d2   :  { %776 = vmax.xlane.f32.xlu1 %v775_v59 }
 0x4e3   :  { %2288 = vrot.lane.b32.xlu1 %v2287_v60, %s2330_s23 }
 0x557   :  { %v603_v61 = vpop.xlane.xlu1 %602 }
 0x558   :  { %v604_v62 = vsub.f32 %v600_v53, %v603_v61 }
 0x55a   :  { %v605_v63 = vmul.f32 1.442695, %v604_v62 }
 0x55b   :  { %v777_v1 = vpop.xlane.xlu1 %776 }
 0x55c   :  { %2298 = vpow2.f32 %v605_v63  ;;  %v778_v8 = vsub.f32 %v774_v57, %v777_v1 }
 0x55e   :  { %v779_v9 = vmul.f32 1.442695, %v778_v8 }
 0x55f   :  { %v2289_v2 = vpop.permute.xlu1 %2288 }
 0x560   :  { %v2291_v3 = vunpack.i.h.bf16 %v2289_v2  ;;  %2300 = vpow2.f32 %v779_v9  ;;  %v2290_v10 = vunpack.i.l.bf16 %v2289_v2 }
 0x561   :  { %2302 = vrcp.f32 %v337_v18 }
 0x562   :  { %v2544_v4 = vmul.f32 %v2291_v3, %v2471_v16  ;;  %v2552_v11 = vmul.f32 %v2290_v10, %v2471_v16  ;;  %v1039_v16 = vrot.slane %v2491_v21, 4  ;;  %v1365_v21 = vrot.slane %v2529_v48, 4 }
 0x564   :  { %618 = vrot.lane.b32.xlu0 %v2544_v4, %s2330_s23  ;;  %v1287_v10 = vrot.slane %v2544_v4, 4  ;;  %v1450_v4 = vrot.slane %v2558_v17, 4 }
 0x568   :  { %951 = vrot.lane.b32.xlu0 %v950_v5, %s2331_s2 }
 0x569   :  { %v2299_v6 = vpop.eup %2298 }
 0x56a   :  { %v607_v7 = vsel %vm328_vm7, %v2299_v6, 0.0 }
 0x56b   :  { %608 = vadd.xlane.f32.xlu1 %v607_v7 }
 0x56d   :  { %v2301_v13 = vpop.eup %2300 }
 0x56e   :  { %v781_v14 = vsel %vm328_vm7, %v2301_v13, 0.0  ;;  %v2303_v23 = vpop.eup %2302 }
 0x56f   :  { %v339_v25 = vmul.f32 %v2303_v23, %v2297_v47 }
 0x57c   :  { %870 = vrot.lane.b32.xlu1 %v2552_v11, %s2330_s23 }
 0x587   :  { %782 = vadd.xlane.f32.xlu0 %v781_v14 }
 0x59d   :  { %792 = vrot.lane.b32.xlu0 %v2558_v17, %s2330_s23 }
 0x5d6   :  { %v619_v19 = vpop.permute.xlu0 %618 }
 0x5d7   :  { %2172 = vmatpush3.msk.msra.mxu1 %vm448_vm11, %v619_v19 }
 0x5d8   :  { %2181 = vmatprep.subr.mxu1 %v2328_v0 }
 0x5da   :  { %v952_v26 = vpop.permute.xlu0 %951 }
 0x5f4   :  { %v609_v22 = vpop.xlane.xlu1 %608 }
 0x5f5   :  { %2304 = vrcp.f32 %v609_v22 }
 0x5f8   :  { %v871_v24 = vpop.permute.xlu1 %870 }
 0x5f9   :  { %2187 = vmatpush3.msk.msra.mxu0 %vm448_vm11, %v871_v24 }
 0x5fa   :  { %2189 = vmatmul.mubr.msk.f32.vlgmr.msra.gmra.mxu0 %vm444_vm15, %v339_v25  ;;  %2196 = vmatprep.subr.mxu0 %v2328_v0  ;;  %v1124_v25 = vrot.slane %v2502_v29, 4 }
 0x5fb   :  { %2197 = vmatpush3.xpose.msk.msra.mxu0 %vm167_vm5, %v952_v26  ;;  %2198 = vmatprep.mubr.msk.f32.mxu0 %vm2329_vm1, %v2328_v0 }
 0x5fc   :  { %2206 = vmatprep.subr.mxu0 %v2328_v0 }
 0x5fe   :  { %2199 = vmatmul.mubr.msk.f32.vlgmr.msra.gmra.mxu0 %vm167_vm5, %v1039_v16 }
 0x5ff   :  { %2207 = vmatpush3.xpose.msk.msra.mxu0 %vm167_vm5, %v952_v26  ;;  %2208 = vmatprep.mubr.msk.f32.mxu0 %vm2329_vm1, %v2328_v0 }
 0x600   :  { %2216 = vmatprep.subr.mxu0 %v2328_v0 }
 0x602   :  { %v2305_v28 = vpop.eup %2304  ;;  %2209 = vmatmul.mubr.msk.f32.vlgmr.msra.gmra.mxu0 %vm167_vm5, %v1202_v27 }
 0x603   :  { %2217 = vmatpush3.xpose.msk.msra.mxu0 %vm167_vm5, %v952_v26  ;;  %v611_v30 = vmul.f32 %v2305_v28, %v2299_v6  ;;  %2218 = vmatprep.mubr.msk.f32.mxu0 %vm2329_vm1, %v2328_v0 }
 0x604   :  { %2226 = vmatprep.subr.mxu0 %v2328_v0 }
 0x605   :  { %2174 = vmatmul.mubr.msk.f32.vlgmr.msra.gmra.mxu1 %vm444_vm15, %v611_v30 }
 0x606   :  { %2219 = vmatmul.mubr.msk.f32.vlgmr.msra.gmra.mxu0 %vm167_vm5, %v1365_v21  ;;  %2183 = vmatprep.mubr.msk.f32.mxu1 %vm2329_vm1, %v2328_v0 }
 0x607   :  { %2228 = vmatprep.mubr.msk.f32.mxu0 %vm2329_vm1, %v2328_v0 }
 0x610   :  { %v783_v31 = vpop.xlane.xlu0 %782 }
 0x611   :  { %2306 = vrcp.f32 %v783_v31 }
 0x614   :  { %v793_v32 = vpop.permute.xlu0 %792 }
 0x615   :  { %2182 = vmatpush3.msk.msra.mxu1 %vm448_vm11, %v793_v32 }
 0x616   :  { %2191 = vmatprep.subr.mxu1 %v2328_v0 }
 0x61e   :  { %v2307_v33 = vpop.eup %2306 }
 0x61f   :  { %v785_v34 = vmul.f32 %v2307_v33, %v2301_v13 }
 0x621   :  { %2184 = vmatmul.mubr.msk.f32.vlgmr.msra.gmra.mxu1 %vm444_vm15, %v785_v34 }
 0x622   :  { %2192 = vmatpush3.xpose.msk.msra.mxu1 %vm167_vm5, %v952_v26  ;;  %2193 = vmatprep.mubr.msk.f32.mxu1 %vm2329_vm1, %v2328_v0  ;;  %v1528_v26 = vrot.slane %v2552_v11, 4 }
 0x623   :  { %2201 = vmatprep.subr.mxu1 %v2328_v0 }
 0x625   :  { %2194 = vmatmul.mubr.msk.f32.vlgmr.msra.gmra.mxu1 %vm167_vm5, %v949_v35 }
 0x626   :  { %2203 = vmatprep.mubr.msk.f32.mxu1 %vm2329_vm1, %v2328_v0 }
 0x6ba   :  { %v943_v36 = vpop.f32.mrf.mxu0 }
 0x6bb   :  { %v944_v43 = vadd.f32 %v943_v36, %v2537_v50 }
 0x6bc   :  { %v2190_v37 = vpop.f32.mrf.mxu0 }
 0x6be   :  { %v1108_v38 = vpop.f32.mrf.mxu0 }
 0x6bf   :  { %v1112_v39 = vmul.f32 0.35355338, %v1108_v38 }
 0x6c0   :  { %v2200_v40 = vpop.f32.mrf.mxu0 }
 0x6c1   :  { %v1113_v41 = vsel %vm328_vm7, %v1112_v39, -inf  ;;  %v140_v40 = vld [vmem:[%s2764_s5 + $0x10] sm:$0xff] }
 0x6c2   :  { %1114 = vmax.xlane.f32.xlu1 %v1113_v41  ;;  %v1271_v42 = vpop.f32.mrf.mxu0  ;;  %v139_v41 = vld [vmem:[%s2764_s5 + $0x8] sm:$0xff] }
 0x6c3   :  { %v1275_v58 = vmul.f32 0.35355338, %v1271_v42  ;;  %v138_v42 = vld [vmem:[%s2764_s5] sm:$0xff] }
 0x6c4   :  { %v2210_v44 = vpop.f32.mrf.mxu0 }
 0x6c5   :  { %v691_v20 = vpop.f32.mrf.mxu1  ;;  %v1276_v59 = vsel %vm328_vm7, %v1275_v58, -inf }
 0x6c6   :  { %v947_v45 = vadd.f32 %v944_v43, %v691_v20  ;;  %v1434_v46 = vpop.f32.mrf.mxu0 }
 0x6c7   :  { %v1438_v47 = vmul.f32 0.35355338, %v1434_v46  ;;  %v2175_v48 = vpop.f32.mrf.mxu1 }
 0x6c8   :  { %v2220_v49 = vpop.f32.mrf.mxu0 }
 0x6c9   :  { %v1439_v51 = vsel %vm328_vm7, %v1438_v47, -inf }
 0x6ca   :  { %1440 = vmax.xlane.f32.xlu1 %v1439_v51 }
 0x6e1   :  { %v865_v52 = vpop.f32.mrf.mxu1 }
 0x6e2   :  { %v2604_v53 = vadd.f32 %v947_v45, %v865_v52 }
 0x6e3   :  { %v2185_v54 = vpop.f32.mrf.mxu1 }
 0x6e5   :  { %v1023_v55 = vpop.f32.mrf.mxu1 }
 0x6e6   :  { %v1027_v56 = vmul.f32 0.35355338, %v1023_v55 }
 0x6e7   :  { %v2195_v57 = vpop.f32.mrf.mxu1 }
 0x6e8   :  { %v1028_v50 = vsel %vm328_vm7, %v1027_v56, -inf  ;;  %v2060_v57 = vld [vmem:[%s2765_s6] ss:$0 sm:$0xff] }
 0x6e9   :  { %1029 = vmax.xlane.f32.xlu0 %v1028_v50 }
 0x6ed   :  { %1277 = vmax.xlane.f32.xlu0 %v1276_v59 }
 0x74b   :  { %v1115_v60 = vpop.xlane.xlu1 %1114 }
 0x74c   :  { %v1116_v61 = vsub.f32 %v1112_v39, %v1115_v60  ;;  %v141_v39 = vld [vmem:[%s2764_s5 + $0x18] sm:$0xff] }
 0x74e   :  { %v1117_v62 = vmul.f32 1.442695, %v1116_v61 }
 0x750   :  { %2308 = vpow2.f32 %v1117_v62 }
 0x753   :  { %v1441_v63 = vpop.xlane.xlu1 %1440 }
 0x754   :  { %v1442_v1 = vsub.f32 %v1438_v47, %v1441_v63 }
 0x756   :  { %v1443_v2 = vmul.f32 1.442695, %v1442_v1 }
 0x758   :  { %2310 = vpow2.f32 %v1443_v2 }
 0x75d   :  { %v2309_v3 = vpop.eup %2308 }
 0x75e   :  { %v1119_v5 = vsel %vm328_vm7, %v2309_v3, 0.0 }
 0x75f   :  { %1120 = vadd.xlane.f32.xlu0 %v1119_v5  ;;  %v147_v5 = vld [vmem:[%s2766_s9 + $0x10] sm:$0xff] }
 0x765   :  { %v2311_v6 = vpop.eup %2310 }
 0x766   :  { %v1445_v7 = vsel %vm328_vm7, %v2311_v6, 0.0 }
 0x767   :  { %1446 = vadd.xlane.f32.xlu1 %v1445_v7  ;;  %v157_v7 = vld [vmem:[%s2767_s11 + $0x38] sm:$0xff] }
 0x772   :  { %v1030_v8 = vpop.xlane.xlu0 %1029 }
 0x773   :  { %v1031_v15 = vsub.f32 %v1027_v56, %v1030_v8  ;;  %v156_v8 = vld [vmem:[%s2767_s11 + $0x30] sm:$0xff] }
 0x775   :  { %v1032_v18 = vmul.f32 1.442695, %v1031_v15 }
 0x776   :  { %v1278_v9 = vpop.xlane.xlu0 %1277 }
 0x777   :  { %v1279_v13 = vsub.f32 %v1275_v58, %v1278_v9  ;;  %v155_v9 = vld [vmem:[%s2767_s11 + $0x28] sm:$0xff] }
 0x778   :  { %1288 = vrot.lane.b32.xlu1 %v1287_v10, %s2330_s23  ;;  %v154_v10 = vld [vmem:[%s2767_s11 + $0x20] sm:$0xff] }
 0x779   :  { %v1280_v14 = vmul.f32 1.442695, %v1279_v13  ;;  %v153_v13 = vld [vmem:[%s2767_s11 + $0x18] sm:$0xff] }
 0x77b   :  { %2312 = vpow2.f32 %v1280_v14 }
 0x77c   :  { %2314 = vpow2.f32 %v1032_v18 }
 0x788   :  { %v2313_v19 = vpop.eup %2312 }
 0x789   :  { %v1282_v22 = vsel %vm328_vm7, %v2313_v19, 0.0  ;;  %v2315_v23 = vpop.eup %2314 }
 0x78a   :  { %1283 = vadd.xlane.f32.xlu0 %v1282_v22  ;;  %v1034_v24 = vsel %vm328_vm7, %v2315_v23, 0.0  ;;  %v2062_v22 = vld [vmem:[%s2768_s7] ss:$0 sm:$0xff] }
 0x79c   :  { %1035 = vadd.xlane.f32.xlu1 %v1034_v24  ;;  %v2063_v24 = vld [vmem:[%s2769_s8] ss:$0 sm:$0xff] }
 0x7a0   :  { %1125 = vrot.lane.b32.xlu0 %v1124_v25, %s2330_s23 }
 0x7a4   :  { %1451 = vrot.lane.b32.xlu0 %v1450_v4, %s2330_s23 }
 0x7ad   :  { %1529 = vrot.lane.b32.xlu1 %v1528_v26, %s2330_s23  ;;  %v152_v26 = vld [vmem:[%s2767_s11 + $0x10] sm:$0xff] }
 0x7e8   :  { %v1121_v16 = vpop.xlane.xlu0 %1120 }
 0x7e9   :  { %2316 = vrcp.f32 %v1121_v16  ;;  %v151_v16 = vld [vmem:[%s2767_s11 + $0x8] sm:$0xff] }
 0x7f0   :  { %v1447_v27 = vpop.xlane.xlu1 %1446 }
 0x7f4   :  { %v1289_v29 = vpop.permute.xlu1 %1288 }
 0x7f6   :  { %v2317_v30 = vpop.eup %2316 }
 0x7f7   :  { %v1123_v31 = vmul.f32 %v2317_v30, %v2309_v3  ;;  %v148_v3 = vld [vmem:[%s2766_s9 + $0x18] sm:$0xff] }
 0x813   :  { %v1284_v28 = vpop.xlane.xlu0 %1283 }
 0x814   :  { %2318 = vrcp.f32 %v1284_v28  ;;  %v2064_v28 = vld [vmem:[%s2770_s10] ss:$0 sm:$0xff] }
 0x815   :  { %2320 = vrcp.f32 %v1447_v27  ;;  %v150_v27 = vld [vmem:[%s2767_s11] sm:$0xff] }
 0x817   :  { %v1126_v21 = vpop.permute.xlu0 %1125 }
 0x818   :  { %2202 = vmatpush3.msk.msra.mxu1 %vm448_vm11, %v1126_v21 }
 0x819   :  { %2204 = vmatmul.mubr.msk.f32.vlgmr.msra.gmra.mxu1 %vm444_vm15, %v1123_v31  ;;  %2211 = vmatprep.subr.mxu1 %v2328_v0 }
 0x81a   :  { %2212 = vmatpush3.msk.msra.mxu1 %vm448_vm11, %v1289_v29  ;;  %2213 = vmatprep.mubr.msk.f32.mxu1 %vm2329_vm1, %v2328_v0 }
 0x81b   :  { %2221 = vmatprep.subr.mxu1 %v2328_v0  ;;  %v1452_v33 = vpop.permute.xlu0 %1451 }
 0x821   :  { %v2319_v11 = vpop.eup %2318 }
 0x822   :  { %v1286_v17 = vmul.f32 %v2319_v11, %v2313_v19  ;;  %v2321_v32 = vpop.eup %2320  ;;  %v2066_v11 = vld [vmem:[%s2771_s12] ss:$0 sm:$0xff] }
 0x823   :  { %v1449_v35 = vmul.f32 %v2321_v32, %v2311_v6  ;;  %v145_v6 = vld [vmem:[%s2766_s9] sm:$0xff] }
 0x824   :  { %2214 = vmatmul.mubr.msk.f32.vlgmr.msra.gmra.mxu1 %vm444_vm15, %v1286_v17 }
 0x825   :  { %2222 = vmatpush3.msk.msra.mxu1 %vm448_vm11, %v1452_v33  ;;  %v1036_v34 = vpop.xlane.xlu1 %1035  ;;  %2223 = vmatprep.mubr.msk.f32.mxu1 %vm2329_vm1, %v2328_v0 }
 0x826   :  { %2322 = vrcp.f32 %v1036_v34  ;;  %2231 = vmatprep.subr.mxu1 %v2328_v0 }
 0x828   :  { %2224 = vmatmul.mubr.msk.f32.vlgmr.msra.gmra.mxu1 %vm444_vm15, %v1449_v35 }
 0x829   :  { %v1530_v36 = vpop.permute.xlu1 %1529  ;;  %2239 = vmatprep.mubr.msk.f32.mxu1 %vm2329_vm1, %v2328_v0  ;;  %2232 = vmatpush3.msra.mxu1 %v141_v39 }
 0x82a   :  { %2227 = vmatpush3.msk.msra.mxu0 %vm448_vm11, %v1530_v36  ;;  %2233 = vmatprep.subr.mxu1 %v2328_v0 }
 0x82b   :  { %2242 = vmatprep.subr.mxu0 %v2328_v0  ;;  %2234 = vmatpush3.msra.mxu1 %v140_v40 }
 0x82c   :  { %2235 = vmatprep.subr.mxu1 %v2328_v0 }
 0x82d   :  { %2236 = vmatpush3.msra.mxu1 %v139_v41  ;;  %v1934_v41 = vld [vmem:[%s2772_s15 + $0x18] sm:$0xff] }
 0x82e   :  { %2237 = vmatprep.subr.mxu1 %v2328_v0 }
 0x82f   :  { %2238 = vmatpush3.msra.mxu1 %v138_v42  ;;  %v1933_v42 = vld [vmem:[%s2772_s15 + $0x10] sm:$0xff] }
 0x830   :  { %2253 = vmatprep.subr.mxu1 %v2328_v0 }
 0x833   :  { %v2323_v37 = vpop.eup %2322 }
 0x834   :  { %v1038_v38 = vmul.f32 %v2323_v37, %v2315_v23 }
 0x836   :  { %2229 = vmatmul.mubr.msk.f32.vlgmr.msra.gmra.mxu0 %vm444_vm15, %v1038_v38 }
 0x837   :  { %2250 = vmatprep.mubr.msk.f32.mxu0 %vm2329_vm1, %v2328_v0  ;;  %2243 = vmatpush3.msra.mxu0 %v148_v3 }
 0x838   :  { %2244 = vmatprep.subr.mxu0 %v2328_v0 }
 0x839   :  { %2245 = vmatpush3.msra.mxu0 %v147_v5 }
 0x83a   :  { %2246 = vmatprep.subr.mxu0 %v2328_v0 }
 0x8d9   :  { %v1198_v43 = vpop.f32.mrf.mxu1 }
 0x8db   :  { %v2205_v44 = vpop.f32.mrf.mxu1 }
 0x8dc   :  { %v1931_v44 = vld [vmem:[%s2772_s15] sm:$0xff] }
 0x8e4   :  { %v1361_v20 = vpop.f32.mrf.mxu1 }
 0x8e6   :  { %v2215_v45 = vpop.f32.mrf.mxu1 }
 0x8e8   :  { %v1524_v46 = vpop.f32.mrf.mxu1 }
 0x8ea   :  { %v2225_v47 = vpop.f32.mrf.mxu1 }
 0x8f6   :  { %v1602_v48 = vpop.f32.mrf.mxu0 }
 0x8f7   :  { %v1603_v49 = vadd.f32 %v1602_v48, %v1198_v43  ;;  %v1932_v43 = vld [vmem:[%s2772_s15 + $0x8] sm:$0xff]  ;;  %v2068_v48 = vld [vmem:[%s2773_s13] ss:$0 sm:$0xff] }
 0x8f8   :  { %v2230_v51 = vpop.f32.mrf.mxu0 }
 0x8f9   :  { %v1606_v52 = vadd.f32 %v1603_v49, %v1361_v20  ;;  %v2069_v51 = vld [vmem:[%s2774_s14] ss:$0 sm:$0xff] }
 0x8fb   :  { %v1607_v54 = vadd.f32 %v1606_v52, %v1524_v46 }
 0x8fd   :  { %v1609_v55 = vrot.slane %v1607_v54, 4 }
 0x8ff   :  { %v1611_v56 = vsel %vm448_vm11, %v2604_v53, %v1609_v55 }
 0x900   :  { %2240 = vmatmul.mubr.msk.f32.vlgmr.msra.gmra.mxu1 %vm167_vm5, %v1611_v56 }
 0x901   :  { %2269 = vmatprep.mubr.msk.f32.mxu1 %vm2329_vm1, %v2328_v0  ;;  %2254 = vmatpush3.msra.mxu1 %v157_v7  ;;  %v2070_v7 = vld [vmem:[%s2775_s16] ss:$0 sm:$0xff] }
 0x902   :  { %2255 = vmatprep.subr.mxu1 %v2328_v0 }
 0x903   :  { %2256 = vmatpush3.msra.mxu1 %v156_v8 }
 0x904   :  { %2257 = vmatprep.subr.mxu1 %v2328_v0 }
 0x905   :  { %2258 = vmatpush3.msra.mxu1 %v155_v9 }
 0x906   :  { %2259 = vmatprep.subr.mxu1 %v2328_v0 }
 0x907   :  { %2260 = vmatpush3.msra.mxu1 %v154_v10 }
 0x908   :  { %2261 = vmatprep.subr.mxu1 %v2328_v0 }
 0x909   :  { %2262 = vmatpush3.msra.mxu1 %v153_v13 }
 0x90a   :  { %2263 = vmatprep.subr.mxu1 %v2328_v0 }
 0x90b   :  { %2264 = vmatpush3.msra.mxu1 %v152_v26 }
 0x90c   :  { %2265 = vmatprep.subr.mxu1 %v2328_v0 }
 0x90d   :  { %2266 = vmatpush3.msra.mxu1 %v151_v16 }
 0x90e   :  { %2267 = vmatprep.subr.mxu1 %v2328_v0 }
 0x90f   :  { %2268 = vmatpush3.msra.mxu1 %v150_v27 }
 0x9c0   :  { %v1687_v58 = vpop.f32.mrf.mxu1 }
 0x9c1   :  { %v1688_v50 = vadd.f32 %v2060_v57, %v1687_v58 }
 0x9c2   :  { %v2241_v59 = vpop.f32.mrf.mxu1 }
 0x9c3   :  { %v1691_v60 = vadd.f32 %v1688_v50, %v2462_v12  ;;  %v146_v12 = vld [vmem:[%s2766_s9 + $0x8] sm:$0xff] }
 0x9c4   :  { %2247 = vmatpush3.msra.mxu0 %v146_v12 }
 0x9c5   :  { %v1692_v61 = vsel %vm167_vm5, %v1691_v60, 0.0  ;;  %2248 = vmatprep.subr.mxu0 %v2328_v0 }
 0x9c6   :  { %1693 = vadd.xlane.f32.xlu1 %v1692_v61  ;;  %2249 = vmatpush3.msra.mxu0 %v145_v6 }
 0x9c7   :  { %2272 = vmatprep.subr.mxu0 %v2328_v0 }
 0xa4f   :  { %v1694_v62 = vpop.xlane.xlu1 %1693 }
 0xa50   :  { %v1696_v63 = vmul.f32 0.03125, %v1694_v62 }
 0xa52   :  { %v1697_v53 = vsub.f32 %v1691_v60, %v1696_v63 }
 0xa54   :  { %v1698_v1 = vmul.f32 %v1697_v53, %v1697_v53 }
 0xa56   :  { %v1699_v2 = vsel %vm167_vm5, %v1698_v1, 0.0 }
 0xa57   :  { %1700 = vadd.xlane.f32.xlu0 %v1699_v2 }
 0xae0   :  { %v1701_v14 = vpop.xlane.xlu0 %1700 }
 0xae1   :  { %v1702_v15 = vmul.f32 0.03125, %v1701_v14 }
 0xae3   :  { %v1703_v18 = vadd.f32 1e-05, %v1702_v15 }
 0xae5   :  { %2324 = vrsqrt.f32 %v1703_v18 }
 0xaf2   :  { %v2325_v19 = vpop.eup %2324 }
 0xaf3   :  { %v1705_v23 = vmul.f32 %v2325_v19, %v1697_v53 }
 0xaf5   :  { %v1712_v25 = vmul.f32 %v2062_v22, %v1705_v23 }
 0xaf7   :  { %v1719_v4 = vadd.f32 %v2063_v24, %v1712_v25 }
 0xaf9   :  { %2251 = vmatmul.mubr.msk.f32.vlgmr.msra.gmra.mxu0 %vm167_vm5, %v1719_v4 }
 0xafa   :  { %2280 = vmatprep.mubr.msk.f32.mxu0 %vm2329_vm1, %v2328_v0  ;;  %2273 = vmatpush3.msra.mxu0 %v1934_v41  ;;  %vm1908_vm1 = vcmask 257024  }
 0xafb   :  { %2274 = vmatprep.subr.mxu0 %v2328_v0 }
 0xafc   :  { %2275 = vmatpush3.msra.mxu0 %v1933_v42 }
 0xafd   :  { %2276 = vmatprep.subr.mxu0 %v2328_v0 }
 0xafe   :  { %2277 = vmatpush3.msra.mxu0 %v1932_v43 }
 0xaff   :  { %2278 = vmatprep.subr.mxu0 %v2328_v0 }
 0xb00   :  { %2279 = vmatpush3.msra.mxu0 %v1931_v44 }
 0xbb9   :  { %v1795_v30 = vpop.f32.mrf.mxu0 }
 0xbba   :  { %v1796_v21 = vadd.f32 %v2064_v28, %v1795_v30 }
 0xbbb   :  { %v2252_v31 = vpop.f32.mrf.mxu0 }
 0xbbc   :  { %v1799_v29 = vmax.f32 %v1796_v21, 0.0 }
 0xbbe   :  { %2270 = vmatmul.mubr.msk.f32.vlgmr.msra.gmra.mxu1 %vm1806_vm0, %v1799_v29 }
 0xc7e   :  { %v1876_v17 = vpop.f32.mrf.mxu1 }
 0xc7f   :  { %v1877_v32 = vadd.f32 %v2066_v11, %v1876_v17 }
 0xc80   :  { %v2271_v33 = vpop.f32.mrf.mxu1 }
 0xc81   :  { %v1880_v34 = vadd.f32 %v1877_v32, %v1719_v4 }
 0xc83   :  { %v1881_v35 = vsel %vm167_vm5, %v1880_v34, 0.0 }
 0xc84   :  { %1882 = vadd.xlane.f32.xlu0 %v1881_v35 }
 0xd0d   :  { %v1883_v36 = vpop.xlane.xlu0 %1882 }
 0xd0e   :  { %v1884_v37 = vmul.f32 0.03125, %v1883_v36 }
 0xd10   :  { %v1885_v38 = vsub.f32 %v1880_v34, %v1884_v37 }
 0xd12   :  { %v1886_v39 = vmul.f32 %v1885_v38, %v1885_v38 }
 0xd14   :  { %v1887_v40 = vsel %vm167_vm5, %v1886_v39, 0.0 }
 0xd15   :  { %1888 = vadd.xlane.f32.xlu1 %v1887_v40 }
 0xd9e   :  { %v1889_v20 = vpop.xlane.xlu1 %1888 }
 0xd9f   :  { %v1890_v45 = vmul.f32 0.03125, %v1889_v20 }
 0xda1   :  { %v1891_v46 = vadd.f32 1e-05, %v1890_v45 }
 0xda3   :  { %2326 = vrsqrt.f32 %v1891_v46 }
 0xdb0   :  { %v2327_v47 = vpop.eup %2326 }
 0xdb1   :  { %v1893_v49 = vmul.f32 %v2327_v47, %v1885_v38 }
 0xdb3   :  { %v1900_v52 = vmul.f32 %v2068_v48, %v1893_v49 }
 0xdb5   :  { %v1907_v54 = vadd.f32 %v2069_v51, %v1900_v52 }
 0xdb7   :  { %v1909_v55 = vsel %vm1908_vm1, %v1907_v54, 0.0  ;;  %v1919_v0 = vrot.slane %v1907_v54, 4 }
 0xdb8   :  { %v1910_v56 = vrot.slane %v1909_v55, 4 }
 0xdb9   :  { %v1921_v57 = vsel %vm1908_vm1, %v1919_v0, 0.0 }
 0xdba   :  { %v1911_v58 = vadd.f32 %v1910_v56, %v1909_v55  ;;  %v1922_v50 = vrot.slane %v1921_v57, 4 }
 0xdbc   :  { %v1912_v59 = vrot.slane %v1911_v58, 2  ;;  %v1923_v60 = vadd.f32 %v1922_v50, %v1921_v57 }
 0xdbe   :  { %v1913_v61 = vadd.f32 %v1912_v59, %v1911_v58  ;;  %v1924_v62 = vrot.slane %v1923_v60, 2 }
 0xdc0   :  { %v1914_v63 = vrot.slane %v1913_v61, 1  ;;  %v1925_v53 = vadd.f32 %v1924_v62, %v1923_v60 }
 0xdc2   :  { %v1915_v1 = vadd.f32 %v1914_v63, %v1913_v61  ;;  %v1926_v2 = vrot.slane %v1925_v53, 1 }
 0xdc4   :  { %v1927_v3 = vadd.f32 %v1926_v2, %v1925_v53  ;;  %v1917_v5 = vmul.f32 0.25, %v1915_v1 }
 0xdc6   :  { %v1928_v12 = vmul.f32 0.25, %v1927_v3 }
 0xdc8   :  { %v1930_v6 = vsel %vm1929_vm2, %v1917_v5, %v1928_v12 }
 0xdc9   :  { %2281 = vmatmul.mubr.msk.f32.vlgmr.msra.gmra.mxu0 %vm167_vm5, %v1930_v6 }
 0xe89   :  { %v2011_v8 = vpop.f32.mrf.mxu0 }
 0xe8a   :  { %v2012_v9 = vadd.f32 %v2070_v7, %v2011_v8 }
 0xe8b   :  { %v2282_v10 = vpop.f32.mrf.mxu0 }
 0xe8c   :  { %2016 = vst.msk [vmem:[%s2776_s17] sm:$0x3] %vm2015_vm3, %v2012_v9 }

// kernel: integrated_forward.7
= control target key start
LH: loop header
LB: loop body
LE: loop exit
PB: predicated region body
PF: predicated region fallthrough
CT: control target
= control target key end

     0   :  { %s1611_s0 = inlined_call_operand.vmem [shape: f32[2,32], index: 0, kind: input, shape index: {}]   ;;  %s1612_s1 = inlined_call_operand.vmem [shape: f32[2,32,96], index: 1, kind: input, shape index: {}]   ;;  %s1613_s2 = inlined_call_operand.vmem [shape: f32[2,1,96], index: 2, kind: input, shape index: {}]   ;;  %s1614_s3 = inlined_call_operand.vmem [shape: f32[2,32,32], index: 3, kind: input, shape index: {}]   ;;  %s1615_s4 = inlined_call_operand.vmem [shape: f32[2,1,32], index: 4, kind: input, shape index: {}]   ;;  %s1616_s5 = inlined_call_operand.vmem [shape: f32[2,1,32], index: 5, kind: input, shape index: {}]   ;;  %s1617_s6 = inlined_call_operand.vmem [shape: f32[2,1,32], index: 6, kind: input, shape index: {}]   ;;  %s1618_s7 = inlined_call_operand.vmem [shape: f32[2,32,64], index: 7, kind: input, shape index: {}]   ;;  %s1619_s8 = inlined_call_operand.vmem [shape: f32[2,1,64], index: 8, kind: input, shape index: {}]   ;;  %s1620_s9 = inlined_call_operand.vmem [shape: f32[2,64,32], index: 9, kind: input, shape index: {}]   ;;  %s1621_s10 = inlined_call_operand.vmem [shape: f32[2,1,32], index: 10, kind: input, shape index: {}]   ;;  %s1622_s11 = inlined_call_operand.vmem [shape: f32[2,1,32], index: 11, kind: input, shape index: {}]   ;;  %s1623_s12 = inlined_call_operand.vmem [shape: f32[2,1,32], index: 12, kind: input, shape index: {}]   ;;  %s1624_s13 = inlined_call_operand.vmem [shape: f32[32,256], index: 13, kind: input, shape index: {}]   ;;  %s1625_s14 = inlined_call_operand.vmem [shape: f32[1,256], index: 14, kind: input, shape index: {}]   ;;  %s1626_s15 = inlined_call_operand.vmem [shape: f32[2,256], index: 15, kind: output, shape index: {0}]   ;;  %s1627_s16 = inlined_call_operand.hbm [shape: f32[2,32], index: 16, kind: output, shape index: {1}]  }
   0x1   :  { %1628 = sst [smem:[#allocation5_spill]] %s1611_s0 }
   0x2   :  { %v57_v0 = vld [vmem:[%s1612_s1 + $0x18] sm:$0xff]  ;;  %v1241_v1 = vmov 0.0   ;;  %v56_v2 = vld [vmem:[%s1612_s1 + $0x10] sm:$0xff]  ;;  %vm1242_vm0 = vmmov 0  }
   0x3   :  { %1103 = vmatprep.subr.mxu0 %v1241_v1  ;;  %1111 = vmatprep.mubr.msk.f32.mxu0 %vm1242_vm0, %v1241_v1 }
   0x4   :  { %1104 = vmatpush3.msra.mxu0 %v57_v0  ;;  %1114 = vmatprep.subr.mxu1 %v1241_v1 }
   0x5   :  { %22 = vsyncpa [#allocation3], 0  ;;  %1105 = vmatprep.subr.mxu0 %v1241_v1  ;;  %v55_v3 = vld [vmem:[%s1612_s1 + $0x8] sm:$0xff]  ;;  %1122 = vmatprep.mubr.msk.f32.mxu1 %vm1242_vm0, %v1241_v1  ;;  %v54_v4 = vld [vmem:[%s1612_s1] sm:$0xff]  ;;  %s1629_s0 = sld [smem:[#allocation5_spill]]  ;;  %vm88_vm1 = vcmask 261120  }
   0x6   :  { %1106 = vmatpush3.msra.mxu0 %v56_v2  ;;  %v62_v6 = vld [vmem:[%s1614_s3 + $0x18] sm:$0xff]  ;;  %v61_v7 = vld [vmem:[%s1614_s3 + $0x10] sm:$0xff]  ;;  %v60_v8 = vld [vmem:[%s1614_s3 + $0x8] sm:$0xff]  ;;  %s1243_s27 = smov 64   ;;  %vm244_vm2 = vcmask 254976   ;;  %vm359_vm3 = vcmask 523264  }
   0x7   :  { %1107 = vmatprep.subr.mxu0 %v1241_v1  ;;  %1115 = vmatpush3.msra.mxu1 %v62_v6  ;;  %v59_v9 = vld [vmem:[%s1614_s3] sm:$0xff]  ;;  %v69_v26 = vld [vmem:[%s1618_s7 + $0x18] sm:$0xff]  ;;  %v68_v27 = vld [vmem:[%s1618_s7 + $0x10] sm:$0xff] }
   0x8   :  { %1108 = vmatpush3.msra.mxu0 %v55_v3  ;;  %1116 = vmatprep.subr.mxu1 %v1241_v1  ;;  %v1001_v10 = vld [vmem:[%s1613_s2] ss:$0 sm:$0xff]  ;;  %v67_v28 = vld [vmem:[%s1618_s7 + $0x8] sm:$0xff]  ;;  %v78_v30 = vld [vmem:[%s1620_s9 + $0x38] sm:$0xff] }
   0x9   :  { %1109 = vmatprep.subr.mxu0 %v1241_v1  ;;  %1117 = vmatpush3.msra.mxu1 %v61_v7  ;;  %v1003_v15 = vld [vmem:[%s1615_s4] ss:$0 sm:$0xff]  ;;  %v77_v31 = vld [vmem:[%s1620_s9 + $0x30] sm:$0xff]  ;;  %v76_v32 = vld [vmem:[%s1620_s9 + $0x28] sm:$0xff] }
   0xa   :  { %1110 = vmatpush3.msra.mxu0 %v54_v4  ;;  %1118 = vmatprep.subr.mxu1 %v1241_v1  ;;  %v66_v29 = vld [vmem:[%s1618_s7] sm:$0xff]  ;;  %v74_v34 = vld [vmem:[%s1620_s9 + $0x18] sm:$0xff]  ;;  %v73_v44 = vld [vmem:[%s1620_s9 + $0x10] sm:$0xff] }
   0xb   :  { %v53_v5 = vld [vmem:[%s1629_s0] sm:$0x3]  ;;  %1125 = vmatprep.subr.mxu0 %v1241_v1  ;;  %1119 = vmatpush3.msra.mxu1 %v60_v8  ;;  %v72_v45 = vld [vmem:[%s1620_s9 + $0x8] sm:$0xff]  ;;  %v1016_v63 = vld [vmem:[%s1612_s1 + $0x38] sm:$0xff] }
   0xc   :  { %1112 = vmatmul.mubr.msk.f32.vlgmr.msra.gmra.mxu0 %vm88_vm1, %v53_v5  ;;  %1120 = vmatprep.subr.mxu1 %v1241_v1  ;;  %v75_v33 = vld [vmem:[%s1620_s9 + $0x20] sm:$0xff]  ;;  %v1015_v0 = vld [vmem:[%s1612_s1 + $0x30] sm:$0xff]  ;;  %v1014_v2 = vld [vmem:[%s1612_s1 + $0x28] sm:$0xff] }
   0xd   :  { %1133 = vmatprep.mubr.msk.f32.mxu0 %vm1242_vm0, %v1241_v1  ;;  %1121 = vmatpush3.msra.mxu1 %v59_v9  ;;  %v1005_v39 = vld [vmem:[%s1616_s5] ss:$0 sm:$0xff] }
   0xe   :  { %1136 = vmatprep.subr.mxu1 %v1241_v1  ;;  %1126 = vmatpush3.msra.mxu0 %v69_v26  ;;  %v1006_v41 = vld [vmem:[%s1617_s6] ss:$0 sm:$0xff] }
   0xf   :  { %1127 = vmatprep.subr.mxu0 %v1241_v1  ;;  %v71_v46 = vld [vmem:[%s1620_s9] sm:$0xff] }
  0x10   :  { %1128 = vmatpush3.msra.mxu0 %v68_v27  ;;  %v1007_v47 = vld [vmem:[%s1619_s8] ss:$0 sm:$0xff] }
  0x11   :  { %1129 = vmatprep.subr.mxu0 %v1241_v1  ;;  %v1009_v52 = vld [vmem:[%s1621_s10] ss:$0 sm:$0xff] }
  0x12   :  { %1130 = vmatpush3.msra.mxu0 %v67_v28  ;;  %v1013_v3 = vld [vmem:[%s1612_s1 + $0x20] sm:$0xff] }
  0x13   :  { %1131 = vmatprep.subr.mxu0 %v1241_v1  ;;  %v1011_v8 = vld [vmem:[%s1622_s11] ss:$0 sm:$0xff] }
  0x14   :  { %1132 = vmatpush3.msra.mxu0 %v66_v29 }
  0x15   :  { %1155 = vmatprep.subr.mxu0 %v1241_v1 }
  0xcc   :  { %v158_v11 = vpop.f32.mrf.mxu0 }
  0xcd   :  { %v159_v12 = vadd.f32 %v1001_v10, %v158_v11  ;;  %v1012_v10 = vld [vmem:[%s1623_s12] ss:$0 sm:$0xff] }
  0xce   :  { %v1113_v13 = vpop.f32.mrf.mxu0 }
  0xcf   :  { %169 = vrot.lane.b32.xlu0 %v159_v12, %s1243_s27  ;;  %v1021_v13 = vld [vmem:[%s1614_s3 + $0x38] sm:$0xff] }
 0x141   :  { %v170_v14 = vpop.permute.xlu0 %169 }
 0x142   :  { %1123 = vmatmul.mubr.msk.f32.vlgmr.msra.gmra.mxu1 %vm88_vm1, %v170_v14  ;;  %v1020_v14 = vld [vmem:[%s1614_s3 + $0x30] sm:$0xff] }
 0x143   :  { %1152 = vmatprep.mubr.msk.f32.mxu1 %vm1242_vm0, %v1241_v1  ;;  %1137 = vmatpush3.msra.mxu1 %v78_v30 }
 0x144   :  { %1138 = vmatprep.subr.mxu1 %v1241_v1 }
 0x145   :  { %1139 = vmatpush3.msra.mxu1 %v77_v31 }
 0x146   :  { %1140 = vmatprep.subr.mxu1 %v1241_v1 }
 0x147   :  { %1141 = vmatpush3.msra.mxu1 %v76_v32 }
 0x148   :  { %1142 = vmatprep.subr.mxu1 %v1241_v1 }
 0x149   :  { %1143 = vmatpush3.msra.mxu1 %v75_v33  ;;  %v1028_v33 = vld [vmem:[%s1618_s7 + $0x38] sm:$0xff] }
 0x14a   :  { %1144 = vmatprep.subr.mxu1 %v1241_v1 }
 0x14b   :  { %1145 = vmatpush3.msra.mxu1 %v74_v34  ;;  %v1027_v34 = vld [vmem:[%s1618_s7 + $0x30] sm:$0xff] }
 0x14c   :  { %1146 = vmatprep.subr.mxu1 %v1241_v1 }
 0x14d   :  { %1147 = vmatpush3.msra.mxu1 %v73_v44 }
 0x14e   :  { %1148 = vmatprep.subr.mxu1 %v1241_v1 }
 0x14f   :  { %1149 = vmatpush3.msra.mxu1 %v72_v45 }
 0x150   :  { %1150 = vmatprep.subr.mxu1 %v1241_v1 }
 0x151   :  { %1151 = vmatpush3.msra.mxu1 %v71_v46  ;;  %v1045_v46 = vld [vmem:[%s1616_s5 + $0x1] ss:$0 sm:$0xff] }
 0x152   :  { %1177 = vmatprep.subr.mxu1 %v1241_v1 }
 0x202   :  { %v239_v16 = vpop.f32.mrf.mxu1 }
 0x203   :  { %v240_v17 = vadd.f32 %v1003_v15, %v239_v16  ;;  %v1019_v15 = vld [vmem:[%s1614_s3 + $0x28] sm:$0xff]  ;;  %v1018_v16 = vld [vmem:[%s1614_s3 + $0x20] sm:$0xff] }
 0x204   :  { %v1124_v18 = vpop.f32.mrf.mxu1 }
 0x205   :  { %v243_v19 = vadd.f32 %v240_v17, %v53_v5  ;;  %v1041_v17 = vld [vmem:[%s1613_s2 + $0x1] ss:$0 sm:$0xff] }
 0x207   :  { %v245_v20 = vsel %vm244_vm2, %v243_v19, 0.0 }
 0x208   :  { %246 = vadd.xlane.f32.xlu0 %v245_v20 }
 0x291   :  { %v247_v21 = vpop.xlane.xlu0 %246 }
 0x292   :  { %v249_v22 = vmul.f32 0.03125, %v247_v21 }
 0x294   :  { %v250_v23 = vsub.f32 %v243_v19, %v249_v22  ;;  %v1043_v22 = vld [vmem:[%s1615_s4 + $0x1] ss:$0 sm:$0xff] }
 0x296   :  { %v251_v24 = vmul.f32 %v250_v23, %v250_v23 }
 0x298   :  { %v252_v25 = vsel %vm244_vm2, %v251_v24, 0.0 }
 0x299   :  { %253 = vadd.xlane.f32.xlu1 %v252_v25 }
 0x322   :  { %v254_v35 = vpop.xlane.xlu1 %253 }
 0x323   :  { %v255_v36 = vmul.f32 0.03125, %v254_v35  ;;  %v1026_v35 = vld [vmem:[%s1618_s7 + $0x28] sm:$0xff] }
 0x325   :  { %v256_v37 = vadd.f32 1e-05, %v255_v36  ;;  %v1025_v36 = vld [vmem:[%s1618_s7 + $0x20] sm:$0xff] }
 0x327   :  { %1211 = vrsqrt.f32 %v256_v37  ;;  %v1037_v37 = vld [vmem:[%s1620_s9 + $0x78] sm:$0xff] }
 0x334   :  { %v1212_v38 = vpop.eup %1211 }
 0x335   :  { %v258_v40 = vmul.f32 %v1212_v38, %v250_v23  ;;  %v1036_v38 = vld [vmem:[%s1620_s9 + $0x70] sm:$0xff] }
 0x337   :  { %v265_v42 = vmul.f32 %v1005_v39, %v258_v40  ;;  %v1035_v39 = vld [vmem:[%s1620_s9 + $0x68] sm:$0xff]  ;;  %v1034_v40 = vld [vmem:[%s1620_s9 + $0x60] sm:$0xff] }
 0x339   :  { %v272_v43 = vadd.f32 %v1006_v41, %v265_v42  ;;  %v1033_v41 = vld [vmem:[%s1620_s9 + $0x58] sm:$0xff] }
 0x33b   :  { %1134 = vmatmul.mubr.msk.f32.vlgmr.msra.gmra.mxu0 %vm88_vm1, %v272_v43 }
 0x33c   :  { %1163 = vmatprep.mubr.msk.f32.mxu0 %vm1242_vm0, %v1241_v1  ;;  %1156 = vmatpush3.msra.mxu0 %v1016_v63 }
 0x33d   :  { %1157 = vmatprep.subr.mxu0 %v1241_v1 }
 0x33e   :  { %1158 = vmatpush3.msra.mxu0 %v1015_v0 }
 0x33f   :  { %1159 = vmatprep.subr.mxu0 %v1241_v1 }
 0x340   :  { %1160 = vmatpush3.msra.mxu0 %v1014_v2 }
 0x341   :  { %1161 = vmatprep.subr.mxu0 %v1241_v1 }
 0x342   :  { %1162 = vmatpush3.msra.mxu0 %v1013_v3 }
 0x343   :  { %1166 = vmatprep.subr.mxu0 %v1241_v1 }
 0x3fb   :  { %v348_v48 = vpop.f32.mrf.mxu0 }
 0x3fc   :  { %v349_v49 = vadd.f32 %v1007_v47, %v348_v48  ;;  %v1046_v48 = vld [vmem:[%s1617_s6 + $0x1] ss:$0 sm:$0xff] }
 0x3fd   :  { %v1135_v50 = vpop.f32.mrf.mxu0 }
 0x3fe   :  { %v352_v51 = vmax.f32 %v349_v49, 0.0 }
 0x400   :  { %1153 = vmatmul.mubr.msk.f32.vlgmr.msra.gmra.mxu1 %vm359_vm3, %v352_v51  ;;  %v1032_v51 = vld [vmem:[%s1620_s9 + $0x50] sm:$0xff] }
 0x401   :  { %1185 = vmatprep.mubr.msk.f32.mxu1 %vm1242_vm0, %v1241_v1  ;;  %1178 = vmatpush3.msra.mxu1 %v1028_v33 }
 0x402   :  { %1179 = vmatprep.subr.mxu1 %v1241_v1 }
 0x403   :  { %1180 = vmatpush3.msra.mxu1 %v1027_v34 }
 0x404   :  { %1181 = vmatprep.subr.mxu1 %v1241_v1 }
 0x405   :  { %1182 = vmatpush3.msra.mxu1 %v1026_v35 }
 0x406   :  { %1183 = vmatprep.subr.mxu1 %v1241_v1 }
 0x407   :  { %1184 = vmatpush3.msra.mxu1 %v1025_v36 }
 0x4c0   :  { %v429_v53 = vpop.f32.mrf.mxu1 }
 0x4c1   :  { %v430_v54 = vadd.f32 %v1009_v52, %v429_v53  ;;  %v1031_v52 = vld [vmem:[%s1620_s9 + $0x48] sm:$0xff]  ;;  %v1030_v53 = vld [vmem:[%s1620_s9 + $0x40] sm:$0xff] }
 0x4c2   :  { %v1154_v55 = vpop.f32.mrf.mxu1 }
 0x4c3   :  { %v433_v56 = vadd.f32 %v430_v54, %v272_v43  ;;  %v1047_v54 = vld [vmem:[%s1619_s8 + $0x1] ss:$0 sm:$0xff] }
 0x4c5   :  { %v434_v57 = vsel %vm244_vm2, %v433_v56, 0.0 }
 0x4c6   :  { %435 = vadd.xlane.f32.xlu1 %v434_v57 }
 0x54f   :  { %v436_v58 = vpop.xlane.xlu1 %435 }
 0x550   :  { %v437_v59 = vmul.f32 0.03125, %v436_v58 }
 0x552   :  { %v438_v60 = vsub.f32 %v433_v56, %v437_v59  ;;  %v1049_v59 = vld [vmem:[%s1621_s10 + $0x1] ss:$0 sm:$0xff] }
 0x554   :  { %v439_v61 = vmul.f32 %v438_v60, %v438_v60 }
 0x556   :  { %v440_v62 = vsel %vm244_vm2, %v439_v61, 0.0 }
 0x557   :  { %441 = vadd.xlane.f32.xlu1 %v440_v62 }
 0x5e0   :  { %v442_v4 = vpop.xlane.xlu1 %441 }
 0x5e1   :  { %v443_v5 = vmul.f32 0.03125, %v442_v4 }
 0x5e3   :  { %v444_v6 = vadd.f32 1e-05, %v443_v5 }
 0x5e5   :  { %1213 = vrsqrt.f32 %v444_v6  ;;  %v884_v6 = vld [vmem:[%s1624_s13 + $0x38] sm:$0xff] }
 0x5e6   :  { %924 = vmatprep.subr.mxu1 %v884_v6 }
 0x5f2   :  { %v1214_v7 = vpop.eup %1213 }
 0x5f3   :  { %v446_v9 = vmul.f32 %v1214_v7, %v438_v60  ;;  %v883_v7 = vld [vmem:[%s1624_s13 + $0x30] sm:$0xff] }
 0x5f5   :  { %v453_v11 = vmul.f32 %v1011_v8, %v446_v9  ;;  %v882_v8 = vld [vmem:[%s1624_s13 + $0x28] sm:$0xff]  ;;  %v881_v9 = vld [vmem:[%s1624_s13 + $0x20] sm:$0xff] }
 0x5f7   :  { %v460_v12 = vadd.f32 %v1012_v10, %v453_v11  ;;  %v880_v10 = vld [vmem:[%s1624_s13 + $0x18] sm:$0xff]  ;;  %v879_v11 = vld [vmem:[%s1624_s13 + $0x10] sm:$0xff] }
 0x5f9   :  { %1164 = vmatmul.mubr.msk.f32.vlgmr.msra.gmra.mxu0 %vm88_vm1, %v460_v12 }
 0x5fa   :  { %1174 = vmatprep.mubr.msk.f32.mxu0 %vm1242_vm0, %v1241_v1  ;;  %1167 = vmatpush3.msra.mxu0 %v1021_v13  ;;  %v877_v13 = vld [vmem:[%s1624_s13] sm:$0xff] }
 0x5fb   :  { %1168 = vmatprep.subr.mxu0 %v1241_v1 }
 0x5fc   :  { %1169 = vmatpush3.msra.mxu0 %v1020_v14 }
 0x5fd   :  { %1170 = vmatprep.subr.mxu0 %v1241_v1 }
 0x5fe   :  { %1171 = vmatpush3.msra.mxu0 %v1019_v15 }
 0x5ff   :  { %1172 = vmatprep.subr.mxu0 %v1241_v1 }
 0x600   :  { %1173 = vmatpush3.msra.mxu0 %v1018_v16 }
 0x601   :  { %1188 = vmatprep.subr.mxu0 %v1241_v1 }
 0x6b9   :  { %v576_v18 = vpop.f32.mrf.mxu0 }
 0x6ba   :  { %v577_v19 = vadd.f32 %v1041_v17, %v576_v18  ;;  %v1051_v18 = vld [vmem:[%s1622_s11 + $0x1] ss:$0 sm:$0xff] }
 0x6bb   :  { %v1165_v20 = vpop.f32.mrf.mxu0 }
 0x6bc   :  { %587 = vrot.lane.b32.xlu1 %v577_v19, %s1243_s27  ;;  %v1052_v20 = vld [vmem:[%s1623_s12 + $0x1] ss:$0 sm:$0xff] }
 0x72e   :  { %v588_v21 = vpop.permute.xlu1 %587 }
 0x72f   :  { %1175 = vmatmul.mubr.msk.f32.vlgmr.msra.gmra.mxu0 %vm88_vm1, %v588_v21 }
 0x730   :  { %1204 = vmatprep.mubr.msk.f32.mxu0 %vm1242_vm0, %v1241_v1  ;;  %1189 = vmatpush3.msra.mxu0 %v1037_v37 }
 0x731   :  { %1190 = vmatprep.subr.mxu0 %v1241_v1 }
 0x732   :  { %1191 = vmatpush3.msra.mxu0 %v1036_v38 }
 0x733   :  { %1192 = vmatprep.subr.mxu0 %v1241_v1 }
 0x734   :  { %1193 = vmatpush3.msra.mxu0 %v1035_v39 }
 0x735   :  { %1194 = vmatprep.subr.mxu0 %v1241_v1 }
 0x736   :  { %1195 = vmatpush3.msra.mxu0 %v1034_v40 }
 0x737   :  { %1196 = vmatprep.subr.mxu0 %v1241_v1 }
 0x738   :  { %1197 = vmatpush3.msra.mxu0 %v1033_v41 }
 0x739   :  { %1198 = vmatprep.subr.mxu0 %v1241_v1 }
 0x73a   :  { %1199 = vmatpush3.msra.mxu0 %v1032_v51 }
 0x73b   :  { %1200 = vmatprep.subr.mxu0 %v1241_v1 }
 0x73c   :  { %1201 = vmatpush3.msra.mxu0 %v1031_v52 }
 0x73d   :  { %1202 = vmatprep.subr.mxu0 %v1241_v1 }
 0x73e   :  { %1203 = vmatpush3.msra.mxu0 %v1030_v53 }
 0x7ef   :  { %v657_v23 = vpop.f32.mrf.mxu0 }
 0x7f0   :  { %v658_v24 = vadd.f32 %v1043_v22, %v657_v23 }
 0x7f1   :  { %v1176_v25 = vpop.f32.mrf.mxu0 }
 0x7f2   :  { %v661_v26 = vadd.f32 %v658_v24, %v460_v12  ;;  %v878_v12 = vld [vmem:[%s1624_s13 + $0x8] sm:$0xff]  ;;  %s1244_s13 = smov [#allocation2]  }
 0x7f3   :  { %s991_s30 = sshll.u32 %s1244_s13, 4  ;;  %s992_s30 = int_to_ptr.vmem [resolvable:$true] %s991_s30 }
 0x7f4   :  { %v662_v27 = vsel %vm244_vm2, %v661_v26, 0.0  ;;  %s1219_s0 = scalar_lea.vmem %s992_s30, 32  ;;  %p1224_p1 = scmp.lt.s32.totalorder %s992_s30, %s992_s30 }
 0x7f5   :  { %663 = vadd.xlane.f32.xlu1 %v662_v27  ;;  %p1220_p0 = scmp.ne.s32.totalorder %s992_s30, %s1219_s0  ;;  %p1225_p2 = scmp.lt.s32.totalorder %s1219_s0, %s1219_s0 }
 0x7f7   :  { %p1226_p3 = por %p1225_p2, %p1224_p1 }
 0x7f9   :  { %p1227_p4 = pnand %p1226_p3, %p1220_p0 }
 0x87e   :  { %v664_v28 = vpop.xlane.xlu1 %663 }
 0x87f   :  { %v665_v29 = vmul.f32 0.03125, %v664_v28 }
 0x881   :  { %v666_v30 = vsub.f32 %v661_v26, %v665_v29 }
 0x883   :  { %v667_v31 = vmul.f32 %v666_v30, %v666_v30 }
 0x885   :  { %v668_v32 = vsel %vm244_vm2, %v667_v31, 0.0 }
 0x886   :  { %669 = vadd.xlane.f32.xlu0 %v668_v32 }
 0x90f   :  { %v670_v42 = vpop.xlane.xlu0 %669 }
 0x910   :  { %v671_v43 = vmul.f32 0.03125, %v670_v42 }
 0x912   :  { %v672_v44 = vadd.f32 1e-05, %v671_v43 }
 0x914   :  { %1215 = vrsqrt.f32 %v672_v44 }
 0x921   :  { %v1216_v45 = vpop.eup %1215 }
 0x922   :  { %v674_v47 = vmul.f32 %v1216_v45, %v666_v30 }
 0x924   :  { %v681_v49 = vmul.f32 %v1045_v46, %v674_v47 }
 0x926   :  { %v688_v50 = vadd.f32 %v1046_v48, %v681_v49 }
 0x928   :  { %1186 = vmatmul.mubr.msk.f32.vlgmr.msra.gmra.mxu1 %vm88_vm1, %v688_v50 }
 0x929   :  { %964 = vmatprep.mubr.f32.mxu1 %v1241_v1  ;;  %925 = vmatpush1.msra.mxu1 %v883_v7 }
 0x92a   :  { %926 = vmatprep.subr.mxu1 %v882_v8 }
 0x92b   :  { %927 = vmatpush1.msra.mxu1 %v881_v9 }
 0x92c   :  { %928 = vmatprep.subr.mxu1 %v880_v10 }
 0x92d   :  { %929 = vmatpush1.msra.mxu1 %v879_v11 }
 0x92e   :  { %930 = vmatprep.subr.mxu1 %v878_v12 }
 0x92f   :  { %931 = vmatpush1.msra.mxu1 %v877_v13 }
 0x9e8   :  { %v764_v55 = vpop.f32.mrf.mxu1 }
 0x9e9   :  { %v765_v56 = vadd.f32 %v1047_v54, %v764_v55 }
 0x9ea   :  { %v1187_v57 = vpop.f32.mrf.mxu1 }
 0x9eb   :  { %v768_v58 = vmax.f32 %v765_v56, 0.0 }
 0x9ed   :  { %1205 = vmatmul.mubr.msk.f32.vlgmr.msra.gmra.mxu0 %vm359_vm3, %v768_v58 }
 0xaad   :  { %v844_v1 = vpop.f32.mrf.mxu0 }
 0xaae   :  { %v845_v60 = vadd.f32 %v1049_v59, %v844_v1 }
 0xaaf   :  { %v1206_v61 = vpop.f32.mrf.mxu0 }
 0xab0   :  { %v848_v62 = vadd.f32 %v845_v60, %v688_v50 }
 0xab2   :  { %v849_v63 = vsel %vm244_vm2, %v848_v62, 0.0 }
 0xab3   :  { %850 = vadd.xlane.f32.xlu0 %v849_v63 }
 0xb3c   :  { %v851_v0 = vpop.xlane.xlu0 %850 }
 0xb3d   :  { %v852_v2 = vmul.f32 0.03125, %v851_v0 }
 0xb3f   :  { %v853_v3 = vsub.f32 %v848_v62, %v852_v2 }
 0xb41   :  { %v854_v4 = vmul.f32 %v853_v3, %v853_v3 }
 0xb43   :  { %v855_v5 = vsel %vm244_vm2, %v854_v4, 0.0 }
 0xb44   :  { %856 = vadd.xlane.f32.xlu0 %v855_v5 }
 0xbcd   :  { %v857_v14 = vpop.xlane.xlu0 %856 }
 0xbce   :  { %v858_v15 = vmul.f32 0.03125, %v857_v14 }
 0xbd0   :  { %v859_v16 = vadd.f32 1e-05, %v858_v15 }
 0xbd2   :  { %1217 = vrsqrt.f32 %v859_v16 }
 0xbdf   :  { %v1218_v17 = vpop.eup %1217 }
 0xbe0   :  { %v861_v19 = vmul.f32 %v1218_v17, %v853_v3 }
 0xbe2   :  { %v868_v21 = vmul.f32 %v1051_v18, %v861_v19 }
 0xbe4   :  { %v875_v22 = vadd.f32 %v1052_v20, %v868_v21 }
 0xbe6   :  { %1053 = vmatmul.mubr.msk.f32.vlgmr.msra.gmra.mxu1 %vm88_vm1, %v875_v22  ;;  %876 = vst.msk [vmem:[#allocation2] sm:$0x3] %vm244_vm2, %v875_v22 }
 0xbe7   :  { %1230 = shalt.err (!%p1227_p4)
}
 0xbe8   :  { %994 = dma.vmem_to_hbm [thread:$0]  %s992_s30, 32, %s1627_s16, [#allocation3]   ;;  %v887_v23 = vlaneseq  ;;  %v885_v27 = vld [vmem:[%s1625_s14] sm:$0x3] }
 0xbea   :  { %v888_v24 = vshrl.u32 %v887_v23, 7 }
 0xbec   :  { %v889_v25 = vsub.s32 0, %v888_v24  ;;  %v893_v26 = vsub.s32 1, %v888_v24 }
 0xbee   :  { %v890_v28 = vrot.slane %v885_v27, %v889_v25  ;;  %v894_v29 = vrot.slane %v885_v27, %v893_v26 }
 0xca6   :  { %v966_v30 = vpop.f32.mrf.mxu1 }
 0xca7   :  { %v967_v32 = vadd.f32 %v966_v30, %v890_v28 }
 0xca8   :  { %v968_v31 = vpop.f32.mrf.mxu1 }
 0xca9   :  { %v969_v33 = vadd.f32 %v968_v31, %v894_v29 }
 0xcab   :  { %v973_v34 = vcombine.low %v967_v32, %v969_v33 }
 0xcad   :  { %1054 = vst.sshfl [vmem:[%s1626_s15] sm:$0x33 pattern:$0x76325410] %v973_v34 }
 0xcae   :  { %1239 = dma.done.wait [#allocation3], 32  }
 0xcaf   :  { %1240 = vsyncadd [#allocation3], 4294967264 }
 0xcb0   :  { %1000 = vsyncpa [#allocation3], 1 }

</bundles_post_ra>
